<compile_context>
chip_gen: v5e
topology: v5e:2x2
jax: 0.10.0
libtpu: 0.0.40
codegen_flags: <defaults>
</compile_context>

<pallas_src>
import functools

import jax
import jax.numpy as jnp
from jax import lax
from jax.experimental import pallas as pl
from jax.experimental.pallas import tpu as pltpu


def _round_up(a, b):
    return ((a + b - 1) // b) * b


def _conv_bn_relu_kernel(xa_ref, xh_ref, w_ref, shift_ref, o_ref, *, shifts, tm, relu):
    """One M-tile: sum over kh*kw shifted (tm, C_in) @ (C_in, C_out_p) matmuls.

    xa_ref   : (tm, C_in)  f32   current row tile of the flattened padded NHWC input
    xh_ref   : (halo_p, C_in) f32  small halo (rows just past this tile)
    w_ref    : (kh*kw, C_in, C_out_p) bf16  BN-scale-folded weights (resident)
    shift_ref: (1, C_out_p) f32  folded conv-bias / BN shift
    o_ref    : (tm, C_out_p)
    """
    x = jnp.concatenate([xa_ref[...], xh_ref[...]], axis=0)     # (tm + halo_p, C_in) f32
    c_in = x.shape[1]

    acc = None
    for r, off in enumerate(shifts):                            # static unroll, kh*kw steps
        xs = lax.slice(x, (off, 0), (off + tm, c_in))           # shifted window (tm, C_in)
        part = jnp.dot(xs.astype(jnp.bfloat16), w_ref[r],       # bf16 MXU, f32 accumulate
                       preferred_element_type=jnp.float32)
        acc = part if acc is None else acc + part

    y = acc + shift_ref[...]                                    # (tm, C_out_p) f32
    if relu:                                                    # static flag
        y = jnp.maximum(y, 0.0)
    o_ref[...] = y.astype(o_ref.dtype)


@functools.partial(jax.jit,
                   static_argnames=("stride", "padding", "has_bn", "has_relu", "tm"))
def conv_bn_relu(x, conv_w, conv_b, bn_gamma, bn_beta, bn_mean, bn_var,
                 stride=1, padding=1, has_bn=True, has_relu=True, eps=1e-5, tm=512):
    """x: (N, C_in, H, W) NCHW.  conv_w: (C_out, C_in, kh, kw).  Returns NCHW."""
    n, c_in, h, w = x.shape
    c_out, c_in_w, kh, kw = conv_w.shape
    if c_in_w != c_in:
        raise NotImplementedError("groups > 1 not supported")  # TODO(synk): grouped conv

    h_out = (h + 2 * padding - kh) // stride + 1
    w_out = (w + 2 * padding - kw) // stride + 1
    hp = h + 2 * padding
    wp = w + 2 * padding

    # ---- activations: NCHW -> padded NHWC -> flat (N*Hp*Wp, C_in), f32 ----
    x_nhwc = jnp.transpose(x, (0, 2, 3, 1))
    x_pad = jnp.pad(x_nhwc, ((0, 0), (padding, padding), (padding, padding), (0, 0)))
    x_flat = x_pad.reshape(n * hp * wp, c_in).astype(jnp.float32)

    # ---- fold conv bias + inference BN into per-channel scale/shift ----
    if has_bn:
        inv_std = lax.rsqrt(bn_var.astype(jnp.float32) + eps)
        scale = bn_gamma.astype(jnp.float32) * inv_std
        shift = (conv_b.astype(jnp.float32) - bn_mean.astype(jnp.float32)) * scale \
            + bn_beta.astype(jnp.float32)
    else:
        scale = jnp.ones((c_out,), jnp.float32)
        shift = conv_b.astype(jnp.float32)

    # ---- weights: (C_out, C_in, kh, kw) -> (kh*kw, C_in, C_out_p), scale folded, bf16 ----
    c_out_p = _round_up(c_out, 128)                              # lane-dense output
    w_mat = jnp.transpose(conv_w.astype(jnp.float32), (2, 3, 1, 0)).reshape(kh * kw, c_in, c_out)
    w_mat = w_mat * scale[None, None, :]                         # fold BN scale into weights
    w_mat = jnp.pad(w_mat, ((0, 0), (0, 0), (0, c_out_p - c_out))).astype(jnp.bfloat16)
    shift_p = jnp.pad(shift, (0, c_out_p - c_out)).reshape(1, c_out_p)

    # ---- tiling over flattened padded-grid rows (M) with a small halo block ----
    shifts = tuple(i * wp + j for i in range(kh) for j in range(kw))
    max_shift = shifts[-1]                                       # (kh-1)*wp + (kw-1)
    halo_p = max(16, _round_up(max_shift, 16))                   # sublane/bf16-safe halo rows
    tm_eff = _round_up(max(tm, halo_p), halo_p)                  # multiple of halo_p, >= halo_p
    mp = n * hp * wp
    num_tiles = pl.cdiv(mp, tm_eff)
    rows_padded = num_tiles * tm_eff + halo_p                    # halo of last tile stays in-bounds
    x_flat = jnp.pad(x_flat, ((0, rows_padded - mp), (0, 0)))
    halo_blocks_per_tile = tm_eff // halo_p

    kernel = functools.partial(_conv_bn_relu_kernel,
                               shifts=shifts, tm=tm_eff, relu=bool(has_relu))

    k_total = c_in * kh * kw
    flops = 2 * num_tiles * tm_eff * k_total * c_out_p
    bytes_accessed = (num_tiles * (tm_eff + halo_p) * c_in * 4   # activation tile + halo
                      + kh * kw * c_in * c_out_p * 2             # bf16 resident weights
                      + c_out_p * 4                              # shift row
                      + num_tiles * tm_eff * c_out_p * x.dtype.itemsize)

    out_flat = pl.pallas_call(
        kernel,
        out_shape=jax.ShapeDtypeStruct((num_tiles * tm_eff, c_out_p), x.dtype),
        grid_spec=pltpu.PrefetchScalarGridSpec(
            num_scalar_prefetch=0,
            grid=(num_tiles,),
            in_specs=[
                pl.BlockSpec((tm_eff, c_in), lambda m: (m, 0)),            # current tile
                pl.BlockSpec((halo_p, c_in),
                             lambda m: ((m + 1) * halo_blocks_per_tile, 0)),  # small halo
                pl.BlockSpec((kh * kw, c_in, c_out_p), lambda m: (0, 0, 0)),  # resident weights
                pl.BlockSpec((1, c_out_p), lambda m: (0, 0)),
            ],
            out_specs=pl.BlockSpec((tm_eff, c_out_p), lambda m: (m, 0)),
        ),
        compiler_params=pltpu.CompilerParams(
            dimension_semantics=("parallel",),
            vmem_limit_bytes=64 * 1024 * 1024,
        ),
        cost_estimate=pl.CostEstimate(flops=flops, transcendentals=0,
                                      bytes_accessed=bytes_accessed),
    )(x_flat, x_flat, w_mat, shift_p)

    # ---- extract valid output positions (padded grid -> (N, H_out, W_out, C_out)) ----
    out = out_flat[:mp].reshape(n, hp, wp, c_out_p)
    out = out[:, 0:stride * (h_out - 1) + 1:stride,
              0:stride * (w_out - 1) + 1:stride, :c_out]
    return jnp.transpose(out, (0, 3, 1, 2))                      # back to NCHW


if __name__ == "__main__":
    key = jax.random.PRNGKey(0)
    k_x, k_w, k_b, k_g, k_be, k_m, k_v = jax.random.split(key, 7)

    N, C_IN, C_OUT, H, W, KS = 2, 4, 8, 16, 16, 3

    x = jax.random.normal(k_x, (N, C_IN, H, W), jnp.float32)
    conv_w = jax.random.normal(k_w, (C_OUT, C_IN, KS, KS), jnp.float32) * 0.1
    conv_b = jax.random.normal(k_b, (C_OUT,), jnp.float32) * 0.1
    bn_gamma = jax.random.normal(k_g, (C_OUT,), jnp.float32) * 0.1 + 1.0
    bn_beta = jax.random.normal(k_be, (C_OUT,), jnp.float32) * 0.1
    bn_mean = jax.random.normal(k_m, (C_OUT,), jnp.float32) * 0.1
    bn_var = jax.random.uniform(k_v, (C_OUT,), jnp.float32, 0.5, 1.5)

    def reference(x, stride, padding, has_bn, has_relu):
        y = lax.conv_general_dilated(
            x, conv_w, window_strides=(stride, stride),
            padding=((padding, padding), (padding, padding)),
            dimension_numbers=("NCHW", "OIHW", "NCHW"),
        ) + conv_b[None, :, None, None]
        if has_bn:
            inv_std = 1.0 / jnp.sqrt(bn_var + 1e-5)
            y = (y - bn_mean[None, :, None, None]) * (bn_gamma * inv_std)[None, :, None, None] \
                + bn_beta[None, :, None, None]
        if has_relu:
            y = jnp.maximum(y, 0.0)
        return y

    # (stride, padding, has_bn, has_relu): conv+bn+relu, strided conv, plain conv.
    cases = [(1, 1, True, True), (2, 1, True, True), (1, 1, False, False)]
    for (s, p, hb, hr) in cases:
        out = conv_bn_relu(x, conv_w, conv_b, bn_gamma, bn_beta, bn_mean, bn_var,
                           stride=s, padding=p, has_bn=hb, has_relu=hr)
        jax.block_until_ready(out)
        ref = reference(x, s, p, hb, hr)
        assert out.shape == ref.shape, (out.shape, ref.shape)
        # Tolerance sized for bf16 MXU operands with f32 accumulation.
        assert jnp.allclose(out, ref, atol=3e-2, rtol=3e-2), (
            (s, p, hb, hr), float(jnp.max(jnp.abs(out - ref))))

    print("KERNEL_OK")
</pallas_src>

<mosaic_0001>
module attributes {stable_mosaic.version = 11 : i64} {
  func.func @_conv_bn_relu_kernel(%arg0: i32, %arg1: memref<528x4xf32, #tpu.memory_space<vmem>>, %arg2: memref<48x4xf32, #tpu.memory_space<vmem>>, %arg3: memref<9x4x128xbf16, #tpu.memory_space<vmem>>, %arg4: memref<1x128xf32, #tpu.memory_space<vmem>>, %arg5: memref<528x128xf32, #tpu.memory_space<vmem>>) attributes {dimension_semantics = [#tpu.dimension_semantics<parallel>], iteration_bounds = array<i64: 2>, scalar_prefetch = 0 : i64, scratch_operands = 0 : i64, tpu.core_type = #tpu.core_type<tc>, window_params = [{transform_indices = @transform_0, window_bounds = array<i64: 528, 4>}, {transform_indices = @transform_1, window_bounds = array<i64: 48, 4>}, {pipeline_mode = #tpu.pipeline_mode<synchronous>, transform_indices = @transform_2, window_bounds = array<i64: 9, 4, 128>}, {pipeline_mode = #tpu.pipeline_mode<synchronous>, transform_indices = @transform_3, window_bounds = array<i64: 1, 128>}, {transform_indices = @transform_4, window_bounds = array<i64: 528, 128>}]} {
    %c0 = arith.constant 0 : index
    %c0_0 = arith.constant 0 : index
    %0 = vector.load %arg1[%c0, %c0_0] : memref<528x4xf32, #tpu.memory_space<vmem>>, vector<528x4xf32>
    %c0_1 = arith.constant 0 : index
    %c0_2 = arith.constant 0 : index
    %1 = vector.load %arg2[%c0_1, %c0_2] : memref<48x4xf32, #tpu.memory_space<vmem>>, vector<48x4xf32>
    %2 = tpu.concatenate %0, %1 in 0 : vector<528x4xf32>, vector<48x4xf32> -> vector<576x4xf32>
    %3 = vector.extract_strided_slice %2 {offsets = [0, 0], sizes = [528, 4], strides = [1, 1]} : vector<576x4xf32> to vector<528x4xf32>
    %4 = arith.truncf %3 : vector<528x4xf32> to vector<528x4xbf16>
    %c0_3 = arith.constant 0 : index
    %c0_4 = arith.constant 0 : index
    %c0_5 = arith.constant 0 : index
    %5 = vector.load %arg3[%c0_3, %c0_4, %c0_5] : memref<9x4x128xbf16, #tpu.memory_space<vmem>>, vector<1x4x128xbf16>
    %6 = vector.shape_cast %5 : vector<1x4x128xbf16> to vector<4x128xbf16>
    %cst = arith.constant dense<0.000000e+00> : vector<528x128xf32>
    %7 = tpu.matmul %4, %6, %cst {dimension_numbers = #tpu.dot_dimension_numbers<[1], [0], [0], [1], [0, 0, 1, 1], [], []>} : vector<528x4xbf16>, vector<4x128xbf16>, vector<528x128xf32> -> vector<528x128xf32>
    %8 = vector.extract_strided_slice %2 {offsets = [1, 0], sizes = [528, 4], strides = [1, 1]} : vector<576x4xf32> to vector<528x4xf32>
    %9 = arith.truncf %8 : vector<528x4xf32> to vector<528x4xbf16>
    %c1 = arith.constant 1 : index
    %c0_6 = arith.constant 0 : index
    %c0_7 = arith.constant 0 : index
    %10 = vector.load %arg3[%c1, %c0_6, %c0_7] : memref<9x4x128xbf16, #tpu.memory_space<vmem>>, vector<1x4x128xbf16>
    %11 = vector.shape_cast %10 : vector<1x4x128xbf16> to vector<4x128xbf16>
    %cst_8 = arith.constant dense<0.000000e+00> : vector<528x128xf32>
    %12 = tpu.matmul %9, %11, %cst_8 {dimension_numbers = #tpu.dot_dimension_numbers<[1], [0], [0], [1], [0, 0, 1, 1], [], []>} : vector<528x4xbf16>, vector<4x128xbf16>, vector<528x128xf32> -> vector<528x128xf32>
    %13 = arith.addf %7, %12 : vector<528x128xf32>
    %14 = vector.extract_strided_slice %2 {offsets = [2, 0], sizes = [528, 4], strides = [1, 1]} : vector<576x4xf32> to vector<528x4xf32>
    %15 = arith.truncf %14 : vector<528x4xf32> to vector<528x4xbf16>
    %c2 = arith.constant 2 : index
    %c0_9 = arith.constant 0 : index
    %c0_10 = arith.constant 0 : index
    %16 = vector.load %arg3[%c2, %c0_9, %c0_10] : memref<9x4x128xbf16, #tpu.memory_space<vmem>>, vector<1x4x128xbf16>
    %17 = vector.shape_cast %16 : vector<1x4x128xbf16> to vector<4x128xbf16>
    %cst_11 = arith.constant dense<0.000000e+00> : vector<528x128xf32>
    %18 = tpu.matmul %15, %17, %cst_11 {dimension_numbers = #tpu.dot_dimension_numbers<[1], [0], [0], [1], [0, 0, 1, 1], [], []>} : vector<528x4xbf16>, vector<4x128xbf16>, vector<528x128xf32> -> vector<528x128xf32>
    %19 = arith.addf %13, %18 : vector<528x128xf32>
    %20 = vector.extract_strided_slice %2 {offsets = [18, 0], sizes = [528, 4], strides = [1, 1]} : vector<576x4xf32> to vector<528x4xf32>
    %21 = arith.truncf %20 : vector<528x4xf32> to vector<528x4xbf16>
    %c3 = arith.constant 3 : index
    %c0_12 = arith.constant 0 : index
    %c0_13 = arith.constant 0 : index
    %22 = vector.load %arg3[%c3, %c0_12, %c0_13] : memref<9x4x128xbf16, #tpu.memory_space<vmem>>, vector<1x4x128xbf16>
    %23 = vector.shape_cast %22 : vector<1x4x128xbf16> to vector<4x128xbf16>
    %cst_14 = arith.constant dense<0.000000e+00> : vector<528x128xf32>
    %24 = tpu.matmul %21, %23, %cst_14 {dimension_numbers = #tpu.dot_dimension_numbers<[1], [0], [0], [1], [0, 0, 1, 1], [], []>} : vector<528x4xbf16>, vector<4x128xbf16>, vector<528x128xf32> -> vector<528x128xf32>
    %25 = arith.addf %19, %24 : vector<528x128xf32>
    %26 = vector.extract_strided_slice %2 {offsets = [19, 0], sizes = [528, 4], strides = [1, 1]} : vector<576x4xf32> to vector<528x4xf32>
    %27 = arith.truncf %26 : vector<528x4xf32> to vector<528x4xbf16>
    %c4 = arith.constant 4 : index
    %c0_15 = arith.constant 0 : index
    %c0_16 = arith.constant 0 : index
    %28 = vector.load %arg3[%c4, %c0_15, %c0_16] : memref<9x4x128xbf16, #tpu.memory_space<vmem>>, vector<1x4x128xbf16>
    %29 = vector.shape_cast %28 : vector<1x4x128xbf16> to vector<4x128xbf16>
    %cst_17 = arith.constant dense<0.000000e+00> : vector<528x128xf32>
    %30 = tpu.matmul %27, %29, %cst_17 {dimension_numbers = #tpu.dot_dimension_numbers<[1], [0], [0], [1], [0, 0, 1, 1], [], []>} : vector<528x4xbf16>, vector<4x128xbf16>, vector<528x128xf32> -> vector<528x128xf32>
    %31 = arith.addf %25, %30 : vector<528x128xf32>
    %32 = vector.extract_strided_slice %2 {offsets = [20, 0], sizes = [528, 4], strides = [1, 1]} : vector<576x4xf32> to vector<528x4xf32>
    %33 = arith.truncf %32 : vector<528x4xf32> to vector<528x4xbf16>
    %c5 = arith.constant 5 : index
    %c0_18 = arith.constant 0 : index
    %c0_19 = arith.constant 0 : index
    %34 = vector.load %arg3[%c5, %c0_18, %c0_19] : memref<9x4x128xbf16, #tpu.memory_space<vmem>>, vector<1x4x128xbf16>
    %35 = vector.shape_cast %34 : vector<1x4x128xbf16> to vector<4x128xbf16>
    %cst_20 = arith.constant dense<0.000000e+00> : vector<528x128xf32>
    %36 = tpu.matmul %33, %35, %cst_20 {dimension_numbers = #tpu.dot_dimension_numbers<[1], [0], [0], [1], [0, 0, 1, 1], [], []>} : vector<528x4xbf16>, vector<4x128xbf16>, vector<528x128xf32> -> vector<528x128xf32>
    %37 = arith.addf %31, %36 : vector<528x128xf32>
    %38 = vector.extract_strided_slice %2 {offsets = [36, 0], sizes = [528, 4], strides = [1, 1]} : vector<576x4xf32> to vector<528x4xf32>
    %39 = arith.truncf %38 : vector<528x4xf32> to vector<528x4xbf16>
    %c6 = arith.constant 6 : index
    %c0_21 = arith.constant 0 : index
    %c0_22 = arith.constant 0 : index
    %40 = vector.load %arg3[%c6, %c0_21, %c0_22] : memref<9x4x128xbf16, #tpu.memory_space<vmem>>, vector<1x4x128xbf16>
    %41 = vector.shape_cast %40 : vector<1x4x128xbf16> to vector<4x128xbf16>
    %cst_23 = arith.constant dense<0.000000e+00> : vector<528x128xf32>
    %42 = tpu.matmul %39, %41, %cst_23 {dimension_numbers = #tpu.dot_dimension_numbers<[1], [0], [0], [1], [0, 0, 1, 1], [], []>} : vector<528x4xbf16>, vector<4x128xbf16>, vector<528x128xf32> -> vector<528x128xf32>
    %43 = arith.addf %37, %42 : vector<528x128xf32>
    %44 = vector.extract_strided_slice %2 {offsets = [37, 0], sizes = [528, 4], strides = [1, 1]} : vector<576x4xf32> to vector<528x4xf32>
    %45 = arith.truncf %44 : vector<528x4xf32> to vector<528x4xbf16>
    %c7 = arith.constant 7 : index
    %c0_24 = arith.constant 0 : index
    %c0_25 = arith.constant 0 : index
    %46 = vector.load %arg3[%c7, %c0_24, %c0_25] : memref<9x4x128xbf16, #tpu.memory_space<vmem>>, vector<1x4x128xbf16>
    %47 = vector.shape_cast %46 : vector<1x4x128xbf16> to vector<4x128xbf16>
    %cst_26 = arith.constant dense<0.000000e+00> : vector<528x128xf32>
    %48 = tpu.matmul %45, %47, %cst_26 {dimension_numbers = #tpu.dot_dimension_numbers<[1], [0], [0], [1], [0, 0, 1, 1], [], []>} : vector<528x4xbf16>, vector<4x128xbf16>, vector<528x128xf32> -> vector<528x128xf32>
    %49 = arith.addf %43, %48 : vector<528x128xf32>
    %50 = vector.extract_strided_slice %2 {offsets = [38, 0], sizes = [528, 4], strides = [1, 1]} : vector<576x4xf32> to vector<528x4xf32>
    %51 = arith.truncf %50 : vector<528x4xf32> to vector<528x4xbf16>
    %c8 = arith.constant 8 : index
    %c0_27 = arith.constant 0 : index
    %c0_28 = arith.constant 0 : index
    %52 = vector.load %arg3[%c8, %c0_27, %c0_28] : memref<9x4x128xbf16, #tpu.memory_space<vmem>>, vector<1x4x128xbf16>
    %53 = vector.shape_cast %52 : vector<1x4x128xbf16> to vector<4x128xbf16>
    %cst_29 = arith.constant dense<0.000000e+00> : vector<528x128xf32>
    %54 = tpu.matmul %51, %53, %cst_29 {dimension_numbers = #tpu.dot_dimension_numbers<[1], [0], [0], [1], [0, 0, 1, 1], [], []>} : vector<528x4xbf16>, vector<4x128xbf16>, vector<528x128xf32> -> vector<528x128xf32>
    %55 = arith.addf %49, %54 : vector<528x128xf32>
    %c0_30 = arith.constant 0 : index
    %c0_31 = arith.constant 0 : index
    %56 = vector.load %arg4[%c0_30, %c0_31] : memref<1x128xf32, #tpu.memory_space<vmem>>, vector<1x128xf32>
    %57 = vector.broadcast %56 : vector<1x128xf32> to vector<528x128xf32>
    %58 = arith.addf %55, %57 : vector<528x128xf32>
    %cst_32 = arith.constant 0.000000e+00 : f32
    %59 = vector.broadcast %cst_32 : f32 to vector<528x128xf32>
    %60 = arith.maximumf %58, %59 : vector<528x128xf32>
    %c0_33 = arith.constant 0 : index
    %c0_34 = arith.constant 0 : index
    %61 = vector.load %arg5[%c0_33, %c0_34] : memref<528x128xf32, #tpu.memory_space<vmem>>, vector<528x128xf32>
    tpu.vector_store %arg5[%c0_33, %c0_34], %60 {strides = array<i32>} : memref<528x128xf32, #tpu.memory_space<vmem>>, vector<528x128xf32>,
    return
  }
  func.func @transform_0(%arg0: i32) -> (i32, i32) {
    %c0_i32 = arith.constant 0 : i32
    %c0_i32_0 = arith.constant 0 : i32
    return %arg0, %c0_i32 : i32, i32
  }
  func.func @transform_1(%arg0: i32) -> (i32, i32) {
    %c1_i32 = arith.constant 1 : i32
    %0 = arith.addi %arg0, %c1_i32 : i32
    %c11_i32 = arith.constant 11 : i32
    %1 = arith.muli %0, %c11_i32 : i32
    %c0_i32 = arith.constant 0 : i32
    %c0_i32_0 = arith.constant 0 : i32
    return %1, %c0_i32 : i32, i32
  }
  func.func @transform_2(%arg0: i32) -> (i32, i32, i32) {
    %c0_i32 = arith.constant 0 : i32
    %c0_i32_0 = arith.constant 0 : i32
    %c0_i32_1 = arith.constant 0 : i32
    %c0_i32_2 = arith.constant 0 : i32
    return %c0_i32, %c0_i32_0, %c0_i32_1 : i32, i32, i32
  }
  func.func @transform_3(%arg0: i32) -> (i32, i32) {
    %c0_i32 = arith.constant 0 : i32
    %c0_i32_0 = arith.constant 0 : i32
    %c0_i32_1 = arith.constant 0 : i32
    return %c0_i32, %c0_i32_0 : i32, i32
  }
  func.func @transform_4(%arg0: i32) -> (i32, i32) {
    %c0_i32 = arith.constant 0 : i32
    %c0_i32_0 = arith.constant 0 : i32
    return %arg0, %c0_i32 : i32, i32
  }
}

</mosaic_0001>

<bundles_post_ra>
// kernel: conv_bn_relu.1
= control target key start
LH: loop header
LB: loop body
LE: loop exit
PB: predicated region body
PF: predicated region fallthrough
CT: control target
= control target key end

     0   :  { %s4558_s15 = smov 0   ;;  %s6704_s0 = inlined_call_operand.vmem [shape: f32[1104,4], index: 0, kind: input, shape index: {}, may-alias: {0,1}]   ;;  %s6705_s1 = inlined_call_operand.vmem [shape: f32[1104,4], index: 1, kind: input, shape index: {}, may-alias: {0,1}]   ;;  %s6706_s2 = inlined_call_operand.vmem [shape: bf16[9,4,128], index: 2, kind: input, shape index: {}]   ;;  %s6707_s3 = inlined_call_operand.vmem [shape: f32[1,128], index: 3, kind: input, shape index: {}]   ;;  %s6708_s4 = inlined_call_operand.vmem [shape: f32[1056,128], index: 4, kind: output, shape index: {}]  }
   0x1 LB: > { %s4194_s16 = sadd.s32 4294967295, %s4531_s15   ;;  %p4198_p0 = scmp.ge.s32.totalorder %s4531_s15, 1  ;;  %s4531_s15 = sphi %s4558_s15, %s14_s15  }
   0x2   : > { %p190_p1 = scmp.lt.s32.totalorder %s4531_s15, 3 }
   0x4   : > { %p191_p2 = pnand %p4198_p0, %p190_p1 }
   0x6   : > { %194 = sbr.rel (%p191_p2) target bundleno = 1366 (0x556), region = 36 }
   0xb   : > { %v4203_v0 = vld [vmem:[%s6706_s2 + $0x2] sm:$0x3]  ;;  %vm735_vm0 = vcmask 1041408   ;;  %s4571_s19 = smul.u32 66, %s4194_s16  ;;  %v4270_v2 = vld [vmem:[%s6706_s2 + $0x4] sm:$0x3] }
   0xc   : > { %v737_v1 = vsel %vm735_vm0, %v4203_v0, 0  ;;  %v362_v3 = vld [vmem:[%s6706_s2] sm:$0x3]  ;;  %v1360_v4 = vsel %vm735_vm0, %v4270_v2, 0  ;;  %v4338_v6 = vld [vmem:[%s6706_s2 + $0x8] sm:$0x3] }
   0xd   : > { %4510 = vmatpush.bf16.msra.mxu1 %v737_v1  ;;  %4511 = vmatpush.bf16.msra.mxu2 %v737_v1  ;;  %p232_p3 = scmp.lt.s32.totalorder %s4571_s19, 137  ;;  %v980_v5 = vsel %vm735_vm0, %v362_v3, 0  ;;  %v2109_v7 = vsel %vm735_vm0, %v4338_v6, 0  ;;  %vm366_vm1 = vsmask.f32 7424  ;;  %vm635_vm2 = vcmask 31744  }
   0xe   : > { %746 = vmatpush.bf16.msra.mxu0 %v737_v1  ;;  %4512 = vmatpush.bf16.msra.mxu3 %v737_v1  ;;  %s4892_s7 = sadd.s32 1, %s4194_s16  ;;  %vm1192_vm3 = vcmask 1046528   ;;  %vm1863_vm4 = vsmask.f32 6400  ;;  %vm3024_vm5 = vsmask.f32 5376 }
   0xf   : > { %s233_s26 = scalar_select %p232_p3, %s4571_s19, 137  ;;  %vm2353_vm6 = vcmask 1045504   ;;  %vm3514_vm7 = vcmask 1044480  }
  0x10   : > { %s4200_s8 = smul.u32 66, %s4892_s7  ;;  %p252_p5 = scmp.lt.s32.totalorder %s4571_s19, 131 }
  0x11   : > { %1369 = vmatpush.bf16.msrb.mxu2 %v1360_v4  ;;  %989 = vmatpush.bf16.msrb.mxu1 %v980_v5  ;;  %s4199_s27 = sshll.u32 %s233_s26, 3 }
  0x12   : > { %2118 = vmatpush.bf16.msrb.mxu0 %v2109_v7  ;;  %s4591_s30 = scalar_lea.vmem %s6704_s0, %s4199_s27  ;;  %p244_p4 = scmp.lt.s32.totalorder %s4200_s8, 137 }
  0x13   : > { %v276_v8 = vld [vmem:[%s4591_s30 + $0x90] sm:$0xff]  ;;  %v277_v9 = vld [vmem:[%s4591_s30 + $0x98] sm:$0xff]  ;;  %v278_v10 = vld [vmem:[%s4591_s30 + $0xa0] sm:$0xff]  ;;  %s7271_s19 = smov (!%p252_p5, %s4571_s19), 131 }
  0x14   : > { %v279_v11 = vld [vmem:[%s4591_s30 + $0xa8] sm:$0xff]  ;;  %v4597_v12 = vpack.c.bf16 %v277_v9, %v276_v8  ;;  %v294_v13 = vld [vmem:[%s4591_s30 + $0x120] sm:$0xff]  ;;  %v296_v16 = vld [vmem:[%s4591_s30 + $0x130] sm:$0xff]  ;;  %s7269_s8 = smov (!%p244_p4, %s4200_s8), 137  ;;  %s4202_s25 = sshll.u32 %s7271_s19, 3 }
  0x15   : > { %v295_v14 = vld [vmem:[%s4591_s30 + $0x128] sm:$0xff]  ;;  %v4601_v15 = vpack.c.bf16 %v279_v11, %v278_v10  ;;  %v297_v17 = vld [vmem:[%s4591_s30 + $0x138] sm:$0xff]  ;;  %v258_v19 = vld [vmem:[%s4591_s30] sm:$0xff]  ;;  %s4201_s9 = sshll.u32 %s7269_s8, 3  ;;  %s6096_s28 = scalar_lea.vmem %s6708_s4, %s4202_s25 }
  0x16   : > { %v4605_v18 = vpack.c.bf16 %v295_v14, %v294_v13  ;;  %v4609_v20 = vshll.u32 %v4597_v12, 16  ;;  %v4612_v21 = vshrl.u32 %v4597_v12, 16  ;;  %v4614_v22 = vpack.c.bf16 %v297_v17, %v296_v16  ;;  %v259_v23 = vld [vmem:[%s4591_s30 + $0x8] sm:$0xff]  ;;  %v260_v24 = vld [vmem:[%s4591_s30 + $0x10] sm:$0xff]  ;;  %v261_v25 = vld [vmem:[%s4591_s30 + $0x18] sm:$0xff]  ;;  %s4959_s12 = scalar_lea.vmem %s6705_s1, %s4201_s9 }
  0x17   : > { %v4620_v26 = vshll.u32 %v4601_v15, 16  ;;  %v4628_v29 = vpack.c.bf16 %v259_v23, %v258_v19  ;;  %v4634_v32 = vpack.c.bf16 %v261_v25, %v260_v24  ;;  %v280_v42 = vld [vmem:[%s4591_s30 + $0xb0] sm:$0xff]  ;;  %v281_v43 = vld [vmem:[%s4591_s30 + $0xb8] sm:$0xff]  ;;  %v298_v46 = vld [vmem:[%s4591_s30 + $0x140] sm:$0xff]  ;;  %v4673_v60 = vshrl.u32 %v4601_v15, 16 }
  0x18   : > { %6867 = vst [vmem:[#allocation2_spill] sm:$0xff] %v4605_v18  ;;  %v4623_v27 = vshll.u32 %v4605_v18, 16  ;;  %v4626_v28 = vshrl.u32 %v4605_v18, 16  ;;  %v6711_v30 = vrot.slane %v4609_v20, 1  ;;  %v4632_v31 = vshll.u32 %v4614_v22, 16  ;;  %v299_v47 = vld [vmem:[%s4591_s30 + $0x148] sm:$0xff] }
  0x19   : > { %6868 = vst [vmem:[#allocation3_spill] sm:$0xff] %v4609_v20  ;;  %v449_v33 = vrot.slane %v4620_v26, 1  ;;  %v368_v35 = vshrl.u32 %v4628_v29, 16  ;;  %v370_v36 = vshll.u32 %v4628_v29, 16  ;;  %v6709_v39 = vshll.u32 %v4634_v32, 16  ;;  %v262_v51 = vld [vmem:[%s4591_s30 + $0x20] sm:$0xff] }
  0x1a   : > { %6869 = vst [vmem:[#allocation4_spill] sm:$0xff] %v4612_v21  ;;  %v6713_v34 = vrot.slane %v4623_v27, 1  ;;  %v445_v37 = vor.u32 %v4612_v21, %v6711_v30  ;;  %v521_v38 = vrot.slane %v4632_v31, 1  ;;  %v4658_v50 = vpack.c.bf16 %v281_v43, %v280_v42  ;;  %v263_v52 = vld [vmem:[%s4591_s30 + $0x28] sm:$0xff]  ;;  %v312_v55 = vld [vmem:[%s4591_s30 + $0x1b0] sm:$0xff]  ;;  %v313_v56 = vld [vmem:[%s4591_s30 + $0x1b8] sm:$0xff] }
  0x1b   : > { %6870 = vst [vmem:[#allocation5_spill] sm:$0xff] %v4614_v22  ;;  %v372_v41 = vrot.slane %v370_v36, 1  ;;  %v377_v45 = vrot.slane %v6709_v39, 1  ;;  %v4663_v54 = vpack.c.bf16 %v299_v47, %v298_v46  ;;  %v314_v57 = vld [vmem:[%s4591_s30 + $0x1c0] sm:$0xff]  ;;  %v315_v58 = vld [vmem:[%s4591_s30 + $0x1c8] sm:$0xff]  ;;  %v4670_v59 = vpack.c.bf16 %v263_v52, %v262_v51  ;;  %v301_v36 = vld [vmem:[%s4591_s30 + $0x158] sm:$0xff] }
  0x1c   : > { %6871 = vst [vmem:[#allocation6_spill] sm:$0xff] %v4620_v26  ;;  %v517_v40 = vor.u32 %v4626_v28, %v6713_v34  ;;  %v450_v44 = vsel %vm366_vm1, %v445_v37, %v449_v33  ;;  %v4676_v61 = vshll.u32 %v4658_v50, 16  ;;  %v4679_v62 = vshrl.u32 %v4614_v22, 16  ;;  %v282_v24 = vld [vmem:[%s4591_s30 + $0xc0] sm:$0xff]  ;;  %v283_v25 = vld [vmem:[%s4591_s30 + $0xc8] sm:$0xff] }
  0x1d   : > { %6872 = vst [vmem:[#allocation7_spill] sm:$0xff] %v4626_v28  ;;  %4213 = vmatmul.msk.bf16.vlgmr.msra.gmra.mxu1 %vm635_vm2, %v450_v44  ;;  %v373_v49 = vor.u32 %v372_v41, %v368_v35  ;;  %v4682_v63 = vshll.u32 %v4663_v54, 16  ;;  %v4684_v0 = vpack.c.bf16 %v313_v56, %v312_v55  ;;  %v4686_v1 = vpack.c.bf16 %v315_v58, %v314_v57  ;;  %v300_v35 = vld [vmem:[%s4591_s30 + $0x150] sm:$0xff]  ;;  %v265_v41 = vld [vmem:[%s4591_s30 + $0x38] sm:$0xff]  ;;  %v4304_v43 = vld [vmem:[%s6706_s2 + $0x6] sm:$0x3] }
  0x1e   : > { %6873 = vst [vmem:[#allocation8_spill] sm:$0xff] %v4632_v31  ;;  %v522_v48 = vsel %vm366_vm1, %v517_v40, %v521_v38  ;;  %v6710_v2 = vshrl.u32 %v4634_v32, 16  ;;  %v4690_v3 = vshll.u32 %v4670_v59, 16  ;;  %v453_v7 = vor.u32 %v4673_v60, %v449_v33  ;;  %v264_v40 = vld [vmem:[%s4591_s30 + $0x30] sm:$0xff]  ;;  %v287_v34 = vld [vmem:[%s4591_s30 + $0xe8] sm:$0xff]  ;;  %v309_v31 = vld [vmem:[%s4591_s30 + $0x198] sm:$0xff] }
  0x1f   : > { %6874 = vst [vmem:[#allocation9_spill] sm:$0xff] %v4634_v32  ;;  %4222 = vmatmul.msk.bf16.vlgmr.msra.gmra.mxu2 %vm635_vm2, %v522_v48  ;;  %v378_v53 = vsel %vm366_vm1, %v373_v49, %v377_v45  ;;  %v4693_v4 = vshll.u32 %v4684_v0, 16  ;;  %v4696_v5 = vshrl.u32 %v4684_v0, 16  ;;  %v4699_v6 = vshll.u32 %v4686_v1, 16  ;;  %v316_v44 = vld [vmem:[%s4591_s30 + $0x1d0] sm:$0xff]  ;;  %v311_v18 = vld [vmem:[%s4591_s30 + $0x1a8] sm:$0xff] }
  0x20   : > { %6875 = vst [vmem:[#allocation10_spill] sm:$0xff] %v4663_v54  ;;  %4204 = vmatmul.msk.bf16.vlgmr.msra.gmra.mxu0 %vm635_vm2, %v378_v53  ;;  %v457_v8 = vrot.slane %v4676_v61, 1  ;;  %v525_v9 = vor.u32 %v4679_v62, %v521_v38  ;;  %v529_v10 = vrot.slane %v4682_v63, 1  ;;  %v381_v14 = vor.u32 %v6710_v2, %v377_v45  ;;  %v317_v45 = vld [vmem:[%s4591_s30 + $0x1d8] sm:$0xff] }
  0x21   : > { %6876 = vst [vmem:[#allocation11_spill] sm:$0xff] %v4670_v59  ;;  %v6712_v11 = vrot.slane %v4693_v4, 1  ;;  %v593_v13 = vrot.slane %v4699_v6, 1  ;;  %v385_v16 = vrot.slane %v4690_v3, 1  ;;  %v4724_v38 = vpack.c.bf16 %v283_v25, %v282_v24 }
  0x22   : > { %6877 = vst [vmem:[#allocation12_spill] sm:$0xff] %v4673_v60  ;;  %v458_v19 = vsel %vm366_vm1, %v453_v7, %v457_v8  ;;  %v530_v23 = vsel %vm366_vm1, %v525_v9, %v529_v10  ;;  %v4728_v42 = vpack.c.bf16 %v301_v36, %v300_v35  ;;  %v4736_v46 = vpack.c.bf16 %v265_v41, %v264_v40  ;;  %v284_v35 = vld [vmem:[%s4591_s30 + $0xd0] sm:$0xff]  ;;  %v285_v36 = vld [vmem:[%s4591_s30 + $0xd8] sm:$0xff]  ;;  %v266_v41 = vld [vmem:[%s4591_s30 + $0x40] sm:$0xff] }
  0x23   : > { %6878 = vst [vmem:[#allocation13_spill] sm:$0xff] %v4679_v62  ;;  %v589_v17 = vor.u32 %v4696_v5, %v6712_v11  ;;  %v386_v37 = vsel %vm366_vm1, %v381_v14, %v385_v16  ;;  %v1619_v47 = vsel %vm735_vm0, %v4304_v43, 0  ;;  %v4739_v48 = vpack.c.bf16 %v317_v45, %v316_v44  ;;  %v267_v43 = vld [vmem:[%s4591_s30 + $0x48] sm:$0xff]  ;;  %v318_v45 = vld [vmem:[%s4591_s30 + $0x1e0] sm:$0xff] }
  0x24   : > { %6879 = vst [vmem:[#allocation14_spill] sm:$0xff] %v4682_v63  ;;  %v4742_v49 = vshrl.u32 %v4686_v1, 16  ;;  %v4745_v51 = vshrl.u32 %v4658_v50, 16  ;;  %v4748_v52 = vshll.u32 %v4724_v38, 16  ;;  %1628 = vmatpush.bf16.msrb.mxu3 %v1619_v47  ;;  %v4751_v53 = vshrl.u32 %v4663_v54, 16  ;;  %v319_v47 = vld [vmem:[%s4591_s30 + $0x1e8] sm:$0xff] }
  0x25   : > { %6880 = vst [vmem:[#allocation15_spill] sm:$0xff] %v4684_v0  ;;  %v594_v33 = vsel %vm366_vm1, %v589_v17, %v593_v13  ;;  %v4754_v55 = vshll.u32 %v4728_v42, 16  ;;  %v4757_v56 = vshll.u32 %v4739_v48, 16  ;;  %v4760_v57 = vshrl.u32 %v4670_v59, 16  ;;  %v286_v11 = vld [vmem:[%s4591_s30 + $0xe0] sm:$0xff] }
  0x26   : > { %6881 = vst [vmem:[#allocation16_spill] sm:$0xff] %v4686_v1  ;;  %4231 = vmatmul.msk.bf16.vlgmr.msra.gmra.mxu3 %vm635_vm2, %v594_v33  ;;  %v4763_v58 = vshll.u32 %v4736_v46, 16  ;;  %v597_v7 = vor.u32 %v4742_v49, %v593_v13  ;;  %v461_v14 = vor.u32 %v4745_v51, %v457_v8  ;;  %v465_v17 = vrot.slane %v4748_v52, 1 }
  0x27   : > { %6882 = vst [vmem:[#allocation17_spill] sm:$0xff] %v4690_v3  ;;  %v601_v9 = vrot.slane %v4757_v56, 1  ;;  %v389_v24 = vor.u32 %v4760_v57, %v385_v16  ;;  %v4784_v40 = vpack.c.bf16 %v285_v36, %v284_v35  ;;  %v4816_v36 = vshrl.u32 %v4736_v46, 16 }
  0x28   : > { %6883 = vst [vmem:[#allocation18_spill] sm:$0xff] %v4693_v4  ;;  %v393_v25 = vrot.slane %v4763_v58, 1  ;;  %v466_v13 = vsel %vm366_vm1, %v461_v14, %v465_v17  ;;  %v4795_v14 = vpack.c.bf16 %v319_v47, %v318_v45 }
  0x29   : > { %6884 = vst [vmem:[#allocation19_spill] sm:$0xff] %v4696_v5  ;;  %v602_v33 = vsel %vm366_vm1, %v597_v7, %v601_v9  ;;  %v4793_v7 = vpack.c.bf16 %v267_v43, %v266_v41 }
  0x2a   : > { %6885 = vst [vmem:[#allocation20_spill] sm:$0xff] %v4699_v6  ;;  %v394_v16 = vsel %vm366_vm1, %v389_v24, %v393_v25  ;;  %v4801_v24 = vshrl.u32 %v4724_v38, 16  ;;  %v4813_v35 = vshll.u32 %v4795_v14, 16  ;;  %v397_v39 = vor.u32 %v4816_v36, %v393_v25  ;;  %v321_v6 = vld [vmem:[%s4591_s30 + $0x1f8] sm:$0xff] }
  0x2b   : > { %6886 = vst [vmem:[#allocation21_spill] sm:$0xff] %v4728_v42 }
  0x2c   : > { %6887 = vst [vmem:[#allocation22_spill] sm:$0xff] %v4736_v46  ;;  %v469_v41 = vor.u32 %v4801_v24, %v465_v17 }
  0x2d   : > { %4214 = vmatmul.msk.bf16.gmra.mxu1 %vm635_vm2, %v458_v19  ;;  %6888 = vst [vmem:[#allocation23_spill] sm:$0xff] %v4739_v48  ;;  %v533_v19 = vor.u32 %v4751_v53, %v529_v10  ;;  %v303_v10 = vld [vmem:[%s4591_s30 + $0x168] sm:$0xff] }
  0x2e   : > { %6889 = vst [vmem:[#allocation24_spill] sm:$0xff] %v4742_v49 }
  0x2f   : > { %4223 = vmatmul.msk.bf16.gmra.mxu2 %vm635_vm2, %v530_v23  ;;  %6890 = vst [vmem:[#allocation25_spill] sm:$0xff] %v4751_v53  ;;  %v537_v23 = vrot.slane %v4754_v55, 1  ;;  %v291_v53 = vld [vmem:[%s4591_s30 + $0x108] sm:$0xff] }
  0x30   : > { %4205 = vmatmul.msk.bf16.gmra.mxu0 %vm635_vm2, %v386_v37  ;;  %6891 = vst [vmem:[#allocation26_spill] sm:$0xff] %v4754_v55  ;;  %v302_v37 = vld [vmem:[%s4591_s30 + $0x160] sm:$0xff]  ;;  %v323_v55 = vld [vmem:[%s4591_s30 + $0x208] sm:$0xff] }
  0x31   : > { %6892 = vst [vmem:[#allocation27_spill] sm:$0xff] %v4757_v56  ;;  %v538_v8 = vsel %vm366_vm1, %v533_v19, %v537_v23  ;;  %v4788_v44 = vpack.c.bf16 %v303_v10, %v302_v37  ;;  %v4798_v19 = vshrl.u32 %v4739_v48, 16  ;;  %v4819_v37 = vshll.u32 %v4793_v7, 16 }
  0x32   : > { %6893 = vst [vmem:[#allocation28_spill] sm:$0xff] %v4760_v57  ;;  %v4840_v56 = vpack.c.bf16 %v287_v34, %v286_v11 }
  0x33   : > { %6894 = vst [vmem:[#allocation29_spill] sm:$0xff] %v4763_v58  ;;  %v605_v10 = vor.u32 %v4798_v19, %v601_v9  ;;  %v401_v2 = vrot.slane %v4819_v37, 1  ;;  %v4863_v11 = vshrl.u32 %v4788_v44, 16 }
  0x34   : > { %6895 = vst [vmem:[#allocation30_spill] sm:$0xff] %v4788_v44  ;;  %v4860_v34 = vshll.u32 %v4840_v56, 16 }
  0x35   : > { %6896 = vst [vmem:[#allocation31_spill] sm:$0xff] %v4793_v7  ;;  %v402_v25 = vsel %vm366_vm1, %v397_v39, %v401_v2  ;;  %v4857_v39 = vshrl.u32 %v4784_v40, 16 }
  0x36   : > { %4232 = vmatmul.msk.bf16.gmra.mxu3 %vm635_vm2, %v602_v33  ;;  %6897 = vst [vmem:[#allocation32_spill] sm:$0xff] %v4795_v14  ;;  %v4804_v33 = vshll.u32 %v4784_v40, 16 }
  0x37   : > { %6898 = vst [vmem:[#allocation33_spill] sm:$0xff] %v4798_v19  ;;  %v269_v19 = vld [vmem:[%s4591_s30 + $0x58] sm:$0xff] }
  0x38   : > { %6901 = vst [vmem:[#allocation36_spill] sm:$0xff] %v4813_v35  ;;  %v473_v43 = vrot.slane %v4804_v33, 1 }
  0x39   : > { %6902 = vst [vmem:[#allocation37_spill] sm:$0xff] %v4816_v36 }
  0x3a   : > { %6903 = vst [vmem:[#allocation38_spill] sm:$0xff] %v4819_v37  ;;  %v474_v9 = vsel %vm366_vm1, %v469_v41, %v473_v43 }
  0x3b   : > { %6908 = vst [vmem:[#allocation43_spill] sm:$0xff] %v4863_v11 }
  0x3d   : > { %4215 = vmatmul.msk.bf16.gmra.mxu1 %vm635_vm2, %v466_v13  ;;  %v4807_v13 = vshrl.u32 %v4728_v42, 16  ;;  %v308_v42 = vld [vmem:[%s4591_s30 + $0x190] sm:$0xff] }
  0x3f   : > { %4224 = vmatmul.msk.bf16.gmra.mxu2 %vm635_vm2, %v538_v8  ;;  %6899 = vst [vmem:[#allocation34_spill] sm:$0xff] %v4807_v13  ;;  %v4810_v8 = vshll.u32 %v4788_v44, 16  ;;  %v541_v45 = vor.u32 %v4807_v13, %v537_v23  ;;  %v305_v23 = vld [vmem:[%s4591_s30 + $0x178] sm:$0xff] }
  0x40   : > { %4206 = vmatmul.msk.bf16.gmra.mxu0 %vm635_vm2, %v394_v16  ;;  %v609_v16 = vrot.slane %v4813_v35, 1  ;;  %v304_v35 = vld [vmem:[%s4591_s30 + $0x170] sm:$0xff] }
  0x41   : > { %6900 = vst [vmem:[#allocation35_spill] sm:$0xff] %v4810_v8  ;;  %v545_v47 = vrot.slane %v4810_v8, 1  ;;  %v4844_v41 = vpack.c.bf16 %v305_v23, %v304_v35 }
  0x42   : > { %v610_v30 = vsel %vm366_vm1, %v605_v10, %v609_v16  ;;  %v268_v10 = vld [vmem:[%s4591_s30 + $0x50] sm:$0xff] }
  0x43   : > { %v546_v17 = vsel %vm366_vm1, %v541_v45, %v545_v47  ;;  %6904 = vst [vmem:[#allocation39_spill] sm:$0xff] %v4844_v41  ;;  %v320_v45 = vld [vmem:[%s4591_s30 + $0x1f0] sm:$0xff]  ;;  %v4849_v49 = vpack.c.bf16 %v269_v19, %v268_v10  ;;  %v4866_v35 = vshll.u32 %v4844_v41, 16  ;;  %v4872_v19 = vshrl.u32 %v4793_v7, 16 }
  0x44   : > { %v4851_v48 = vpack.c.bf16 %v321_v6, %v320_v45  ;;  %v481_v10 = vrot.slane %v4860_v34, 1  ;;  %v549_v45 = vor.u32 %v4863_v11, %v545_v47  ;;  %v306_v47 = vld [vmem:[%s4591_s30 + $0x180] sm:$0xff] }
  0x45   : > { %6905 = vst [vmem:[#allocation40_spill] sm:$0xff] %v4849_v49  ;;  %v405_v5 = vor.u32 %v4872_v19, %v401_v2  ;;  %v322_v11 = vld [vmem:[%s4591_s30 + $0x200] sm:$0xff] }
  0x46   : > { %4233 = vmatmul.msk.bf16.gmra.mxu3 %vm635_vm2, %v610_v30  ;;  %6906 = vst [vmem:[#allocation41_spill] sm:$0xff] %v4851_v48  ;;  %v4854_v30 = vshrl.u32 %v4795_v14, 16  ;;  %v4869_v6 = vshll.u32 %v4851_v48, 16  ;;  %v553_v14 = vrot.slane %v4866_v35, 1 }
  0x47   : > { %6909 = vst [vmem:[#allocation44_spill] sm:$0xff] %v4866_v35  ;;  %v307_v35 = vld [vmem:[%s4591_s30 + $0x188] sm:$0xff] }
  0x48   : > { %6907 = vst [vmem:[#allocation42_spill] sm:$0xff] %v4854_v30  ;;  %v617_v23 = vrot.slane %v4869_v6, 1  ;;  %v4905_v8 = vpack.c.bf16 %v307_v35, %v306_v47  ;;  %v4924_v35 = vshrl.u32 %v4844_v41, 16 }
  0x49   : > { %6910 = vst [vmem:[#allocation45_spill] sm:$0xff] %v4869_v6  ;;  %v554_v6 = vsel %vm366_vm1, %v549_v45, %v553_v14  ;;  %v271_v45 = vld [vmem:[%s4591_s30 + $0x68] sm:$0xff] }
  0x4a   : > { %6911 = vst [vmem:[#allocation46_spill] sm:$0xff] %v4872_v19 }
  0x4b   : > { %6913 = vst [vmem:[#allocation48_spill] sm:$0xff] %v4905_v8 }
  0x4c   : > { %6918 = vst [vmem:[#allocation53_spill] sm:$0xff] %v4924_v35 }
  0x4d   : > { %4216 = vmatmul.msk.bf16.gmra.mxu1 %vm635_vm2, %v474_v9  ;;  %v4875_v9 = vshll.u32 %v4849_v49, 16 }
  0x4f   : > { %4225 = vmatmul.msk.bf16.gmra.mxu2 %vm635_vm2, %v546_v17  ;;  %6912 = vst [vmem:[#allocation47_spill] sm:$0xff] %v4875_v9  ;;  %v613_v17 = vor.u32 %v4854_v30, %v609_v16  ;;  %v409_v1 = vrot.slane %v4875_v9, 1  ;;  %v289_v30 = vld [vmem:[%s4591_s30 + $0xf8] sm:$0xff] }
  0x50   : > { %4207 = vmatmul.msk.bf16.gmra.mxu0 %vm635_vm2, %v402_v25  ;;  %v477_v25 = vor.u32 %v4857_v39, %v473_v43  ;;  %v288_v43 = vld [vmem:[%s4591_s30 + $0xf0] sm:$0xff] }
  0x51   : > { %v618_v0 = vsel %vm366_vm1, %v613_v17, %v617_v23  ;;  %v410_v2 = vsel %vm366_vm1, %v405_v5, %v409_v1  ;;  %v4900_v17 = vpack.c.bf16 %v289_v30, %v288_v43  ;;  %v4918_v5 = vshrl.u32 %v4840_v56, 16 }
  0x52   : > { %v482_v16 = vsel %vm366_vm1, %v477_v25, %v481_v10  ;;  %v270_v25 = vld [vmem:[%s4591_s30 + $0x60] sm:$0xff] }
  0x53   : > { %v4910_v13 = vpack.c.bf16 %v271_v45, %v270_v25  ;;  %v4921_v30 = vshll.u32 %v4900_v17, 16  ;;  %v485_v25 = vor.u32 %v4918_v5, %v481_v10 }
  0x55   : > { %6914 = vst [vmem:[#allocation49_spill] sm:$0xff] %v4910_v13  ;;  %v489_v45 = vrot.slane %v4921_v30, 1 }
  0x56   : > { %4234 = vmatmul.msk.bf16.gmra.mxu3 %vm635_vm2, %v618_v0  ;;  %v4912_v0 = vpack.c.bf16 %v323_v55, %v322_v11  ;;  %6917 = vst [vmem:[#allocation52_spill] sm:$0xff] %v4921_v30  ;;  %v4933_v55 = vshrl.u32 %v4849_v49, 16  ;;  %v4936_v11 = vshll.u32 %v4910_v13, 16 }
  0x58   : > { %6915 = vst [vmem:[#allocation50_spill] sm:$0xff] %v4912_v0  ;;  %v4930_v43 = vshll.u32 %v4912_v0, 16  ;;  %v413_v44 = vor.u32 %v4933_v55, %v409_v1  ;;  %v417_v63 = vrot.slane %v4936_v11, 1 }
  0x59   : > { %6921 = vst [vmem:[#allocation56_spill] sm:$0xff] %v4933_v55 }
  0x5a   : > { %6920 = vst [vmem:[#allocation55_spill] sm:$0xff] %v4930_v43  ;;  %v418_v1 = vsel %vm366_vm1, %v413_v44, %v417_v63 }
  0x5b   : > { %6922 = vst [vmem:[#allocation57_spill] sm:$0xff] %v4936_v11 }
  0x5d   : > { %4217 = vmatmul.msk.bf16.gmra.mxu1 %vm635_vm2, %v482_v16  ;;  %v4915_v16 = vshrl.u32 %v4851_v48, 16  ;;  %v557_v48 = vor.u32 %v4924_v35, %v553_v14  ;;  %v4978_v35 = vshrl.u32 %v4900_v17, 16 }
  0x5f   : > { %4226 = vmatmul.msk.bf16.gmra.mxu2 %vm635_vm2, %v554_v6  ;;  %6916 = vst [vmem:[#allocation51_spill] sm:$0xff] %v4915_v16  ;;  %v4927_v6 = vshll.u32 %v4905_v8, 16  ;;  %v621_v47 = vor.u32 %v4915_v16, %v617_v23  ;;  %v490_v16 = vsel %vm366_vm1, %v485_v25, %v489_v45  ;;  %v4966_v25 = vpack.c.bf16 %v309_v31, %v308_v42 }
  0x60   : > { %4208 = vmatmul.msk.bf16.gmra.mxu0 %vm635_vm2, %v410_v2  ;;  %v625_v2 = vrot.slane %v4930_v43, 1  ;;  %v290_v43 = vld [vmem:[%s4591_s30 + $0x100] sm:$0xff]  ;;  %6928 = vst [vmem:[#allocation63_spill] sm:$0xff] %v4978_v35 }
  0x61   : > { %6919 = vst [vmem:[#allocation54_spill] sm:$0xff] %v4927_v6  ;;  %v561_v41 = vrot.slane %v4927_v6, 1  ;;  %v4962_v14 = vpack.c.bf16 %v291_v53, %v290_v43  ;;  %v4975_v6 = vshrl.u32 %v4912_v0, 16  ;;  %v4984_v43 = vshrl.u32 %v4905_v8, 16 }
  0x62   : > { %v626_v23 = vsel %vm366_vm1, %v621_v47, %v625_v2  ;;  %v273_v47 = vld [vmem:[%s4591_s30 + $0x78] sm:$0xff]  ;;  %6924 = vst [vmem:[#allocation59_spill] sm:$0xff] %v4966_v25  ;;  %v4987_v31 = vshll.u32 %v4966_v25, 16 }
  0x63   : > { %v562_v10 = vsel %vm366_vm1, %v557_v48, %v561_v41  ;;  %6923 = vst [vmem:[#allocation58_spill] sm:$0xff] %v4962_v14  ;;  %v272_v48 = vld [vmem:[%s4591_s30 + $0x70] sm:$0xff]  ;;  %v4981_v53 = vshll.u32 %v4962_v14, 16  ;;  %v565_v8 = vor.u32 %v4984_v43, %v561_v41 }
  0x64   : > { %6927 = vst [vmem:[#allocation62_spill] sm:$0xff] %v4975_v6 }
  0x65   : > { %6929 = vst [vmem:[#allocation64_spill] sm:$0xff] %v4981_v53  ;;  %v497_v0 = vrot.slane %v4981_v53, 1 }
  0x66   : > { %4235 = vmatmul.msk.bf16.gmra.mxu3 %vm635_vm2, %v626_v23  ;;  %v324_v23 = vld [vmem:[%s4959_s12] sm:$0xff]  ;;  %6930 = vst [vmem:[#allocation65_spill] sm:$0xff] %v4984_v43 }
  0x67   : > { %v4972_v44 = vpack.c.bf16 %v324_v23, %v324_v23  ;;  %6931 = vst [vmem:[#allocation66_spill] sm:$0xff] %v4987_v31  ;;  %v493_v23 = vor.u32 %v4978_v35, %v489_v45  ;;  %v293_v45 = vld [vmem:[%s4591_s30 + $0x118] sm:$0xff] }
  0x69   : > { %6926 = vst [vmem:[#allocation61_spill] sm:$0xff] %v4972_v44  ;;  %v631_v42 = vshll.u32 %v4972_v44, 16  ;;  %v569_v44 = vrot.slane %v4987_v31, 1  ;;  %v498_v22 = vsel %vm366_vm1, %v493_v23, %v497_v0  ;;  %v274_v31 = vld [vmem:[%s4591_s30 + $0x80] sm:$0xff]  ;;  %v5024_v23 = vshrl.u32 %v4962_v14, 16 }
  0x6b   : > { %6937 = vst [vmem:[#allocation72_spill] sm:$0xff] %v5024_v23 }
  0x6d   : > { %4218 = vmatmul.msk.bf16.gmra.mxu1 %vm635_vm2, %v490_v16  ;;  %v4970_v16 = vpack.c.bf16 %v273_v47, %v272_v48  ;;  %v629_v48 = vor.u32 %v4975_v6, %v625_v2  ;;  %v633_v47 = vrot.slane %v631_v42, 1  ;;  %v570_v2 = vsel %vm366_vm1, %v565_v8, %v569_v44  ;;  %v292_v42 = vld [vmem:[%s4591_s30 + $0x110] sm:$0xff]  ;;  %v310_v6 = vld [vmem:[%s4591_s30 + $0x1a0] sm:$0xff] }
  0x6f   : > { %4227 = vmatmul.msk.bf16.gmra.mxu2 %vm635_vm2, %v562_v10  ;;  %6925 = vst [vmem:[#allocation60_spill] sm:$0xff] %v4970_v16  ;;  %v4991_v10 = vshrl.u32 %v4910_v13, 16  ;;  %v634_v28 = vsel %vm366_vm1, %v629_v48, %v633_v47  ;;  %v275_v48 = vld [vmem:[%s4591_s30 + $0x88] sm:$0xff]  ;;  %v5018_v47 = vpack.c.bf16 %v311_v18, %v310_v6  ;;  %v1194_v6 = vrot.slane %v4634_v32, 1 }
  0x70   : > { %4209 = vmatmul.msk.bf16.gmra.mxu0 %vm635_vm2, %v418_v1  ;;  %v4994_v1 = vshll.u32 %v4970_v16, 16  ;;  %v5021_v8 = vpack.c.bf16 %v275_v48, %v274_v31  ;;  %v1196_v31 = vrot.slane %v4670_v59, 1 }
  0x71   : > { %6932 = vst [vmem:[#allocation67_spill] sm:$0xff] %v4991_v10  ;;  %v421_v62 = vor.u32 %v4991_v10, %v417_v63  ;;  %v5014_v63 = vpack.c.bf16 %v293_v45, %v292_v42  ;;  %v501_v42 = vor.u32 %v5024_v23, %v497_v0 }
  0x72   : > { %6933 = vst [vmem:[#allocation68_spill] sm:$0xff] %v4994_v1  ;;  %v425_v54 = vrot.slane %v4994_v1, 1  ;;  %v5039_v18 = vshll.u32 %v5021_v8, 16  ;;  %v5050_v53 = vsel %vm1192_vm3, %v1194_v6, %v1196_v31 }
  0x73   : > { %6934 = vst [vmem:[#allocation69_spill] sm:$0xff] %v5014_v63 }
  0x74   : > { %v426_v41 = vsel %vm366_vm1, %v421_v62, %v425_v54  ;;  %6935 = vst [vmem:[#allocation70_spill] sm:$0xff] %v5018_v47  ;;  %v5033_v62 = vshll.u32 %v5018_v47, 16 }
  0x75   : > { %6936 = vst [vmem:[#allocation71_spill] sm:$0xff] %v5021_v8 }
  0x76   : > { %4236 = vmatmul.msk.bf16.gmra.mxu3 %vm635_vm2, %v634_v28  ;;  %v5027_v28 = vshll.u32 %v5014_v63, 16  ;;  %6940 = vst [vmem:[#allocation75_spill] sm:$0xff] %v5033_v62  ;;  %v577_v48 = vrot.slane %v5033_v62, 1 }
  0x77   : > { %6942 = vst [vmem:[#allocation77_spill] sm:$0xff] %v5039_v18 }
  0x78   : > { %6938 = vst [vmem:[#allocation73_spill] sm:$0xff] %v5027_v28  ;;  %v505_v45 = vrot.slane %v5027_v28, 1  ;;  %v6945_v28 = vrot.slane %v4623_v27, 1 }
  0x7a   : > { %v506_v30 = vsel %vm366_vm1, %v501_v42, %v505_v45  ;;  %v4440_v42 = vld [vmem:[%s6706_s2 + $0xe] sm:$0x3] }
  0x7d   : > { %4219 = vmatmul.msk.bf16.gmra.mxu1 %vm635_vm2, %v498_v22  ;;  %v5030_v22 = vshrl.u32 %v4966_v25, 16  ;;  %v433_v25 = vrot.slane %v5039_v18, 1 }
  0x7f   : > { %4228 = vmatmul.msk.bf16.gmra.mxu2 %vm635_vm2, %v570_v2  ;;  %6939 = vst [vmem:[#allocation74_spill] sm:$0xff] %v5030_v22  ;;  %v5036_v2 = vshrl.u32 %v4970_v16, 16 }
  0x80   : > { %4210 = vmatmul.msk.bf16.gmra.mxu0 %vm635_vm2, %v426_v41  ;;  %v573_v41 = vor.u32 %v5030_v22, %v569_v44 }
  0x81   : > { %6941 = vst [vmem:[#allocation76_spill] sm:$0xff] %v5036_v2  ;;  %v429_v43 = vor.u32 %v5036_v2, %v425_v54  ;;  %v4406_v54 = vld [vmem:[%s6706_s2 + $0xc] sm:$0x3] }
  0x82   : > { %v578_v35 = vsel %vm366_vm1, %v573_v41, %v577_v48  ;;  %v2780_v44 = vsel %vm735_vm0, %v4406_v54, 0  ;;  %v3270_v41 = vsel %vm735_vm0, %v4440_v42, 0  ;;  %v5076_v54 = vshrl.u32 %v5018_v47, 16  ;;  %v4474_v42 = vld [vmem:[%s6706_s2 + $0x10] sm:$0x3] }
  0x83   : > { %v434_v0 = vsel %vm366_vm1, %v429_v43, %v433_v25  ;;  %2789 = vmatpush.bf16.msra.mxu2 %v2780_v44  ;;  %3279 = vmatpush.bf16.msra.mxu3 %v3270_v41  ;;  %v1198_v44 = vrot.slane %v4736_v46, 1  ;;  %v3682_v22 = vsel %vm735_vm0, %v4474_v42, 0 }
  0x84   : > { %6943 = vst [vmem:[#allocation78_spill] sm:$0xff] %v5076_v54  ;;  %v581_v41 = vor.u32 %v5076_v54, %v577_v48  ;;  %3691 = vmatpush.bf16.msra.mxu0 %v3682_v22 }
  0x86   : > { %4305 = vmatmul.msk.bf16.vlgmr.msrb.gmra.mxu3 %vm635_vm2, %v5050_v53 }
  0x8d   : > { %4220 = vmatmul.msk.bf16.gmra.mxu1 %vm635_vm2, %v506_v30  ;;  %v4372_v30 = vld [vmem:[%s6706_s2 + $0xa] sm:$0x3] }
  0x8e   : > { %v2521_v43 = vsel %vm735_vm0, %v4372_v30, 0 }
  0x8f   : > { %4229 = vmatmul.msk.bf16.gmra.mxu2 %vm635_vm2, %v578_v35  ;;  %v5072_v35 = vshrl.u32 %v5014_v63, 16  ;;  %2530 = vmatpush.bf16.msra.mxu1 %v2521_v43  ;;  %v5090_v43 = vsel %vm1192_vm3, %v1196_v31, %v1198_v44  ;;  %v6946_v63 = vrot.slane %v4693_v4, 1  ;;  %v1867_v4 = vrot.slane %v4760_v57, 1 }
  0x90   : > { %4211 = vmatmul.msk.bf16.gmra.mxu0 %vm635_vm2, %v434_v0  ;;  %v5079_v0 = vshrl.u32 %v5021_v8, 16 }
  0x91   : > { %v509_v62 = vor.u32 %v5072_v35, %v505_v45  ;;  %v586_v45 = vsel %vm366_vm1, %v581_v41, %v6946_v63  ;;  %v6950_v63 = vshrl.u32 %v4634_v32, 16  ;;  %v6951_v41 = vshll.u32 %v4634_v32, 16 }
  0x92   : > { %6944 = vst [vmem:[#allocation79_spill] sm:$0xff] %v5079_v0  ;;  %v437_v30 = vor.u32 %v5079_v0, %v433_v25  ;;  %v6947_v25 = vrot.slane %v4609_v20, 1 }
  0x93   : > { %v514_v23 = vsel %vm366_vm1, %v509_v62, %v6945_v28  ;;  %v1864_v31 = vrot.slane %v6950_v63, 1 }
  0x94   : > { %v442_v22 = vsel %vm366_vm1, %v437_v30, %v6947_v25  ;;  %v1868_v30 = vrot.slane %v4690_v3, 2  ;;  %v1193_v25 = vrot.slane %v4628_v29, 1 }
  0x96   : > { %4306 = vmatmul.msk.bf16.gmra.mxu3 %vm635_vm2, %v5090_v43  ;;  %v1869_v54 = vor.u32 %v1868_v30, %v1867_v4  ;;  %v1872_v30 = vrot.slane %v4763_v58, 2 }
  0x9a   : > { %v5092_v47 = vpop.f32.mrf.mxu1 }
  0x9d   : > { %v5102_v48 = vpop.f32.mrf.mxu0  ;;  %4221 = vmatmul.msk.bf16.gmra.mxu1 %vm635_vm2, %v514_v23  ;;  %v1865_v23 = vrot.slane %v6951_v41, 2  ;;  %v1195_v41 = vsel %vm1192_vm3, %v1193_v25, %v1194_v6 }
  0x9f   : > { %4230 = vmatmul.msk.bf16.gmra.mxu2 %vm635_vm2, %v586_v45  ;;  %v1200_v45 = vrot.slane %v4793_v7, 1 }
  0xa0   : > { %4212 = vmatmul.msk.bf16.gmra.mxu0 %vm635_vm2, %v442_v22 }
  0xa2   : > { %v5110_v28 = vpop.f32.mrf.mxu2  ;;  %v5112_v62 = vpop.f32.mrf.mxu1 }
  0xa3   : > { %6948 = vst [vmem:[#allocation80_spill] sm:$0xff] %v5110_v28  ;;  %v1866_v28 = vor.u32 %v1865_v23, %v1864_v31  ;;  %v1871_v23 = vrot.slane %v4816_v36, 1  ;;  %v1875_v36 = vrot.slane %v4872_v19, 1  ;;  %v1879_v19 = vrot.slane %v4933_v55, 1 }
  0xa4   : > { %6949 = vst [vmem:[#allocation81_spill] sm:$0xff] %v5112_v62  ;;  %v5127_v62 = vsel %vm1192_vm3, %v1198_v44, %v1200_v45  ;;  %v1883_v55 = vrot.slane %v4991_v10, 1 }
  0xa5   : > { %v5116_v42 = vpop.f32.mrf.mxu0  ;;  %v1870_v57 = vsel %vm1863_vm4, %v1866_v28, %v1869_v54 }
  0xa6   : > { %4307 = vmatmul.msk.bf16.gmra.mxu3 %vm635_vm2, %v5127_v62 }
  0xa9   : > { %v5140_v4 = vpop.f32.mrf.mxu3 }
  0xaa   : > { %v5124_v22 = vpop.f32.mrf.mxu2  ;;  %v5129_v63 = vpop.f32.mrf.mxu1  ;;  %6953 = vst [vmem:[#allocation83_spill] sm:$0xff] %v5140_v4 }
  0xab   : > { %6952 = vst [vmem:[#allocation82_spill] sm:$0xff] %v5124_v22 }
  0xad   : > { %v5134_v3 = vpop.f32.mrf.mxu0  ;;  %4237 = vmatmul.msk.bf16.vlgmr.msrb.gmra.mxu1 %vm635_vm2, %v4628_v29  ;;  %v1202_v29 = vrot.slane %v4849_v49, 1 }
  0xaf   : > { %4271 = vmatmul.msk.bf16.vlgmr.msrb.gmra.mxu2 %vm635_vm2, %v1195_v41  ;;  %v1873_v41 = vor.u32 %v1872_v30, %v1871_v23  ;;  %v1203_v4 = vsel %vm1192_vm3, %v1200_v45, %v1202_v29 }
  0xb0   : > { %4339 = vmatmul.msk.bf16.vlgmr.msrb.gmra.mxu0 %vm635_vm2, %v1870_v57 }
  0xb1   : > { %v5152_v25 = vpop.f32.mrf.mxu3  ;;  %v1874_v58 = vsel %vm1863_vm4, %v1869_v54, %v1873_v41 }
  0xb2   : > { %v5143_v44 = vpop.f32.mrf.mxu2  ;;  %v5145_v31 = vpop.f32.mrf.mxu1  ;;  %6956 = vst [vmem:[#allocation86_spill] sm:$0xff] %v5152_v25 }
  0xb3   : > { %6954 = vst [vmem:[#allocation84_spill] sm:$0xff] %v5143_v44 }
  0xb4   : > { %6955 = vst [vmem:[#allocation85_spill] sm:$0xff] %v5145_v31 }
  0xb5   : > { %v5147_v6 = vpop.f32.mrf.mxu0 }
  0xb6   : > { %4308 = vmatmul.msk.bf16.gmra.mxu3 %vm635_vm2, %v1203_v4 }
  0xb9   : > { %v5167_v25 = vpop.f32.mrf.mxu3 }
  0xba   : > { %v5154_v28 = vpop.f32.mrf.mxu2  ;;  %v5157_v57 = vpop.f32.mrf.mxu1  ;;  %6959 = vst [vmem:[#allocation89_spill] sm:$0xff] %v5167_v25 }
  0xbb   : > { %6957 = vst [vmem:[#allocation87_spill] sm:$0xff] %v5154_v28  ;;  %v1876_v28 = vrot.slane %v4819_v37, 2 }
  0xbc   : > { %6958 = vst [vmem:[#allocation88_spill] sm:$0xff] %v5157_v57 }
  0xbd   : > { %v5160_v44 = vpop.f32.mrf.mxu0  ;;  %4238 = vmatmul.msk.bf16.gmra.mxu1 %vm635_vm2, %v4634_v32  ;;  %v1204_v32 = vrot.slane %v4910_v13, 1 }
  0xbf   : > { %4272 = vmatmul.msk.bf16.gmra.mxu2 %vm635_vm2, %v5050_v53  ;;  %v1877_v53 = vor.u32 %v1876_v28, %v1875_v36  ;;  %v1205_v25 = vsel %vm1192_vm3, %v1202_v29, %v1204_v32 }
  0xc0   : > { %4340 = vmatmul.msk.bf16.gmra.mxu0 %vm635_vm2, %v1874_v58 }
  0xc1   : > { %v5179_v54 = vpop.f32.mrf.mxu3  ;;  %v1878_v37 = vsel %vm1863_vm4, %v1873_v41, %v1877_v53 }
  0xc2   : > { %v5170_v23 = vpop.f32.mrf.mxu2  ;;  %v5172_v45 = vpop.f32.mrf.mxu1  ;;  %6962 = vst [vmem:[#allocation92_spill] sm:$0xff] %v5179_v54 }
  0xc3   : > { %6960 = vst [vmem:[#allocation90_spill] sm:$0xff] %v5170_v23 }
  0xc4   : > { %6961 = vst [vmem:[#allocation91_spill] sm:$0xff] %v5172_v45  ;;  %v1904_v45 = vrot.slane %v4676_v61, 2 }
  0xc5   : > { %v5174_v30 = vpop.f32.mrf.mxu0 }
  0xc6   : > { %4309 = vmatmul.msk.bf16.gmra.mxu3 %vm635_vm2, %v1205_v25 }
  0xc9   : > { %v5194_v54 = vpop.f32.mrf.mxu3 }
  0xca   : > { %v5181_v22 = vpop.f32.mrf.mxu2  ;;  %v5184_v58 = vpop.f32.mrf.mxu1  ;;  %6965 = vst [vmem:[#allocation95_spill] sm:$0xff] %v5194_v54 }
  0xcb   : > { %6963 = vst [vmem:[#allocation93_spill] sm:$0xff] %v5181_v22  ;;  %v1880_v22 = vrot.slane %v4875_v9, 2 }
  0xcc   : > { %6964 = vst [vmem:[#allocation94_spill] sm:$0xff] %v5184_v58 }
  0xcd   : > { %v5187_v23 = vpop.f32.mrf.mxu0  ;;  %4239 = vmatmul.msk.bf16.gmra.mxu1 %vm635_vm2, %v4670_v59  ;;  %v1206_v59 = vrot.slane %v4970_v16, 1 }
  0xcf   : > { %4273 = vmatmul.msk.bf16.gmra.mxu2 %vm635_vm2, %v5090_v43  ;;  %v1881_v43 = vor.u32 %v1880_v22, %v1879_v19  ;;  %v1207_v54 = vsel %vm1192_vm3, %v1204_v32, %v1206_v59 }
  0xd0   : > { %4341 = vmatmul.msk.bf16.gmra.mxu0 %vm635_vm2, %v1878_v37 }
  0xd1   : > { %v5206_v41 = vpop.f32.mrf.mxu3  ;;  %v1882_v9 = vsel %vm1863_vm4, %v1877_v53, %v1881_v43 }
  0xd2   : > { %v5197_v36 = vpop.f32.mrf.mxu2  ;;  %v5199_v29 = vpop.f32.mrf.mxu1  ;;  %6968 = vst [vmem:[#allocation98_spill] sm:$0xff] %v5206_v41 }
  0xd3   : > { %6966 = vst [vmem:[#allocation96_spill] sm:$0xff] %v5197_v36 }
  0xd4   : > { %6967 = vst [vmem:[#allocation97_spill] sm:$0xff] %v5199_v29  ;;  %v1903_v29 = vrot.slane %v4745_v51, 1 }
  0xd5   : > { %v5201_v28 = vpop.f32.mrf.mxu0 }
  0xd6   : > { %4310 = vmatmul.msk.bf16.gmra.mxu3 %vm635_vm2, %v1207_v54 }
  0xd9   : > { %v5221_v41 = vpop.f32.mrf.mxu3 }
  0xda   : > { %v5208_v58 = vpop.f32.mrf.mxu2  ;;  %v5211_v37 = vpop.f32.mrf.mxu1  ;;  %6971 = vst [vmem:[#allocation101_spill] sm:$0xff] %v5221_v41 }
  0xdb   : > { %6969 = vst [vmem:[#allocation99_spill] sm:$0xff] %v5208_v58  ;;  %v1884_v58 = vrot.slane %v4936_v11, 2 }
  0xdc   : > { %6970 = vst [vmem:[#allocation100_spill] sm:$0xff] %v5211_v37 }
  0xdd   : > { %v5214_v36 = vpop.f32.mrf.mxu0  ;;  %4240 = vmatmul.msk.bf16.gmra.mxu1 %vm635_vm2, %v4736_v46  ;;  %v1208_v46 = vrot.slane %v5021_v8, 1 }
  0xdf   : > { %4274 = vmatmul.msk.bf16.gmra.mxu2 %vm635_vm2, %v5127_v62  ;;  %v1885_v62 = vor.u32 %v1884_v58, %v1883_v55  ;;  %v1209_v41 = vsel %vm1192_vm3, %v1206_v59, %v1208_v46 }
  0xe0   : > { %4342 = vmatmul.msk.bf16.gmra.mxu0 %vm635_vm2, %v1882_v9 }
  0xe1   : > { %v5233_v53 = vpop.f32.mrf.mxu3  ;;  %v1886_v11 = vsel %vm1863_vm4, %v1881_v43, %v1885_v62 }
  0xe2   : > { %v5224_v19 = vpop.f32.mrf.mxu2  ;;  %v5226_v32 = vpop.f32.mrf.mxu1  ;;  %6974 = vst [vmem:[#allocation104_spill] sm:$0xff] %v5233_v53  ;;  %v1887_v53 = vrot.slane %v5036_v2, 1 }
  0xe3   : > { %6972 = vst [vmem:[#allocation102_spill] sm:$0xff] %v5224_v19 }
  0xe4   : > { %6973 = vst [vmem:[#allocation103_spill] sm:$0xff] %v5226_v32 }
  0xe5   : > { %v5228_v22 = vpop.f32.mrf.mxu0 }
  0xe6   : > { %4311 = vmatmul.msk.bf16.gmra.mxu3 %vm635_vm2, %v1209_v41 }
  0xe9   : > { %v5247_v10 = vpop.f32.mrf.mxu3 }
  0xea   : > { %v5235_v37 = vpop.f32.mrf.mxu2  ;;  %v5238_v9 = vpop.f32.mrf.mxu1  ;;  %6977 = vst [vmem:[#allocation107_spill] sm:$0xff] %v5247_v10 }
  0xeb   : > { %6975 = vst [vmem:[#allocation105_spill] sm:$0xff] %v5235_v37  ;;  %v1888_v37 = vrot.slane %v4994_v1, 2 }
  0xec   : > { %6976 = vst [vmem:[#allocation106_spill] sm:$0xff] %v5238_v9 }
  0xed   : > { %v5241_v19 = vpop.f32.mrf.mxu0  ;;  %4241 = vmatmul.msk.bf16.gmra.mxu1 %vm635_vm2, %v4793_v7  ;;  %v1210_v7 = vrot.slane %v4597_v12, 1 }
  0xef   : > { %4275 = vmatmul.msk.bf16.gmra.mxu2 %vm635_vm2, %v1203_v4  ;;  %v1889_v4 = vor.u32 %v1888_v37, %v1887_v53  ;;  %v1211_v10 = vsel %vm1192_vm3, %v1208_v46, %v1210_v7 }
  0xf0   : > { %4343 = vmatmul.msk.bf16.gmra.mxu0 %vm635_vm2, %v1886_v11 }
  0xf1   : > { %v5259_v9 = vpop.f32.mrf.mxu3  ;;  %v1890_v1 = vsel %vm1863_vm4, %v1885_v62, %v1889_v4 }
  0xf2   : > { %v5250_v55 = vpop.f32.mrf.mxu2  ;;  %v5252_v59 = vpop.f32.mrf.mxu1  ;;  %6980 = vst [vmem:[#allocation110_spill] sm:$0xff] %v5259_v9  ;;  %v1891_v9 = vrot.slane %v5079_v0, 1  ;;  %v1895_v0 = vrot.slane %v4612_v21, 1 }
  0xf3   : > { %6978 = vst [vmem:[#allocation108_spill] sm:$0xff] %v5250_v55 }
  0xf4   : > { %6979 = vst [vmem:[#allocation109_spill] sm:$0xff] %v5252_v59 }
  0xf5   : > { %v5254_v58 = vpop.f32.mrf.mxu0 }
  0xf6   : > { %4312 = vmatmul.msk.bf16.gmra.mxu3 %vm635_vm2, %v1211_v10 }
  0xf9   : > { %v5273_v2 = vpop.f32.mrf.mxu3 }
  0xfa   : > { %v5261_v43 = vpop.f32.mrf.mxu2  ;;  %v5264_v11 = vpop.f32.mrf.mxu1  ;;  %6983 = vst [vmem:[#allocation113_spill] sm:$0xff] %v5273_v2 }
  0xfb   : > { %6981 = vst [vmem:[#allocation111_spill] sm:$0xff] %v5261_v43  ;;  %v1892_v43 = vrot.slane %v5039_v18, 2 }
  0xfc   : > { %6982 = vst [vmem:[#allocation112_spill] sm:$0xff] %v5264_v11 }
  0xfd   : > { %v5267_v55 = vpop.f32.mrf.mxu0  ;;  %4242 = vmatmul.msk.bf16.gmra.mxu1 %vm635_vm2, %v4849_v49  ;;  %v1212_v49 = vrot.slane %v4601_v15, 1 }
  0xff   : > { %4276 = vmatmul.msk.bf16.gmra.mxu2 %vm635_vm2, %v1205_v25  ;;  %v1893_v25 = vor.u32 %v1892_v43, %v1891_v9  ;;  %v5290_v2 = vsel %vm1192_vm3, %v1210_v7, %v1212_v49 }
 0x100   : > { %4344 = vmatmul.msk.bf16.gmra.mxu0 %vm635_vm2, %v1890_v1 }
 0x101   : > { %v5285_v11 = vpop.f32.mrf.mxu3  ;;  %v1894_v18 = vsel %vm1863_vm4, %v1889_v4, %v1893_v25 }
 0x102   : > { %v5276_v37 = vpop.f32.mrf.mxu2  ;;  %v5278_v46 = vpop.f32.mrf.mxu1  ;;  %6986 = vst [vmem:[#allocation116_spill] sm:$0xff] %v5285_v11 }
 0x103   : > { %6984 = vst [vmem:[#allocation114_spill] sm:$0xff] %v5276_v37 }
 0x104   : > { %6985 = vst [vmem:[#allocation115_spill] sm:$0xff] %v5278_v46 }
 0x105   : > { %v5280_v53 = vpop.f32.mrf.mxu0 }
 0x106   : > { %4313 = vmatmul.msk.bf16.gmra.mxu3 %vm635_vm2, %v5290_v2 }
 0x109   : > { %v1630_v11 = vpop.f32.mrf.mxu3 }
 0x10a   : > { %v5287_v62 = vpop.f32.mrf.mxu2  ;;  %v5292_v1 = vpop.f32.mrf.mxu1 }
 0x10b   : > { %6987 = vst [vmem:[#allocation117_spill] sm:$0xff] %v5287_v62  ;;  %v1896_v62 = vrot.slane %v4609_v20, 2 }
 0x10c   : > { %6988 = vst [vmem:[#allocation118_spill] sm:$0xff] %v5292_v1  ;;  %v1214_v1 = vrot.slane %v4658_v50, 1 }
 0x10d   : > { %v5296_v37 = vpop.f32.mrf.mxu0  ;;  %4243 = vmatmul.msk.bf16.gmra.mxu1 %vm635_vm2, %v4910_v13  ;;  %v1897_v4 = vor.u32 %v1896_v62, %v1895_v0 }
 0x10f   : > { %4277 = vmatmul.msk.bf16.gmra.mxu2 %vm635_vm2, %v1207_v54  ;;  %v5315_v54 = vsel %vm1192_vm3, %v1212_v49, %v1214_v1  ;;  %v1898_v20 = vsel %vm1863_vm4, %v1893_v25, %v1897_v4 }
 0x110   : > { %4345 = vmatmul.msk.bf16.gmra.mxu0 %vm635_vm2, %v1894_v18 }
 0x111   : > { %v1632_v13 = vpop.f32.mrf.mxu3 }
 0x112   : > { %v5303_v9 = vpop.f32.mrf.mxu2  ;;  %v5305_v7 = vpop.f32.mrf.mxu1 }
 0x113   : > { %6989 = vst [vmem:[#allocation119_spill] sm:$0xff] %v5303_v9 }
 0x114   : > { %6990 = vst [vmem:[#allocation120_spill] sm:$0xff] %v5305_v7  ;;  %v1216_v7 = vrot.slane %v4724_v38, 1 }
 0x115   : > { %v5307_v43 = vpop.f32.mrf.mxu0 }
 0x116   : > { %4314 = vmatmul.msk.bf16.gmra.mxu3 %vm635_vm2, %v5315_v54 }
 0x119   : > { %v1635_v21 = vpop.f32.mrf.mxu3 }
 0x11a   : > { %v5312_v46 = vpop.f32.mrf.mxu2  ;;  %v5317_v18 = vpop.f32.mrf.mxu1 }
 0x11b   : > { %6991 = vst [vmem:[#allocation121_spill] sm:$0xff] %v5312_v46  ;;  %v1899_v46 = vrot.slane %v4673_v60, 1 }
 0x11c   : > { %6992 = vst [vmem:[#allocation122_spill] sm:$0xff] %v5317_v18  ;;  %v1900_v18 = vrot.slane %v4620_v26, 2 }
 0x11d   : > { %v5321_v9 = vpop.f32.mrf.mxu0  ;;  %4244 = vmatmul.msk.bf16.gmra.mxu1 %vm635_vm2, %v4970_v16 }
 0x11e   : > { %v1901_v25 = vor.u32 %v1900_v18, %v1899_v46 }
 0x11f   : > { %4278 = vmatmul.msk.bf16.gmra.mxu2 %vm635_vm2, %v1209_v41  ;;  %v5340_v41 = vsel %vm1192_vm3, %v1214_v1, %v1216_v7 }
 0x120   : > { %4346 = vmatmul.msk.bf16.gmra.mxu0 %vm635_vm2, %v1898_v20  ;;  %v1902_v60 = vsel %vm1863_vm4, %v1897_v4, %v1901_v25 }
 0x121   : > { %v1637_v16 = vpop.f32.mrf.mxu3 }
 0x122   : > { %v5328_v0 = vpop.f32.mrf.mxu2  ;;  %v5330_v49 = vpop.f32.mrf.mxu1 }
 0x123   : > { %6993 = vst [vmem:[#allocation123_spill] sm:$0xff] %v5328_v0 }
 0x124   : > { %6994 = vst [vmem:[#allocation124_spill] sm:$0xff] %v5330_v49 }
 0x125   : > { %v5332_v62 = vpop.f32.mrf.mxu0 }
 0x126   : > { %4315 = vmatmul.msk.bf16.gmra.mxu3 %vm635_vm2, %v5340_v41 }
 0x129   : > { %v1640_v26 = vpop.f32.mrf.mxu3 }
 0x12a   : > { %v5337_v59 = vpop.f32.mrf.mxu2  ;;  %v991_v20 = vpop.f32.mrf.mxu1 }
 0x12b   : > { %6995 = vst [vmem:[#allocation125_spill] sm:$0xff] %v5337_v59  ;;  %v992_v49 = vadd.f32 %v991_v20, %v5102_v48  ;;  %v1905_v48 = vor.u32 %v1904_v45, %v1903_v29 }
 0x12d   : > { %v2120_v0 = vpop.f32.mrf.mxu0  ;;  %4245 = vmatmul.msk.bf16.gmra.mxu1 %vm635_vm2, %v5021_v8  ;;  %v1218_v8 = vrot.slane %v4784_v40, 1 }
 0x12f   : > { %4279 = vmatmul.msk.bf16.gmra.mxu2 %vm635_vm2, %v1211_v10 }
 0x130   : > { %4347 = vmatmul.msk.bf16.gmra.mxu0 %vm635_vm2, %v1902_v60  ;;  %v5357_v60 = vsel %vm1192_vm3, %v1216_v7, %v1218_v8 }
 0x131   : > { %v1642_v4 = vpop.f32.mrf.mxu3 }
 0x132   : > { %v1371_v46 = vpop.f32.mrf.mxu2  ;;  %v993_v18 = vpop.f32.mrf.mxu1 }
 0x133   : > { %v1536_v1 = vadd.f32 %v1371_v46, %v992_v49  ;;  %v994_v10 = vadd.f32 %v993_v18, %v5116_v42  ;;  %v1907_v18 = vrot.slane %v4801_v24, 1 }
 0x135   : > { %v1795_v59 = vadd.f32 %v1630_v11, %v1536_v1  ;;  %v2122_v32 = vpop.f32.mrf.mxu0 }
 0x136   : > { %4316 = vmatmul.msk.bf16.gmra.mxu3 %vm635_vm2, %v5357_v60 }
 0x137   : > { %v5353_v57 = vadd.f32 %v2120_v0, %v1795_v59  ;;  %v1906_v59 = vsel %vm1863_vm4, %v1901_v25, %v1905_v48  ;;  %v1220_v25 = vrot.slane %v4840_v56, 1 }
 0x139   : > { %v1645_v45 = vpop.f32.mrf.mxu3 }
 0x13a   : > { %v1373_v31 = vpop.f32.mrf.mxu2  ;;  %v996_v20 = vpop.f32.mrf.mxu1 }
 0x13b   : > { %v1537_v49 = vadd.f32 %v1373_v31, %v994_v10  ;;  %v997_v29 = vadd.f32 %v996_v20, %v5134_v3  ;;  %v1908_v10 = vrot.slane %v4748_v52, 2  ;;  %v5377_v20 = vsel %vm1192_vm3, %v1218_v8, %v1220_v25 }
 0x13d   : > { %v1796_v11 = vadd.f32 %v1632_v13, %v1537_v49  ;;  %v2125_v46 = vpop.f32.mrf.mxu0  ;;  %4246 = vmatmul.msk.bf16.gmra.mxu1 %vm635_vm2, %v4597_v12  ;;  %v1909_v3 = vor.u32 %v1908_v10, %v1907_v18 }
 0x13f   : > { %4280 = vmatmul.msk.bf16.gmra.mxu2 %vm635_vm2, %v5290_v2  ;;  %v5366_v42 = vadd.f32 %v2122_v32, %v1796_v11 }
 0x140   : > { %4348 = vmatmul.msk.bf16.gmra.mxu0 %vm635_vm2, %v1906_v59 }
 0x141   : > { %v1647_v2 = vpop.f32.mrf.mxu3 }
 0x142   : > { %v1376_v13 = vpop.f32.mrf.mxu2  ;;  %v998_v7 = vpop.f32.mrf.mxu1 }
 0x143   : > { %v1538_v31 = vadd.f32 %v1376_v13, %v997_v29  ;;  %v999_v32 = vadd.f32 %v998_v7, %v5147_v6 }
 0x145   : > { %v1797_v0 = vadd.f32 %v1635_v21, %v1538_v31  ;;  %v2127_v1 = vpop.f32.mrf.mxu0 }
 0x146   : > { %4317 = vmatmul.msk.bf16.gmra.mxu3 %vm635_vm2, %v5377_v20 }
 0x147   : > { %v5373_v49 = vadd.f32 %v2125_v46, %v1797_v0  ;;  %v1910_v46 = vsel %vm1863_vm4, %v1905_v48, %v1909_v3  ;;  %v1222_v48 = vrot.slane %v4900_v17, 1 }
 0x149   : > { %v1650_v31 = vpop.f32.mrf.mxu3 }
 0x14a   : > { %v1378_v11 = vpop.f32.mrf.mxu2  ;;  %v1001_v29 = vpop.f32.mrf.mxu1 }
 0x14b   : > { %v1539_v59 = vadd.f32 %v1378_v11, %v999_v32  ;;  %v1002_v8 = vadd.f32 %v1001_v29, %v5160_v44  ;;  %v1911_v32 = vrot.slane %v4857_v39, 1  ;;  %v1912_v11 = vrot.slane %v4804_v33, 2 }
 0x14c   : > { %v5397_v29 = vsel %vm1192_vm3, %v1220_v25, %v1222_v48 }
 0x14d   : > { %v1798_v21 = vadd.f32 %v1637_v16, %v1539_v59  ;;  %v2130_v13 = vpop.f32.mrf.mxu0  ;;  %4247 = vmatmul.msk.bf16.gmra.mxu1 %vm635_vm2, %v4601_v15  ;;  %v1913_v44 = vor.u32 %v1912_v11, %v1911_v32 }
 0x14f   : > { %4281 = vmatmul.msk.bf16.gmra.mxu2 %vm635_vm2, %v5315_v54  ;;  %v5386_v6 = vadd.f32 %v2127_v1, %v1798_v21 }
 0x150   : > { %4349 = vmatmul.msk.bf16.gmra.mxu0 %vm635_vm2, %v1910_v46 }
 0x151   : > { %6996 = vst [vmem:[#allocation126_spill] sm:$0xff] %v5386_v6  ;;  %v1652_v54 = vpop.f32.mrf.mxu3 }
 0x152   : > { %v1381_v16 = vpop.f32.mrf.mxu2  ;;  %v1003_v0 = vpop.f32.mrf.mxu1 }
 0x153   : > { %v1540_v7 = vadd.f32 %v1381_v16, %v1002_v8  ;;  %v1004_v1 = vadd.f32 %v1003_v0, %v5174_v30 }
 0x155   : > { %v1799_v18 = vadd.f32 %v1640_v26, %v1540_v7  ;;  %v2132_v10 = vpop.f32.mrf.mxu0 }
 0x156   : > { %4318 = vmatmul.msk.bf16.gmra.mxu3 %vm635_vm2, %v5397_v29 }
 0x157   : > { %v5393_v59 = vadd.f32 %v2130_v13, %v1799_v18  ;;  %v1914_v13 = vsel %vm1863_vm4, %v1909_v3, %v1913_v44  ;;  %v1224_v3 = vrot.slane %v4962_v14, 1 }
 0x159   : > { %6997 = vst [vmem:[#allocation127_spill] sm:$0xff] %v5393_v59  ;;  %v1655_v7 = vpop.f32.mrf.mxu3 }
 0x15a   : > { %v1383_v21 = vpop.f32.mrf.mxu2  ;;  %v1006_v8 = vpop.f32.mrf.mxu1 }
 0x15b   : > { %v1541_v46 = vadd.f32 %v1383_v21, %v1004_v1  ;;  %v1007_v25 = vadd.f32 %v1006_v8, %v5187_v23  ;;  %v1915_v1 = vrot.slane %v4918_v5, 1  ;;  %v1916_v21 = vrot.slane %v4860_v34, 2 }
 0x15c   : > { %v5417_v8 = vsel %vm1192_vm3, %v1222_v48, %v1224_v3 }
 0x15d   : > { %v1800_v26 = vadd.f32 %v1642_v4, %v1541_v46  ;;  %v2135_v16 = vpop.f32.mrf.mxu0  ;;  %4248 = vmatmul.msk.bf16.gmra.mxu1 %vm635_vm2, %v4658_v50  ;;  %v1917_v23 = vor.u32 %v1916_v21, %v1915_v1 }
 0x15f   : > { %4282 = vmatmul.msk.bf16.gmra.mxu2 %vm635_vm2, %v5340_v41  ;;  %v5406_v30 = vadd.f32 %v2132_v10, %v1800_v26 }
 0x160   : > { %4350 = vmatmul.msk.bf16.gmra.mxu0 %vm635_vm2, %v1914_v13 }
 0x161   : > { %6998 = vst [vmem:[#allocation128_spill] sm:$0xff] %v5406_v30  ;;  %v1657_v41 = vpop.f32.mrf.mxu3 }
 0x162   : > { %v1386_v4 = vpop.f32.mrf.mxu2  ;;  %v1008_v18 = vpop.f32.mrf.mxu1 }
 0x163   : > { %v1542_v0 = vadd.f32 %v1386_v4, %v1007_v25  ;;  %v1009_v10 = vadd.f32 %v1008_v18, %v5201_v28 }
 0x165   : > { %v1801_v32 = vadd.f32 %v1645_v45, %v1542_v0  ;;  %v2137_v11 = vpop.f32.mrf.mxu0 }
 0x166   : > { %4319 = vmatmul.msk.bf16.gmra.mxu3 %vm635_vm2, %v5417_v8 }
 0x167   : > { %v5413_v46 = vadd.f32 %v2135_v16, %v1801_v32  ;;  %v1918_v16 = vsel %vm1863_vm4, %v1913_v44, %v1917_v23  ;;  %v7003_v44 = vld [vmem:[#allocation69_spill] sm:$0xff] }
 0x168   : > { %v1226_v30 = vrot.slane %v7003_v44, 1 }
 0x169   : > { %6999 = vst [vmem:[#allocation129_spill] sm:$0xff] %v5413_v46  ;;  %v1660_v0 = vpop.f32.mrf.mxu3 }
 0x16a   : > { %v1388_v26 = vpop.f32.mrf.mxu2  ;;  %v1011_v25 = vpop.f32.mrf.mxu1 }
 0x16b   : > { %v1543_v13 = vadd.f32 %v1388_v26, %v1009_v10  ;;  %v1012_v48 = vadd.f32 %v1011_v25, %v5214_v36  ;;  %v7001_v10 = vld [vmem:[#allocation63_spill] sm:$0xff]  ;;  %v5437_v25 = vsel %vm1192_vm3, %v1224_v3, %v1226_v30 }
 0x16c   : > { %v1919_v26 = vrot.slane %v7001_v10, 1 }
 0x16d   : > { %v1802_v45 = vadd.f32 %v1647_v2, %v1543_v13  ;;  %v2140_v4 = vpop.f32.mrf.mxu0  ;;  %4249 = vmatmul.msk.bf16.gmra.mxu1 %vm635_vm2, %v4724_v38  ;;  %v7002_v13 = vld [vmem:[#allocation52_spill] sm:$0xff] }
 0x16e   : > { %v1920_v46 = vrot.slane %v7002_v13, 2 }
 0x16f   : > { %4283 = vmatmul.msk.bf16.gmra.mxu2 %vm635_vm2, %v5357_v60  ;;  %v5426_v28 = vadd.f32 %v2137_v11, %v1802_v45 }
 0x170   : > { %4351 = vmatmul.msk.bf16.gmra.mxu0 %vm635_vm2, %v1918_v16  ;;  %v1921_v36 = vor.u32 %v1920_v46, %v1919_v26 }
 0x171   : > { %7000 = vst [vmem:[#allocation130_spill] sm:$0xff] %v5426_v28  ;;  %v1662_v60 = vpop.f32.mrf.mxu3 }
 0x172   : > { %v1391_v2 = vpop.f32.mrf.mxu2  ;;  %v1013_v32 = vpop.f32.mrf.mxu1 }
 0x173   : > { %v1544_v18 = vadd.f32 %v1391_v2, %v1012_v48  ;;  %v1014_v11 = vadd.f32 %v1013_v32, %v5228_v22 }
 0x175   : > { %v1803_v1 = vadd.f32 %v1650_v31, %v1544_v18  ;;  %v2142_v21 = vpop.f32.mrf.mxu0 }
 0x176   : > { %4320 = vmatmul.msk.bf16.gmra.mxu3 %vm635_vm2, %v5437_v25 }
 0x177   : > { %v5433_v59 = vadd.f32 %v2140_v4, %v1803_v1  ;;  %v1922_v4 = vsel %vm1863_vm4, %v1917_v23, %v1921_v36  ;;  %v7008_v23 = vld [vmem:[#allocation2_spill] sm:$0xff] }
 0x178   : > { %v1228_v28 = vrot.slane %v7008_v23, 1 }
 0x179   : > { %7004 = vst [vmem:[#allocation63_spill] sm:$0xff] %v5433_v59  ;;  %v1665_v46 = vpop.f32.mrf.mxu3 }
 0x17a   : > { %v1393_v45 = vpop.f32.mrf.mxu2  ;;  %v1016_v48 = vpop.f32.mrf.mxu1 }
 0x17b   : > { %v1545_v16 = vadd.f32 %v1393_v45, %v1014_v11  ;;  %v1017_v3 = vadd.f32 %v1016_v48, %v5241_v19  ;;  %v7006_v11 = vld [vmem:[#allocation72_spill] sm:$0xff]  ;;  %v5457_v48 = vsel %vm1192_vm3, %v1226_v30, %v1228_v28 }
 0x17c   : > { %v1923_v45 = vrot.slane %v7006_v11, 1 }
 0x17d   : > { %v1804_v31 = vadd.f32 %v1652_v54, %v1545_v16  ;;  %v2145_v2 = vpop.f32.mrf.mxu0  ;;  %4250 = vmatmul.msk.bf16.gmra.mxu1 %vm635_vm2, %v4784_v40  ;;  %v7007_v16 = vld [vmem:[#allocation64_spill] sm:$0xff] }
 0x17e   : > { %v1924_v59 = vrot.slane %v7007_v16, 2 }
 0x17f   : > { %4284 = vmatmul.msk.bf16.gmra.mxu2 %vm635_vm2, %v5377_v20  ;;  %v5446_v22 = vadd.f32 %v2142_v21, %v1804_v31 }
 0x180   : > { %4352 = vmatmul.msk.bf16.gmra.mxu0 %vm635_vm2, %v1922_v4  ;;  %v1925_v19 = vor.u32 %v1924_v59, %v1923_v45 }
 0x181   : > { %7005 = vst [vmem:[#allocation52_spill] sm:$0xff] %v5446_v22  ;;  %v1667_v20 = vpop.f32.mrf.mxu3 }
 0x182   : > { %v1396_v54 = vpop.f32.mrf.mxu2  ;;  %v1018_v32 = vpop.f32.mrf.mxu1 }
 0x183   : > { %v1546_v18 = vadd.f32 %v1396_v54, %v1017_v3  ;;  %v1019_v21 = vadd.f32 %v1018_v32, %v5254_v58 }
 0x185   : > { %v1805_v1 = vadd.f32 %v1655_v7, %v1546_v18  ;;  %v2147_v26 = vpop.f32.mrf.mxu0 }
 0x186   : > { %4321 = vmatmul.msk.bf16.gmra.mxu3 %vm635_vm2, %v5457_v48 }
 0x187   : > { %v5453_v6 = vadd.f32 %v2145_v2, %v1805_v1  ;;  %v1926_v2 = vsel %vm1863_vm4, %v1921_v36, %v1925_v19  ;;  %v7012_v36 = vld [vmem:[#allocation5_spill] sm:$0xff] }
 0x189   : > { %7009 = vst [vmem:[#allocation72_spill] sm:$0xff] %v5453_v6  ;;  %v1670_v59 = vpop.f32.mrf.mxu3  ;;  %v1230_v6 = vrot.slane %v7012_v36, 1 }
 0x18a   : > { %v1398_v31 = vpop.f32.mrf.mxu2  ;;  %v1021_v3 = vpop.f32.mrf.mxu1 }
 0x18b   : > { %v1547_v4 = vadd.f32 %v1398_v31, %v1019_v21  ;;  %v1022_v30 = vadd.f32 %v1021_v3, %v5267_v55  ;;  %v1927_v21 = vrot.slane %v5072_v35, 1  ;;  %v7011_v31 = vld [vmem:[#allocation73_spill] sm:$0xff]  ;;  %v5477_v3 = vsel %vm1192_vm3, %v1228_v28, %v1230_v6 }
 0x18d   : > { %v1806_v7 = vadd.f32 %v1657_v41, %v1547_v4  ;;  %v2150_v54 = vpop.f32.mrf.mxu0  ;;  %4251 = vmatmul.msk.bf16.gmra.mxu1 %vm635_vm2, %v4840_v56  ;;  %v1928_v4 = vrot.slane %v7011_v31, 2 }
 0x18f   : > { %4285 = vmatmul.msk.bf16.gmra.mxu2 %vm635_vm2, %v5397_v29  ;;  %v5466_v58 = vadd.f32 %v2147_v26, %v1806_v7  ;;  %v1929_v55 = vor.u32 %v1928_v4, %v1927_v21 }
 0x190   : > { %4353 = vmatmul.msk.bf16.gmra.mxu0 %vm635_vm2, %v1926_v2 }
 0x191   : > { %7010 = vst [vmem:[#allocation64_spill] sm:$0xff] %v5466_v58  ;;  %v1672_v29 = vpop.f32.mrf.mxu3 }
 0x192   : > { %v1401_v41 = vpop.f32.mrf.mxu2  ;;  %v1023_v32 = vpop.f32.mrf.mxu1 }
 0x193   : > { %v1548_v18 = vadd.f32 %v1401_v41, %v1022_v30  ;;  %v1024_v26 = vadd.f32 %v1023_v32, %v5280_v53 }
 0x195   : > { %v1807_v1 = vadd.f32 %v1660_v0, %v1548_v18  ;;  %v2152_v45 = vpop.f32.mrf.mxu0 }
 0x196   : > { %4322 = vmatmul.msk.bf16.gmra.mxu3 %vm635_vm2, %v5477_v3 }
 0x197   : > { %v5473_v22 = vadd.f32 %v2150_v54, %v1807_v1  ;;  %v1930_v54 = vsel %vm1863_vm4, %v1925_v19, %v1929_v55  ;;  %v7016_v19 = vld [vmem:[#allocation10_spill] sm:$0xff] }
 0x199   : > { %7013 = vst [vmem:[#allocation73_spill] sm:$0xff] %v5473_v22  ;;  %v1675_v18 = vpop.f32.mrf.mxu3  ;;  %v1232_v22 = vrot.slane %v7016_v19, 1 }
 0x19a   : > { %v1403_v7 = vpop.f32.mrf.mxu2  ;;  %v1026_v30 = vpop.f32.mrf.mxu1 }
 0x19b   : > { %v1549_v2 = vadd.f32 %v1403_v7, %v1024_v26  ;;  %v1027_v28 = vadd.f32 %v1026_v30, %v5296_v37  ;;  %v7015_v26 = vld [vmem:[#allocation7_spill] sm:$0xff]  ;;  %v5497_v30 = vsel %vm1192_vm3, %v1230_v6, %v1232_v22 }
 0x19c   : > { %v1931_v7 = vrot.slane %v7015_v26, 1 }
 0x19d   : > { %v1808_v0 = vadd.f32 %v1662_v60, %v1549_v2  ;;  %v2155_v41 = vpop.f32.mrf.mxu0  ;;  %4252 = vmatmul.msk.bf16.gmra.mxu1 %vm635_vm2, %v4900_v17  ;;  %v1932_v2 = vrot.slane %v4623_v27, 2 }
 0x19f   : > { %4286 = vmatmul.msk.bf16.gmra.mxu2 %vm635_vm2, %v5417_v8  ;;  %v5486_v53 = vadd.f32 %v2152_v45, %v1808_v0  ;;  %v1933_v37 = vor.u32 %v1932_v2, %v1931_v7 }
 0x1a0   : > { %4354 = vmatmul.msk.bf16.gmra.mxu0 %vm635_vm2, %v1930_v54 }
 0x1a1   : > { %7014 = vst [vmem:[#allocation131_spill] sm:$0xff] %v5486_v53  ;;  %v1677_v8 = vpop.f32.mrf.mxu3 }
 0x1a2   : > { %v1406_v60 = vpop.f32.mrf.mxu2  ;;  %v1028_v1 = vpop.f32.mrf.mxu1 }
 0x1a3   : > { %v1550_v32 = vadd.f32 %v1406_v60, %v1027_v28  ;;  %v1029_v45 = vadd.f32 %v1028_v1, %v5307_v43 }
 0x1a5   : > { %v1809_v21 = vadd.f32 %v1665_v46, %v1550_v32  ;;  %v2157_v4 = vpop.f32.mrf.mxu0 }
 0x1a6   : > { %4323 = vmatmul.msk.bf16.gmra.mxu3 %vm635_vm2, %v5497_v30 }
 0x1a7   : > { %v5493_v58 = vadd.f32 %v2155_v41, %v1809_v21  ;;  %v1934_v41 = vsel %vm1863_vm4, %v1929_v55, %v1933_v37  ;;  %v7021_v55 = vld [vmem:[#allocation21_spill] sm:$0xff] }
 0x1a8   : > { %v1234_v53 = vrot.slane %v7021_v55, 1 }
 0x1a9   : > { %7017 = vst [vmem:[#allocation7_spill] sm:$0xff] %v5493_v58  ;;  %v1680_v32 = vpop.f32.mrf.mxu3 }
 0x1aa   : > { %v1408_v0 = vpop.f32.mrf.mxu2  ;;  %v1031_v28 = vpop.f32.mrf.mxu1 }
 0x1ab   : > { %v1551_v54 = vadd.f32 %v1408_v0, %v1029_v45  ;;  %v1032_v6 = vadd.f32 %v1031_v28, %v5321_v9  ;;  %v7019_v45 = vld [vmem:[#allocation13_spill] sm:$0xff]  ;;  %v5517_v28 = vsel %vm1192_vm3, %v1232_v22, %v1234_v53 }
 0x1ac   : > { %v1935_v0 = vrot.slane %v7019_v45, 1 }
 0x1ad   : > { %v1810_v46 = vadd.f32 %v1667_v20, %v1551_v54  ;;  %v2160_v60 = vpop.f32.mrf.mxu0  ;;  %4253 = vmatmul.msk.bf16.gmra.mxu1 %vm635_vm2, %v4962_v14  ;;  %v7020_v54 = vld [vmem:[#allocation8_spill] sm:$0xff] }
 0x1ae   : > { %v1936_v58 = vrot.slane %v7020_v54, 2 }
 0x1af   : > { %4287 = vmatmul.msk.bf16.gmra.mxu2 %vm635_vm2, %v5437_v25  ;;  %v5506_v43 = vadd.f32 %v2157_v4, %v1810_v46 }
 0x1b0   : > { %4355 = vmatmul.msk.bf16.gmra.mxu0 %vm635_vm2, %v1934_v41  ;;  %v1937_v9 = vor.u32 %v1936_v58, %v1935_v0 }
 0x1b1   : > { %7018 = vst [vmem:[#allocation132_spill] sm:$0xff] %v5506_v43  ;;  %v1682_v25 = vpop.f32.mrf.mxu3 }
 0x1b2   : > { %v1411_v20 = vpop.f32.mrf.mxu2  ;;  %v1033_v21 = vpop.f32.mrf.mxu1 }
 0x1b3   : > { %v1552_v1 = vadd.f32 %v1411_v20, %v1032_v6  ;;  %v1034_v4 = vadd.f32 %v1033_v21, %v5332_v62 }
 0x1b5   : > { %v1811_v7 = vadd.f32 %v1670_v59, %v1552_v1  ;;  %v2162_v2 = vpop.f32.mrf.mxu0 }
 0x1b6   : > { %4324 = vmatmul.msk.bf16.gmra.mxu3 %vm635_vm2, %v5517_v28 }
 0x1b7   : > { %v5513_v14 = vadd.f32 %v2160_v60, %v1811_v7  ;;  %v1938_v60 = vsel %vm1863_vm4, %v1933_v37, %v1937_v9  ;;  %v7026_v37 = vld [vmem:[#allocation30_spill] sm:$0xff] }
 0x1b8   : > { %v1236_v43 = vrot.slane %v7026_v37, 1 }
 0x1b9   : > { %7022 = vst [vmem:[#allocation13_spill] sm:$0xff] %v5513_v14  ;;  %v1685_v58 = vpop.f32.mrf.mxu3 }
 0x1ba   : > { %v1413_v46 = vpop.f32.mrf.mxu2  ;;  %v1036_v6 = vpop.f32.mrf.mxu1 }
 0x1bb   : > { %v1553_v41 = vadd.f32 %v1413_v46, %v1034_v4  ;;  %v1037_v22 = vadd.f32 %v1036_v6, %v5092_v47  ;;  %v7024_v4 = vld [vmem:[#allocation25_spill] sm:$0xff]  ;;  %v5537_v6 = vsel %vm1192_vm3, %v1234_v53, %v1236_v43 }
 0x1bc   : > { %v1939_v46 = vrot.slane %v7024_v4, 1 }
 0x1bd   : > { %v1812_v59 = vadd.f32 %v1672_v29, %v1553_v41  ;;  %v2165_v20 = vpop.f32.mrf.mxu0  ;;  %4254 = vmatmul.msk.bf16.gmra.mxu1 %vm635_vm2, %v7003_v44  ;;  %v7025_v41 = vld [vmem:[#allocation14_spill] sm:$0xff] }
 0x1be   : > { %v1940_v14 = vrot.slane %v7025_v41, 2 }
 0x1bf   : > { %4288 = vmatmul.msk.bf16.gmra.mxu2 %vm635_vm2, %v5457_v48  ;;  %v5526_v62 = vadd.f32 %v2162_v2, %v1812_v59  ;;  %v7028_v2 = vld [vmem:[#allocation81_spill] sm:$0xff] }
 0x1c0   : > { %4356 = vmatmul.msk.bf16.gmra.mxu0 %vm635_vm2, %v1938_v60  ;;  %v1941_v47 = vor.u32 %v1940_v14, %v1939_v46 }
 0x1c1   : > { %7023 = vst [vmem:[#allocation8_spill] sm:$0xff] %v5526_v62  ;;  %v1687_v48 = vpop.f32.mrf.mxu3 }
 0x1c2   : > { %v1416_v29 = vpop.f32.mrf.mxu2  ;;  %v1038_v21 = vpop.f32.mrf.mxu1 }
 0x1c3   : > { %v1554_v1 = vadd.f32 %v1416_v29, %v1037_v22  ;;  %v1039_v59 = vadd.f32 %v1038_v21, %v7028_v2  ;;  %v7030_v2 = vld [vmem:[#allocation34_spill] sm:$0xff] }
 0x1c5   : > { %v1813_v7 = vadd.f32 %v1675_v18, %v1554_v1  ;;  %v2167_v0 = vpop.f32.mrf.mxu0 }
 0x1c6   : > { %4325 = vmatmul.msk.bf16.gmra.mxu3 %vm635_vm2, %v5537_v6 }
 0x1c7   : > { %v5533_v44 = vadd.f32 %v2165_v20, %v1813_v7  ;;  %v1942_v20 = vsel %vm1863_vm4, %v1937_v9, %v1941_v47  ;;  %v7032_v9 = vld [vmem:[#allocation39_spill] sm:$0xff] }
 0x1c9   : > { %7027 = vst [vmem:[#allocation25_spill] sm:$0xff] %v5533_v44  ;;  %v1690_v14 = vpop.f32.mrf.mxu3 }
 0x1ca   : > { %v1418_v62 = vpop.f32.mrf.mxu2  ;;  %v1041_v22 = vpop.f32.mrf.mxu1 }
 0x1cb   : > { %v1555_v60 = vadd.f32 %v1418_v62, %v1039_v59  ;;  %v1042_v53 = vadd.f32 %v1041_v22, %v5129_v63  ;;  %v1943_v59 = vrot.slane %v7030_v2, 1 }
 0x1cd   : > { %v1814_v18 = vadd.f32 %v1677_v8, %v1555_v60  ;;  %v2170_v29 = vpop.f32.mrf.mxu0  ;;  %4255 = vmatmul.msk.bf16.gmra.mxu1 %vm635_vm2, %v7008_v23  ;;  %v7031_v60 = vld [vmem:[#allocation26_spill] sm:$0xff]  ;;  %v1238_v23 = vrot.slane %v7032_v9, 1 }
 0x1ce   : > { %v1944_v44 = vrot.slane %v7031_v60, 2 }
 0x1cf   : > { %4289 = vmatmul.msk.bf16.gmra.mxu2 %vm635_vm2, %v5477_v3  ;;  %v5546_v1 = vadd.f32 %v2167_v0, %v1814_v18  ;;  %v7034_v0 = vld [vmem:[#allocation85_spill] sm:$0xff]  ;;  %v5557_v22 = vsel %vm1192_vm3, %v1236_v43, %v1238_v23  ;;  %v7036_v43 = vld [vmem:[#allocation88_spill] sm:$0xff] }
 0x1d0   : > { %4357 = vmatmul.msk.bf16.gmra.mxu0 %vm635_vm2, %v1942_v20  ;;  %v1945_v63 = vor.u32 %v1944_v44, %v1943_v59 }
 0x1d1   : > { %7029 = vst [vmem:[#allocation81_spill] sm:$0xff] %v5546_v1  ;;  %v1692_v3 = vpop.f32.mrf.mxu3 }
 0x1d2   : > { %v1421_v8 = vpop.f32.mrf.mxu2  ;;  %v1043_v21 = vpop.f32.mrf.mxu1 }
 0x1d3   : > { %v1556_v62 = vadd.f32 %v1421_v8, %v1042_v53  ;;  %v1044_v18 = vadd.f32 %v1043_v21, %v7034_v0 }
 0x1d5   : > { %v1815_v7 = vadd.f32 %v1680_v32, %v1556_v62  ;;  %v2172_v46 = vpop.f32.mrf.mxu0 }
 0x1d6   : > { %4326 = vmatmul.msk.bf16.gmra.mxu3 %vm635_vm2, %v5557_v22 }
 0x1d7   : > { %v5553_v41 = vadd.f32 %v2170_v29, %v1815_v7  ;;  %v1946_v29 = vsel %vm1863_vm4, %v1941_v47, %v1945_v63  ;;  %v7039_v47 = vld [vmem:[#allocation48_spill] sm:$0xff] }
 0x1d8   : > { %v1240_v60 = vrot.slane %v7039_v47, 1 }
 0x1d9   : > { %7033 = vst [vmem:[#allocation133_spill] sm:$0xff] %v5553_v41  ;;  %v1695_v44 = vpop.f32.mrf.mxu3  ;;  %v7038_v41 = vld [vmem:[#allocation35_spill] sm:$0xff] }
 0x1da   : > { %v1423_v1 = vpop.f32.mrf.mxu2  ;;  %v1046_v53 = vpop.f32.mrf.mxu1 }
 0x1db   : > { %v1557_v20 = vadd.f32 %v1423_v1, %v1044_v18  ;;  %v1047_v21 = vadd.f32 %v1046_v53, %v7036_v43  ;;  %v7037_v18 = vld [vmem:[#allocation43_spill] sm:$0xff] }
 0x1dd   : > { %v1816_v32 = vadd.f32 %v1682_v25, %v1557_v20  ;;  %v2175_v8 = vpop.f32.mrf.mxu0  ;;  %4256 = vmatmul.msk.bf16.gmra.mxu1 %vm635_vm2, %v7012_v36  ;;  %v1947_v20 = vrot.slane %v7037_v18, 1  ;;  %v1948_v36 = vrot.slane %v7038_v41, 2 }
 0x1df   : > { %4290 = vmatmul.msk.bf16.gmra.mxu2 %vm635_vm2, %v5497_v30  ;;  %v5566_v62 = vadd.f32 %v2172_v46, %v1816_v32  ;;  %v7041_v46 = vld [vmem:[#allocation91_spill] sm:$0xff]  ;;  %v1949_v53 = vor.u32 %v1948_v36, %v1947_v20 }
 0x1e0   : > { %4358 = vmatmul.msk.bf16.gmra.mxu0 %vm635_vm2, %v1946_v29  ;;  %v5577_v29 = vsel %vm1192_vm3, %v1238_v23, %v1240_v60  ;;  %v7043_v23 = vld [vmem:[#allocation94_spill] sm:$0xff] }
 0x1e1   : > { %7035 = vst [vmem:[#allocation85_spill] sm:$0xff] %v5566_v62  ;;  %v1697_v30 = vpop.f32.mrf.mxu3 }
 0x1e2   : > { %v1426_v25 = vpop.f32.mrf.mxu2  ;;  %v1048_v7 = vpop.f32.mrf.mxu1 }
 0x1e3   : > { %v1558_v1 = vadd.f32 %v1426_v25, %v1047_v21  ;;  %v1049_v32 = vadd.f32 %v1048_v7, %v7041_v46 }
 0x1e5   : > { %v1817_v59 = vadd.f32 %v1685_v58, %v1558_v1  ;;  %v2177_v0 = vpop.f32.mrf.mxu0 }
 0x1e6   : > { %4327 = vmatmul.msk.bf16.gmra.mxu3 %vm635_vm2, %v5577_v29 }
 0x1e7   : > { %v5573_v2 = vadd.f32 %v2175_v8, %v1817_v59  ;;  %v1950_v8 = vsel %vm1863_vm4, %v1945_v63, %v1949_v53  ;;  %v7046_v63 = vld [vmem:[#allocation59_spill] sm:$0xff] }
 0x1e8   : > { %v1242_v41 = vrot.slane %v7046_v63, 1 }
 0x1e9   : > { %7040 = vst [vmem:[#allocation88_spill] sm:$0xff] %v5573_v2  ;;  %v1700_v36 = vpop.f32.mrf.mxu3  ;;  %v7045_v2 = vld [vmem:[#allocation44_spill] sm:$0xff] }
 0x1ea   : > { %v1428_v62 = vpop.f32.mrf.mxu2  ;;  %v1051_v21 = vpop.f32.mrf.mxu1 }
 0x1eb   : > { %v1559_v43 = vadd.f32 %v1428_v62, %v1049_v32  ;;  %v1052_v7 = vadd.f32 %v1051_v21, %v7043_v23  ;;  %v7044_v32 = vld [vmem:[#allocation53_spill] sm:$0xff] }
 0x1ed   : > { %v1818_v58 = vadd.f32 %v1687_v48, %v1559_v43  ;;  %v2180_v25 = vpop.f32.mrf.mxu0  ;;  %4257 = vmatmul.msk.bf16.gmra.mxu1 %vm635_vm2, %v7016_v19  ;;  %v1951_v43 = vrot.slane %v7044_v32, 1  ;;  %v1952_v19 = vrot.slane %v7045_v2, 2 }
 0x1ef   : > { %4291 = vmatmul.msk.bf16.gmra.mxu2 %vm635_vm2, %v5517_v28  ;;  %v5586_v1 = vadd.f32 %v2177_v0, %v1818_v58  ;;  %v7048_v0 = vld [vmem:[#allocation97_spill] sm:$0xff]  ;;  %v1953_v21 = vor.u32 %v1952_v19, %v1951_v43 }
 0x1f0   : > { %4359 = vmatmul.msk.bf16.gmra.mxu0 %vm635_vm2, %v1950_v8  ;;  %v5597_v8 = vsel %vm1192_vm3, %v1240_v60, %v1242_v41  ;;  %v7050_v60 = vld [vmem:[#allocation100_spill] sm:$0xff] }
 0x1f1   : > { %7042 = vst [vmem:[#allocation91_spill] sm:$0xff] %v5586_v1  ;;  %v1702_v28 = vpop.f32.mrf.mxu3 }
 0x1f2   : > { %v1431_v48 = vpop.f32.mrf.mxu2  ;;  %v1053_v59 = vpop.f32.mrf.mxu1 }
 0x1f3   : > { %v1560_v62 = vadd.f32 %v1431_v48, %v1052_v7  ;;  %v1054_v58 = vadd.f32 %v1053_v59, %v7048_v0 }
 0x1f5   : > { %v1819_v20 = vadd.f32 %v1690_v14, %v1560_v62  ;;  %v2182_v46 = vpop.f32.mrf.mxu0 }
 0x1f6   : > { %4328 = vmatmul.msk.bf16.gmra.mxu3 %vm635_vm2, %v5597_v8 }
 0x1f7   : > { %v5593_v18 = vadd.f32 %v2180_v25, %v1819_v20  ;;  %v1954_v25 = vsel %vm1863_vm4, %v1949_v53, %v1953_v21  ;;  %v7053_v53 = vld [vmem:[#allocation70_spill] sm:$0xff] }
 0x1f8   : > { %v1244_v2 = vrot.slane %v7053_v53, 1 }
 0x1f9   : > { %7047 = vst [vmem:[#allocation94_spill] sm:$0xff] %v5593_v18  ;;  %v1705_v19 = vpop.f32.mrf.mxu3  ;;  %v7052_v18 = vld [vmem:[#allocation54_spill] sm:$0xff] }
 0x1fa   : > { %v1433_v1 = vpop.f32.mrf.mxu2  ;;  %v1056_v7 = vpop.f32.mrf.mxu1 }
 0x1fb   : > { %v1561_v23 = vadd.f32 %v1433_v1, %v1054_v58  ;;  %v1057_v59 = vadd.f32 %v1056_v7, %v7050_v60  ;;  %v7051_v58 = vld [vmem:[#allocation65_spill] sm:$0xff] }
 0x1fd   : > { %v1820_v14 = vadd.f32 %v1692_v3, %v1561_v23  ;;  %v2185_v48 = vpop.f32.mrf.mxu0  ;;  %4258 = vmatmul.msk.bf16.gmra.mxu1 %vm635_vm2, %v7021_v55  ;;  %v1955_v23 = vrot.slane %v7051_v58, 1  ;;  %v1956_v55 = vrot.slane %v7052_v18, 2 }
 0x1ff   : > { %4292 = vmatmul.msk.bf16.gmra.mxu2 %vm635_vm2, %v5537_v6  ;;  %v5606_v62 = vadd.f32 %v2182_v46, %v1820_v14  ;;  %v7055_v46 = vld [vmem:[#allocation103_spill] sm:$0xff]  ;;  %v1957_v7 = vor.u32 %v1956_v55, %v1955_v23 }
 0x200   : > { %4360 = vmatmul.msk.bf16.gmra.mxu0 %vm635_vm2, %v1954_v25  ;;  %v5617_v25 = vsel %vm1192_vm3, %v1242_v41, %v1244_v2  ;;  %v7057_v41 = vld [vmem:[#allocation106_spill] sm:$0xff] }
 0x201   : > { %7049 = vst [vmem:[#allocation97_spill] sm:$0xff] %v5606_v62  ;;  %v1707_v6 = vpop.f32.mrf.mxu3 }
 0x202   : > { %v1436_v3 = vpop.f32.mrf.mxu2  ;;  %v1058_v20 = vpop.f32.mrf.mxu1 }
 0x203   : > { %v1562_v1 = vadd.f32 %v1436_v3, %v1057_v59  ;;  %v1059_v14 = vadd.f32 %v1058_v20, %v7055_v46 }
 0x205   : > { %v1821_v43 = vadd.f32 %v1695_v44, %v1562_v1  ;;  %v2187_v0 = vpop.f32.mrf.mxu0 }
 0x206   : > { %4329 = vmatmul.msk.bf16.gmra.mxu3 %vm635_vm2, %v5617_v25 }
 0x207   : > { %v5613_v32 = vadd.f32 %v2185_v48, %v1821_v43  ;;  %v1958_v48 = vsel %vm1863_vm4, %v1953_v21, %v1957_v7  ;;  %v7060_v21 = vld [vmem:[#allocation15_spill] sm:$0xff] }
 0x208   : > { %v1246_v18 = vrot.slane %v7060_v21, 1 }
 0x209   : > { %7054 = vst [vmem:[#allocation100_spill] sm:$0xff] %v5613_v32  ;;  %v1710_v55 = vpop.f32.mrf.mxu3  ;;  %v7059_v32 = vld [vmem:[#allocation66_spill] sm:$0xff] }
 0x20a   : > { %v1438_v62 = vpop.f32.mrf.mxu2  ;;  %v1061_v59 = vpop.f32.mrf.mxu1 }
 0x20b   : > { %v1563_v60 = vadd.f32 %v1438_v62, %v1059_v14  ;;  %v1062_v20 = vadd.f32 %v1061_v59, %v7057_v41  ;;  %v7058_v14 = vld [vmem:[#allocation74_spill] sm:$0xff] }
 0x20d   : > { %v1822_v44 = vadd.f32 %v1697_v30, %v1563_v60  ;;  %v2190_v3 = vpop.f32.mrf.mxu0  ;;  %4259 = vmatmul.msk.bf16.gmra.mxu1 %vm635_vm2, %v7026_v37  ;;  %v1959_v60 = vrot.slane %v7058_v14, 1  ;;  %v1960_v37 = vrot.slane %v7059_v32, 2 }
 0x20f   : > { %4293 = vmatmul.msk.bf16.gmra.mxu2 %vm635_vm2, %v5557_v22  ;;  %v5626_v1 = vadd.f32 %v2187_v0, %v1822_v44  ;;  %v7062_v0 = vld [vmem:[#allocation109_spill] sm:$0xff]  ;;  %v1961_v59 = vor.u32 %v1960_v37, %v1959_v60 }
 0x210   : > { %4361 = vmatmul.msk.bf16.gmra.mxu0 %vm635_vm2, %v1958_v48  ;;  %v5637_v48 = vsel %vm1192_vm3, %v1244_v2, %v1246_v18  ;;  %v7064_v2 = vld [vmem:[#allocation112_spill] sm:$0xff] }
 0x211   : > { %7056 = vst [vmem:[#allocation103_spill] sm:$0xff] %v5626_v1  ;;  %v1712_v22 = vpop.f32.mrf.mxu3 }
 0x212   : > { %v1441_v30 = vpop.f32.mrf.mxu2  ;;  %v1063_v43 = vpop.f32.mrf.mxu1 }
 0x213   : > { %v1564_v62 = vadd.f32 %v1441_v30, %v1062_v20  ;;  %v1064_v44 = vadd.f32 %v1063_v43, %v7062_v0 }
 0x215   : > { %v1823_v23 = vadd.f32 %v1700_v36, %v1564_v62  ;;  %v2192_v46 = vpop.f32.mrf.mxu0 }
 0x216   : > { %4330 = vmatmul.msk.bf16.gmra.mxu3 %vm635_vm2, %v5637_v48 }
 0x217   : > { %v5633_v58 = vadd.f32 %v2190_v3, %v1823_v23  ;;  %v1962_v3 = vsel %vm1863_vm4, %v1957_v7, %v1961_v59  ;;  %v7067_v7 = vld [vmem:[#allocation16_spill] sm:$0xff] }
 0x218   : > { %v1248_v32 = vrot.slane %v7067_v7, 1 }
 0x219   : > { %7061 = vst [vmem:[#allocation106_spill] sm:$0xff] %v5633_v58  ;;  %v1715_v37 = vpop.f32.mrf.mxu3  ;;  %v7066_v58 = vld [vmem:[#allocation75_spill] sm:$0xff] }
 0x21a   : > { %v1443_v1 = vpop.f32.mrf.mxu2  ;;  %v1066_v20 = vpop.f32.mrf.mxu1 }
 0x21b   : > { %v1565_v41 = vadd.f32 %v1443_v1, %v1064_v44  ;;  %v1067_v43 = vadd.f32 %v1066_v20, %v7064_v2  ;;  %v7065_v44 = vld [vmem:[#allocation78_spill] sm:$0xff] }
 0x21d   : > { %v1824_v36 = vadd.f32 %v1702_v28, %v1565_v41  ;;  %v2195_v30 = vpop.f32.mrf.mxu0  ;;  %4260 = vmatmul.msk.bf16.gmra.mxu1 %vm635_vm2, %v7032_v9  ;;  %v1963_v41 = vrot.slane %v7065_v44, 1  ;;  %v1964_v9 = vrot.slane %v7066_v58, 2 }
 0x21f   : > { %4294 = vmatmul.msk.bf16.gmra.mxu2 %vm635_vm2, %v5577_v29  ;;  %v5646_v62 = vadd.f32 %v2192_v46, %v1824_v36  ;;  %v7069_v46 = vld [vmem:[#allocation115_spill] sm:$0xff]  ;;  %v1965_v20 = vor.u32 %v1964_v9, %v1963_v41 }
 0x220   : > { %4362 = vmatmul.msk.bf16.gmra.mxu0 %vm635_vm2, %v1962_v3  ;;  %v5657_v3 = vsel %vm1192_vm3, %v1246_v18, %v1248_v32  ;;  %v7071_v18 = vld [vmem:[#allocation118_spill] sm:$0xff] }
 0x221   : > { %7063 = vst [vmem:[#allocation109_spill] sm:$0xff] %v5646_v62  ;;  %v1717_v29 = vpop.f32.mrf.mxu3 }
 0x222   : > { %v1446_v28 = vpop.f32.mrf.mxu2  ;;  %v1068_v23 = vpop.f32.mrf.mxu1 }
 0x223   : > { %v1566_v1 = vadd.f32 %v1446_v28, %v1067_v43  ;;  %v1069_v36 = vadd.f32 %v1068_v23, %v7069_v46 }
 0x225   : > { %v1825_v60 = vadd.f32 %v1705_v19, %v1566_v1  ;;  %v2197_v0 = vpop.f32.mrf.mxu0 }
 0x226   : > { %4331 = vmatmul.msk.bf16.gmra.mxu3 %vm635_vm2, %v5657_v3 }
 0x227   : > { %v5653_v14 = vadd.f32 %v2195_v30, %v1825_v60  ;;  %v1966_v30 = vsel %vm1863_vm4, %v1961_v59, %v1965_v20  ;;  %v7074_v59 = vld [vmem:[#allocation23_spill] sm:$0xff] }
 0x228   : > { %v1250_v58 = vrot.slane %v7074_v59, 1 }
 0x229   : > { %7068 = vst [vmem:[#allocation112_spill] sm:$0xff] %v5653_v14  ;;  %v1720_v9 = vpop.f32.mrf.mxu3  ;;  %v7073_v14 = vld [vmem:[#allocation18_spill] sm:$0xff] }
 0x22a   : > { %v1448_v62 = vpop.f32.mrf.mxu2  ;;  %v1071_v43 = vpop.f32.mrf.mxu1 }
 0x22b   : > { %v1567_v2 = vadd.f32 %v1448_v62, %v1069_v36  ;;  %v1072_v23 = vadd.f32 %v1071_v43, %v7071_v18  ;;  %v7072_v36 = vld [vmem:[#allocation19_spill] sm:$0xff] }
 0x22d   : > { %v1826_v19 = vadd.f32 %v1707_v6, %v1567_v2  ;;  %v2200_v28 = vpop.f32.mrf.mxu0  ;;  %4261 = vmatmul.msk.bf16.gmra.mxu1 %vm635_vm2, %v7039_v47  ;;  %v1967_v2 = vrot.slane %v7072_v36, 1  ;;  %v1968_v47 = vrot.slane %v7073_v14, 2 }
 0x22f   : > { %4295 = vmatmul.msk.bf16.gmra.mxu2 %vm635_vm2, %v5597_v8  ;;  %v5666_v1 = vadd.f32 %v2197_v0, %v1826_v19  ;;  %v7076_v0 = vld [vmem:[#allocation120_spill] sm:$0xff]  ;;  %v1969_v43 = vor.u32 %v1968_v47, %v1967_v2 }
 0x230   : > { %4363 = vmatmul.msk.bf16.gmra.mxu0 %vm635_vm2, %v1966_v30  ;;  %v5677_v30 = vsel %vm1192_vm3, %v1248_v32, %v1250_v58  ;;  %v7078_v32 = vld [vmem:[#allocation122_spill] sm:$0xff] }
 0x231   : > { %7070 = vst [vmem:[#allocation115_spill] sm:$0xff] %v5666_v1  ;;  %v1722_v8 = vpop.f32.mrf.mxu3 }
 0x232   : > { %v1451_v6 = vpop.f32.mrf.mxu2  ;;  %v1073_v60 = vpop.f32.mrf.mxu1 }
 0x233   : > { %v1568_v62 = vadd.f32 %v1451_v6, %v1072_v23  ;;  %v1074_v19 = vadd.f32 %v1073_v60, %v7076_v0 }
 0x235   : > { %v1827_v41 = vadd.f32 %v1710_v55, %v1568_v62  ;;  %v2202_v46 = vpop.f32.mrf.mxu0 }
 0x236   : > { %4332 = vmatmul.msk.bf16.gmra.mxu3 %vm635_vm2, %v5677_v30 }
 0x237   : > { %v5673_v44 = vadd.f32 %v2200_v28, %v1827_v41  ;;  %v1970_v28 = vsel %vm1863_vm4, %v1965_v20, %v1969_v43  ;;  %v7081_v20 = vld [vmem:[#allocation32_spill] sm:$0xff] }
 0x238   : > { %v1252_v14 = vrot.slane %v7081_v20, 1 }
 0x239   : > { %7075 = vst [vmem:[#allocation118_spill] sm:$0xff] %v5673_v44  ;;  %v1725_v47 = vpop.f32.mrf.mxu3  ;;  %v7080_v44 = vld [vmem:[#allocation20_spill] sm:$0xff] }
 0x23a   : > { %v1453_v1 = vpop.f32.mrf.mxu2  ;;  %v1076_v23 = vpop.f32.mrf.mxu1 }
 0x23b   : > { %v1569_v18 = vadd.f32 %v1453_v1, %v1074_v19  ;;  %v1077_v60 = vadd.f32 %v1076_v23, %v7078_v32  ;;  %v7079_v19 = vld [vmem:[#allocation24_spill] sm:$0xff] }
 0x23d   : > { %v1828_v55 = vadd.f32 %v1712_v22, %v1569_v18  ;;  %v2205_v6 = vpop.f32.mrf.mxu0  ;;  %4262 = vmatmul.msk.bf16.gmra.mxu1 %vm635_vm2, %v7046_v63  ;;  %v1971_v18 = vrot.slane %v7079_v19, 1  ;;  %v1972_v63 = vrot.slane %v7080_v44, 2 }
 0x23f   : > { %4296 = vmatmul.msk.bf16.gmra.mxu2 %vm635_vm2, %v5617_v25  ;;  %v5686_v62 = vadd.f32 %v2202_v46, %v1828_v55  ;;  %v7083_v46 = vld [vmem:[#allocation124_spill] sm:$0xff]  ;;  %v1973_v23 = vor.u32 %v1972_v63, %v1971_v18 }
 0x240   : > { %4364 = vmatmul.msk.bf16.gmra.mxu0 %vm635_vm2, %v1970_v28  ;;  %v5697_v28 = vsel %vm1192_vm3, %v1250_v58, %v1252_v14  ;;  %v7085_v58 = vld [vmem:[#allocation80_spill] sm:$0xff] }
 0x241   : > { %7077 = vst [vmem:[#allocation120_spill] sm:$0xff] %v5686_v62  ;;  %v1727_v25 = vpop.f32.mrf.mxu3 }
 0x242   : > { %v1456_v22 = vpop.f32.mrf.mxu2  ;;  %v1078_v41 = vpop.f32.mrf.mxu1 }
 0x243   : > { %v1570_v1 = vadd.f32 %v1456_v22, %v1077_v60  ;;  %v1079_v55 = vadd.f32 %v1078_v41, %v7083_v46 }
 0x245   : > { %v1829_v2 = vadd.f32 %v1715_v37, %v1570_v1  ;;  %v2207_v0 = vpop.f32.mrf.mxu0 }
 0x246   : > { %4333 = vmatmul.msk.bf16.gmra.mxu3 %vm635_vm2, %v5697_v28 }
 0x247   : > { %v5693_v36 = vadd.f32 %v2205_v6, %v1829_v2  ;;  %v1974_v6 = vsel %vm1863_vm4, %v1969_v43, %v1973_v23  ;;  %v7088_v43 = vld [vmem:[#allocation41_spill] sm:$0xff] }
 0x248   : > { %v1254_v44 = vrot.slane %v7088_v43, 1 }
 0x249   : > { %7082 = vst [vmem:[#allocation122_spill] sm:$0xff] %v5693_v36  ;;  %v1730_v63 = vpop.f32.mrf.mxu3  ;;  %v7087_v36 = vld [vmem:[#allocation27_spill] sm:$0xff] }
 0x24a   : > { %v1458_v62 = vpop.f32.mrf.mxu2  ;;  %v1081_v60 = vpop.f32.mrf.mxu1 }
 0x24b   : > { %v1571_v32 = vadd.f32 %v1458_v62, %v1079_v55  ;;  %v1082_v41 = vadd.f32 %v1081_v60, %v7085_v58  ;;  %v7086_v55 = vld [vmem:[#allocation33_spill] sm:$0xff] }
 0x24d   : > { %v1830_v37 = vadd.f32 %v1717_v29, %v1571_v32  ;;  %v2210_v22 = vpop.f32.mrf.mxu0  ;;  %4263 = vmatmul.msk.bf16.gmra.mxu1 %vm635_vm2, %v7053_v53  ;;  %v1975_v32 = vrot.slane %v7086_v55, 1  ;;  %v1976_v53 = vrot.slane %v7087_v36, 2  ;;  %v7101_v36 = vld [vmem:[#allocation45_spill] sm:$0xff] }
 0x24f   : > { %4297 = vmatmul.msk.bf16.gmra.mxu2 %vm635_vm2, %v5637_v48  ;;  %v5706_v1 = vadd.f32 %v2207_v0, %v1830_v37  ;;  %v7090_v0 = vld [vmem:[#allocation82_spill] sm:$0xff]  ;;  %v1977_v60 = vor.u32 %v1976_v53, %v1975_v32 }
 0x250   : > { %4365 = vmatmul.msk.bf16.gmra.mxu0 %vm635_vm2, %v1974_v6  ;;  %v5717_v6 = vsel %vm1192_vm3, %v1252_v14, %v1254_v44  ;;  %v7092_v14 = vld [vmem:[#allocation84_spill] sm:$0xff] }
 0x251   : > { %7084 = vst [vmem:[#allocation124_spill] sm:$0xff] %v5706_v1  ;;  %v1732_v48 = vpop.f32.mrf.mxu3 }
 0x252   : > { %v1461_v29 = vpop.f32.mrf.mxu2  ;;  %v1083_v2 = vpop.f32.mrf.mxu1 }
 0x253   : > { %v1572_v62 = vadd.f32 %v1461_v29, %v1082_v41  ;;  %v1084_v37 = vadd.f32 %v1083_v2, %v7090_v0 }
 0x255   : > { %v1831_v18 = vadd.f32 %v1720_v9, %v1572_v62  ;;  %v2212_v46 = vpop.f32.mrf.mxu0 }
 0x256   : > { %4334 = vmatmul.msk.bf16.gmra.mxu3 %vm635_vm2, %v5717_v6 }
 0x257   : > { %v5713_v19 = vadd.f32 %v2210_v22, %v1831_v18  ;;  %v1978_v22 = vsel %vm1863_vm4, %v1973_v23, %v1977_v60 }
 0x259   : > { %7089 = vst [vmem:[#allocation80_spill] sm:$0xff] %v5713_v19  ;;  %v5728_v53 = vpop.f32.mrf.mxu3  ;;  %v7094_v19 = vld [vmem:[#allocation36_spill] sm:$0xff] }
 0x25a   : > { %v1463_v1 = vpop.f32.mrf.mxu2  ;;  %v1086_v41 = vpop.f32.mrf.mxu1  ;;  %v1980_v23 = vrot.slane %v7094_v19, 2 }
 0x25b   : > { %v1573_v58 = vadd.f32 %v1463_v1, %v1084_v37  ;;  %v1087_v1 = vadd.f32 %v1086_v41, %v7092_v14  ;;  %v7093_v37 = vld [vmem:[#allocation42_spill] sm:$0xff]  ;;  %v7097_v41 = vld [vmem:[#allocation87_spill] sm:$0xff] }
 0x25d   : > { %v1832_v9 = vadd.f32 %v1722_v8, %v1573_v58  ;;  %v2215_v29 = vpop.f32.mrf.mxu0  ;;  %4264 = vmatmul.msk.bf16.gmra.mxu1 %vm635_vm2, %v7060_v21  ;;  %v1979_v58 = vrot.slane %v7093_v37, 1  ;;  %v7095_v21 = vld [vmem:[#allocation50_spill] sm:$0xff] }
 0x25f   : > { %4298 = vmatmul.msk.bf16.gmra.mxu2 %vm635_vm2, %v5657_v3  ;;  %v5726_v62 = vadd.f32 %v2212_v46, %v1832_v9  ;;  %v5735_v3 = vrot.slane %v7095_v21, 1 }
 0x260   : > { %4366 = vmatmul.msk.bf16.gmra.mxu0 %vm635_vm2, %v1978_v22 }
 0x261   : > { %7091 = vst [vmem:[#allocation33_spill] sm:$0xff] %v5726_v62  ;;  %v5739_v9 = vpop.f32.mrf.mxu3 }
 0x262   : > { %v1466_v8 = vpop.f32.mrf.mxu2  ;;  %v1088_v18 = vpop.f32.mrf.mxu1 }
 0x263   : > { %v1574_v2 = vadd.f32 %v1466_v8, %v1087_v1  ;;  %v1089_v14 = vadd.f32 %v1088_v18, %v7097_v41  ;;  %v1981_v1 = vor.u32 %v1980_v23, %v1979_v58  ;;  %v325_v18 = vld [vmem:[%s4959_s12 + $0x8] sm:$0xff]  ;;  %v7099_v58 = vld [vmem:[#allocation90_spill] sm:$0xff] }
 0x265   : > { %v1833_v32 = vadd.f32 %v1725_v47, %v1574_v2  ;;  %v2217_v0 = vpop.f32.mrf.mxu0  ;;  %v5744_v47 = vsel %vm1192_vm3, %v1254_v44, %v5735_v3 }
 0x266   : > { %4335 = vmatmul.msk.bf16.gmra.mxu3 %vm635_vm2, %v5744_v47 }
 0x267   : > { %v5737_v46 = vadd.f32 %v2215_v29, %v1833_v32  ;;  %v1982_v29 = vsel %vm1863_vm4, %v1977_v60, %v1981_v1 }
 0x269   : > { %7096 = vst [vmem:[#allocation41_spill] sm:$0xff] %v5737_v46  ;;  %v5756_v44 = vpop.f32.mrf.mxu3 }
 0x26a   : > { %v1468_v22 = vpop.f32.mrf.mxu2  ;;  %v1091_v2 = vpop.f32.mrf.mxu1 }
 0x26b   : > { %v1575_v8 = vadd.f32 %v1468_v22, %v1089_v14  ;;  %v1092_v23 = vadd.f32 %v1091_v2, %v7099_v58  ;;  %v7103_v2 = vld [vmem:[#allocation93_spill] sm:$0xff] }
 0x26d   : > { %v1834_v62 = vadd.f32 %v1727_v25, %v1575_v8  ;;  %v2220_v19 = vpop.f32.mrf.mxu0  ;;  %4265 = vmatmul.msk.bf16.gmra.mxu1 %vm635_vm2, %v7067_v7  ;;  %v4522_v25 = vld [vmem:[%s4959_s12] sm:$0xff]  ;;  %v7100_v7 = vld [vmem:[#allocation51_spill] sm:$0xff] }
 0x26e   : > { %v5761_v41 = vpack.c.bf16 %v325_v18, %v4522_v25  ;;  %v1983_v37 = vrot.slane %v7100_v7, 1 }
 0x26f   : > { %4299 = vmatmul.msk.bf16.gmra.mxu2 %vm635_vm2, %v5677_v30  ;;  %v5754_v32 = vadd.f32 %v2217_v0, %v1834_v62  ;;  %v1984_v30 = vrot.slane %v7101_v36, 2 }
 0x270   : > { %4367 = vmatmul.msk.bf16.gmra.mxu0 %vm635_vm2, %v1982_v29  ;;  %v1608_v62 = vrot.slane %v5761_v41, 1 }
 0x271   : > { %7098 = vst [vmem:[#allocation82_spill] sm:$0xff] %v5754_v32  ;;  %v5768_v32 = vpop.f32.mrf.mxu3  ;;  %v1985_v18 = vor.u32 %v1984_v30, %v1983_v37 }
 0x272   : > { %v1471_v14 = vpop.f32.mrf.mxu2  ;;  %v1093_v8 = vpop.f32.mrf.mxu1 }
 0x273   : > { %v1576_v22 = vadd.f32 %v1471_v14, %v1092_v23  ;;  %v1094_v29 = vadd.f32 %v1093_v8, %v7103_v2  ;;  %v1609_v23 = vsel %vm1192_vm3, %v5735_v3, %v1608_v62  ;;  %v7105_v8 = vld [vmem:[#allocation96_spill] sm:$0xff] }
 0x275   : > { %v1835_v46 = vadd.f32 %v1730_v63, %v1576_v22  ;;  %v2222_v60 = vpop.f32.mrf.mxu0 }
 0x276   : > { %4336 = vmatmul.msk.bf16.gmra.mxu3 %vm635_vm2, %v1609_v23 }
 0x277   : > { %v5766_v0 = vadd.f32 %v2220_v19, %v1835_v46  ;;  %v1986_v19 = vsel %vm1863_vm4, %v1981_v1, %v1985_v18 }
 0x279   : > { %7102 = vst [vmem:[#allocation84_spill] sm:$0xff] %v5766_v0  ;;  %v5781_v37 = vpop.f32.mrf.mxu3  ;;  %v7107_v0 = vld [vmem:[#allocation62_spill] sm:$0xff] }
 0x27a   : > { %v1473_v58 = vpop.f32.mrf.mxu2  ;;  %v1096_v25 = vpop.f32.mrf.mxu1 }
 0x27b   : > { %v1577_v63 = vadd.f32 %v1473_v58, %v1094_v29  ;;  %v1097_v30 = vadd.f32 %v1096_v25, %v7105_v8  ;;  %v326_v58 = vld [vmem:[%s4959_s12 + $0x10] sm:$0xff] }
 0x27c   : > { %v5786_v23 = vpack.c.bf16 %v326_v58, %v326_v58 }
 0x27d   : > { %v1836_v14 = vadd.f32 %v1732_v48, %v1577_v63  ;;  %v2225_v22 = vpop.f32.mrf.mxu0  ;;  %4266 = vmatmul.msk.bf16.gmra.mxu1 %vm635_vm2, %v7074_v59  ;;  %v1987_v59 = vrot.slane %v7107_v0, 1 }
 0x27e   : > { %7106 = vst [vmem:[#allocation87_spill] sm:$0xff] %v5786_v23 }
 0x27f   : > { %4300 = vmatmul.msk.bf16.gmra.mxu2 %vm635_vm2, %v5697_v28  ;;  %v5779_v46 = vadd.f32 %v2222_v60, %v1836_v14  ;;  %v7108_v28 = vld [vmem:[#allocation55_spill] sm:$0xff]  ;;  %v1610_v14 = vrot.slane %v5786_v23, 1 }
 0x280   : > { %4368 = vmatmul.msk.bf16.gmra.mxu0 %vm635_vm2, %v1986_v19  ;;  %v1988_v60 = vrot.slane %v7108_v28, 2  ;;  %v7110_v19 = vld [vmem:[#allocation99_spill] sm:$0xff] }
 0x281   : > { %7104 = vst [vmem:[#allocation50_spill] sm:$0xff] %v5779_v46  ;;  %v5794_v25 = vpop.f32.mrf.mxu3  ;;  %v1611_v58 = vsel %vm1192_vm3, %v1608_v62, %v1610_v14  ;;  %v7112_v62 = vld [vmem:[#allocation102_spill] sm:$0xff] }
 0x282   : > { %v1476_v48 = vpop.f32.mrf.mxu2  ;;  %v1098_v29 = vpop.f32.mrf.mxu1 }
 0x283   : > { %v1578_v2 = vadd.f32 %v1476_v48, %v1097_v30  ;;  %v1099_v8 = vadd.f32 %v1098_v29, %v7110_v19  ;;  %v1989_v48 = vor.u32 %v1988_v60, %v1987_v59  ;;  %v6865_v60 = vshll.u32 %v5761_v41, 16 }
 0x285   : > { %v1837_v63 = vadd.f32 %v5728_v53, %v1578_v2  ;;  %v2227_v1 = vpop.f32.mrf.mxu0 }
 0x286   : > { %4337 = vmatmul.msk.bf16.gmra.mxu3 %vm635_vm2, %v1611_v58 }
 0x287   : > { %v5792_v46 = vadd.f32 %v2225_v22, %v1837_v63  ;;  %v1990_v22 = vsel %vm1863_vm4, %v1985_v18, %v1989_v48 }
 0x289   : > { %7109 = vst [vmem:[#allocation90_spill] sm:$0xff] %v5792_v46  ;;  %v5807_v59 = vpop.f32.mrf.mxu3 }
 0x28a   : > { %v1478_v30 = vpop.f32.mrf.mxu2  ;;  %v1101_v7 = vpop.f32.mrf.mxu1 }
 0x28b   : > { %v1579_v36 = vadd.f32 %v1478_v30, %v1099_v8  ;;  %v1102_v63 = vadd.f32 %v1101_v7, %v7112_v62  ;;  %v7113_v8 = vld [vmem:[#allocation28_spill] sm:$0xff]  ;;  %v7114_v30 = vld [vmem:[#allocation17_spill] sm:$0xff]  ;;  %v1997_v62 = vrot.slane %v6865_v60, 2 }
 0x28c   : > { %v3025_v18 = vrot.slane %v7113_v8, 2  ;;  %v3026_v58 = vrot.slane %v7114_v30, 3  ;;  %v7118_v30 = vld [vmem:[#allocation105_spill] sm:$0xff] }
 0x28d   : > { %v1838_v53 = vadd.f32 %v5739_v9, %v1579_v36  ;;  %v2230_v2 = vpop.f32.mrf.mxu0  ;;  %4267 = vmatmul.msk.bf16.gmra.mxu1 %vm635_vm2, %v7081_v20  ;;  %v6864_v9 = vshrl.u32 %v5761_v41, 16 }
 0x28e   : > { %v3027_v20 = vor.u32 %v3026_v58, %v3025_v18  ;;  %v2001_v18 = vshrl.u32 %v5786_v23, 16  ;;  %v2004_v58 = vshll.u32 %v5786_v23, 16 }
 0x28f   : > { %4301 = vmatmul.msk.bf16.gmra.mxu2 %vm635_vm2, %v5717_v6  ;;  %v5805_v29 = vadd.f32 %v2227_v1, %v1838_v53  ;;  %v7115_v6 = vld [vmem:[#allocation37_spill] sm:$0xff] }
 0x290   : > { %4369 = vmatmul.msk.bf16.gmra.mxu0 %vm635_vm2, %v1990_v22  ;;  %v3028_v1 = vrot.slane %v7115_v6, 2  ;;  %v1994_v22 = vrot.slane %v6864_v9, 1 }
 0x291   : > { %7111 = vst [vmem:[#allocation93_spill] sm:$0xff] %v5805_v29  ;;  %v7116_v29 = vld [vmem:[#allocation29_spill] sm:$0xff]  ;;  %v5824_v8 = vpop.f32.mrf.mxu3 }
 0x292   : > { %v1481_v36 = vpop.f32.mrf.mxu2  ;;  %v1103_v19 = vpop.f32.mrf.mxu1  ;;  %v3029_v46 = vrot.slane %v7116_v29, 3 }
 0x293   : > { %v1580_v14 = vadd.f32 %v1481_v36, %v1102_v63  ;;  %v1104_v6 = vadd.f32 %v1103_v19, %v7118_v30 }
 0x294   : > { %v3030_v63 = vor.u32 %v3029_v46, %v3028_v1 }
 0x295   : > { %v1839_v53 = vadd.f32 %v5756_v44, %v1580_v14  ;;  %v2232_v7 = vpop.f32.mrf.mxu0  ;;  %v1998_v44 = vor.u32 %v1997_v62, %v1994_v22  ;;  %v7121_v22 = vld [vmem:[#allocation46_spill] sm:$0xff] }
 0x296   : > { %v3031_v29 = vsel %vm3024_vm5, %v3027_v20, %v3030_v63  ;;  %v7120_v20 = vld [vmem:[#allocation108_spill] sm:$0xff]  ;;  %v7122_v62 = vld [vmem:[#allocation38_spill] sm:$0xff] }
 0x297   : > { %v5822_v36 = vadd.f32 %v2230_v2, %v1839_v53  ;;  %4441 = vmatmul.msk.bf16.vlgmr.msra.gmra.mxu3 %vm635_vm2, %v3031_v29  ;;  %v1999_v46 = vsel %vm1863_vm4, %v1989_v48, %v1998_v44  ;;  %v3032_v48 = vrot.slane %v7121_v22, 2  ;;  %v3033_v30 = vrot.slane %v7122_v62, 3 }
 0x299   : > { %7117 = vst [vmem:[#allocation96_spill] sm:$0xff] %v5822_v36  ;;  %v5837_v19 = vpop.f32.mrf.mxu3  ;;  %v3034_v29 = vor.u32 %v3033_v30, %v3032_v48  ;;  %v7127_v30 = vld [vmem:[#allocation47_spill] sm:$0xff] }
 0x29a   : > { %v1483_v28 = vpop.f32.mrf.mxu2  ;;  %v1106_v0 = vpop.f32.mrf.mxu1 }
 0x29b   : > { %v1581_v14 = vadd.f32 %v1483_v28, %v1104_v6  ;;  %v1107_v28 = vadd.f32 %v1106_v0, %v7120_v20  ;;  %v2006_v6 = vrot.slane %v2004_v58, 2  ;;  %v3035_v22 = vsel %vm3024_vm5, %v3030_v63, %v3034_v29 }
 0x29d   : > { %v1840_v9 = vadd.f32 %v5768_v32, %v1581_v14  ;;  %v2235_v60 = vpop.f32.mrf.mxu0  ;;  %4268 = vmatmul.msk.bf16.gmra.mxu1 %vm635_vm2, %v7088_v43  ;;  %v7123_v14 = vld [vmem:[#allocation61_spill] sm:$0xff] }
 0x29f   : > { %4302 = vmatmul.msk.bf16.gmra.mxu2 %vm635_vm2, %v5744_v47  ;;  %v5835_v2 = vadd.f32 %v2232_v7, %v1840_v9  ;;  %v2003_v7 = vrot.slane %v2001_v18, 1 }
 0x2a0   : > { %4370 = vmatmul.msk.bf16.gmra.mxu0 %vm635_vm2, %v1999_v46  ;;  %v1258_v46 = vrot.slane %v7123_v14, 1  ;;  %v7128_v14 = vld [vmem:[#allocation9_spill] sm:$0xff] }
 0x2a1   : > { %7119 = vst [vmem:[#allocation99_spill] sm:$0xff] %v5835_v2  ;;  %v5849_v20 = vpop.f32.mrf.mxu3  ;;  %v7124_v2 = vld [vmem:[#allocation111_spill] sm:$0xff] }
 0x2a2   : > { %v1486_v32 = vpop.f32.mrf.mxu2  ;;  %v1108_v53 = vpop.f32.mrf.mxu1 }
 0x2a3   : > { %v1582_v1 = vadd.f32 %v1486_v32, %v1107_v28  ;;  %v1109_v23 = vadd.f32 %v1108_v53, %v7124_v2  ;;  %v2007_v32 = vor.u32 %v2006_v6, %v2003_v7  ;;  %v7126_v53 = vld [vmem:[#allocation56_spill] sm:$0xff] }
 0x2a4   : > { %v3036_v48 = vrot.slane %v7126_v53, 2 }
 0x2a5   : > { %v1841_v47 = vadd.f32 %v5781_v37, %v1582_v1  ;;  %v2237_v9 = vpop.f32.mrf.mxu0  ;;  %v1259_v37 = vsel %vm1192_vm3, %v5735_v3, %v1258_v46  ;;  %v2008_v58 = vsel %vm1863_vm4, %v1998_v44, %v2007_v32  ;;  %v7129_v46 = vld [vmem:[#allocation11_spill] sm:$0xff] }
 0x2a7   : > { %v5846_v0 = vadd.f32 %v2235_v60, %v1841_v47  ;;  %4442 = vmatmul.msk.bf16.gmra.mxu3 %vm635_vm2, %v3035_v22  ;;  %v3037_v47 = vrot.slane %v7127_v30, 3  ;;  %v7131_v22 = vld [vmem:[#allocation22_spill] sm:$0xff] }
 0x2a9   : > { %v5863_v63 = vpop.f32.mrf.mxu3  ;;  %v3038_v6 = vor.u32 %v3037_v47, %v3036_v48 }
 0x2aa   : > { %v1488_v28 = vpop.f32.mrf.mxu2  ;;  %v1111_v62 = vpop.f32.mrf.mxu1 }
 0x2ab   : > { %v1583_v36 = vadd.f32 %v1488_v28, %v1109_v23  ;;  %v7125_v23 = vld [vmem:[#allocation114_spill] sm:$0xff]  ;;  %v2355_v28 = vrot.slane %v7129_v46, 2 }
 0x2ac   : > { %v1112_v1 = vadd.f32 %v1111_v62, %v7125_v23  ;;  %v2357_v62 = vrot.slane %v7131_v22, 2 }
 0x2ad   : > { %v1842_v18 = vadd.f32 %v5794_v25, %v1583_v36  ;;  %v2240_v60 = vpop.f32.mrf.mxu0  ;;  %4269 = vmatmul.msk.bf16.gmra.mxu1 %vm635_vm2, %v7095_v21 }
 0x2af   : > { %4303 = vmatmul.msk.bf16.gmra.mxu2 %vm635_vm2, %v1259_v37  ;;  %v5861_v2 = vadd.f32 %v2237_v9, %v1842_v18  ;;  %v2354_v9 = vrot.slane %v7128_v14, 2  ;;  %v7132_v18 = vld [vmem:[#allocation117_spill] sm:$0xff]  ;;  %v7134_v14 = vld [vmem:[#allocation119_spill] sm:$0xff] }
 0x2b0   : > { %4371 = vmatmul.msk.bf16.gmra.mxu0 %vm635_vm2, %v2008_v58 }
 0x2b1   : > { %v5875_v37 = vpop.f32.mrf.mxu3  ;;  %v2356_v48 = vsel %vm2353_vm6, %v2354_v9, %v2355_v28 }
 0x2b2   : > { %v1491_v3 = vpop.f32.mrf.mxu2  ;;  %v1113_v36 = vpop.f32.mrf.mxu1 }
 0x2b3   : > { %v1584_v25 = vadd.f32 %v1491_v3, %v1112_v1  ;;  %v1114_v58 = vadd.f32 %v1113_v36, %v7132_v18  ;;  %v3515_v1 = vrot.slane %v7129_v46, 3  ;;  %v3039_v3 = vsel %vm3024_vm5, %v3034_v29, %v3038_v6 }
 0x2b5   : > { %v1843_v7 = vadd.f32 %v5807_v59, %v1584_v25  ;;  %v2242_v44 = vpop.f32.mrf.mxu0  ;;  %v3516_v59 = vrot.slane %v7131_v22, 3  ;;  %v7135_v22 = vld [vmem:[#allocation67_spill] sm:$0xff] }
 0x2b6   : > { %v3040_v18 = vrot.slane %v7135_v22, 2 }
 0x2b7   : > { %v5872_v32 = vadd.f32 %v2240_v60, %v1843_v7  ;;  %v2358_v60 = vsel %vm2353_vm6, %v2355_v28, %v2357_v62  ;;  %4443 = vmatmul.msk.bf16.gmra.mxu3 %vm635_vm2, %v3039_v3  ;;  %v3517_v36 = vsel %vm3514_vm7, %v3515_v1, %v3516_v59 }
 0x2b9   : > { %7130 = vst [vmem:[#allocation102_spill] sm:$0xff] %v5872_v32  ;;  %v5890_v29 = vpop.f32.mrf.mxu3 }
 0x2ba   : > { %v1493_v23 = vpop.f32.mrf.mxu2  ;;  %v1116_v53 = vpop.f32.mrf.mxu1 }
 0x2bb   : > { %v1585_v25 = vadd.f32 %v1493_v23, %v1114_v58  ;;  %v1117_v9 = vadd.f32 %v1116_v53, %v7134_v14  ;;  %v7136_v58 = vld [vmem:[#allocation57_spill] sm:$0xff] }
 0x2bc   : > { %v3041_v23 = vrot.slane %v7136_v58, 3  ;;  %v7139_v53 = vld [vmem:[#allocation121_spill] sm:$0xff] }
 0x2bd   : > { %v1844_v30 = vadd.f32 %v5824_v8, %v1585_v25  ;;  %v2245_v47 = vpop.f32.mrf.mxu0  ;;  %4373 = vmatmul.msk.bf16.vlgmr.msra.gmra.mxu1 %vm635_vm2, %v2356_v48 }
 0x2be   : > { %v3042_v25 = vor.u32 %v3041_v23, %v3040_v18 }
 0x2bf   : > { %4407 = vmatmul.msk.bf16.vlgmr.msra.gmra.mxu2 %vm635_vm2, %v2358_v60  ;;  %v5888_v7 = vadd.f32 %v2242_v44, %v1844_v30  ;;  %v7138_v44 = vld [vmem:[#allocation31_spill] sm:$0xff] }
 0x2c0   : > { %4475 = vmatmul.msk.bf16.vlgmr.msra.gmra.mxu0 %vm635_vm2, %v3517_v36  ;;  %v2359_v30 = vrot.slane %v7138_v44, 2 }
 0x2c1   : > { %7133 = vst [vmem:[#allocation28_spill] sm:$0xff] %v5888_v7  ;;  %v5900_v7 = vpop.f32.mrf.mxu3 }
 0x2c2   : > { %v1496_v46 = vpop.f32.mrf.mxu2  ;;  %v1118_v8 = vpop.f32.mrf.mxu1  ;;  %v2360_v58 = vsel %vm2353_vm6, %v2357_v62, %v2359_v30 }
 0x2c3   : > { %v1586_v28 = vadd.f32 %v1496_v46, %v1117_v9  ;;  %v1119_v14 = vadd.f32 %v1118_v8, %v7139_v53  ;;  %v3518_v9 = vrot.slane %v7138_v44, 3  ;;  %v3043_v46 = vsel %vm3024_vm5, %v3038_v6, %v3042_v25  ;;  %v7141_v6 = vld [vmem:[#allocation123_spill] sm:$0xff]  ;;  %v7142_v44 = vld [vmem:[#allocation76_spill] sm:$0xff] }
 0x2c4   : > { %v3044_v53 = vrot.slane %v7142_v44, 2 }
 0x2c5   : > { %v1845_v3 = vadd.f32 %v5837_v19, %v1586_v28  ;;  %v2247_v1 = vpop.f32.mrf.mxu0  ;;  %v3519_v28 = vsel %vm3514_vm7, %v3516_v59, %v3518_v9 }
 0x2c7   : > { %v5897_v48 = vadd.f32 %v2245_v47, %v1845_v3  ;;  %4444 = vmatmul.msk.bf16.gmra.mxu3 %vm635_vm2, %v3043_v46 }
 0x2c9   : > { %7137 = vst [vmem:[#allocation17_spill] sm:$0xff] %v5897_v48  ;;  %v5913_v18 = vpop.f32.mrf.mxu3 }
 0x2ca   : > { %v1498_v36 = vpop.f32.mrf.mxu2  ;;  %v1121_v32 = vpop.f32.mrf.mxu1 }
 0x2cb   : > { %v1587_v22 = vadd.f32 %v1498_v36, %v1119_v14  ;;  %v1122_v23 = vadd.f32 %v1121_v32, %v7141_v6  ;;  %v7143_v14 = vld [vmem:[#allocation68_spill] sm:$0xff]  ;;  %v7146_v32 = vld [vmem:[#allocation125_spill] sm:$0xff] }
 0x2cc   : > { %v3045_v36 = vrot.slane %v7143_v14, 3 }
 0x2cd   : > { %v1846_v19 = vadd.f32 %v5849_v20, %v1587_v22  ;;  %v2250_v47 = vpop.f32.mrf.mxu0  ;;  %4374 = vmatmul.msk.bf16.gmra.mxu1 %vm635_vm2, %v2358_v60 }
 0x2ce   : > { %v3046_v46 = vor.u32 %v3045_v36, %v3044_v53 }
 0x2cf   : > { %4408 = vmatmul.msk.bf16.gmra.mxu2 %vm635_vm2, %v2360_v58  ;;  %v5911_v8 = vadd.f32 %v2247_v1, %v1846_v19  ;;  %v7145_v1 = vld [vmem:[#allocation40_spill] sm:$0xff] }
 0x2d0   : > { %4476 = vmatmul.msk.bf16.gmra.mxu0 %vm635_vm2, %v3519_v28  ;;  %v2361_v19 = vrot.slane %v7145_v1, 2 }
 0x2d1   : > { %7140 = vst [vmem:[#allocation37_spill] sm:$0xff] %v5911_v8  ;;  %v5923_v8 = vpop.f32.mrf.mxu3 }
 0x2d2   : > { %v1501_v62 = vpop.f32.mrf.mxu2  ;;  %v1123_v20 = vpop.f32.mrf.mxu1  ;;  %v2362_v14 = vsel %vm2353_vm6, %v2359_v30, %v2361_v19 }
 0x2d3   : > { %v1588_v3 = vadd.f32 %v1501_v62, %v1122_v23  ;;  %v1124_v6 = vadd.f32 %v1123_v20, %v7146_v32  ;;  %v3520_v23 = vrot.slane %v7145_v1, 3  ;;  %v3047_v62 = vsel %vm3024_vm5, %v3042_v25, %v3046_v46  ;;  %v7148_v25 = vld [vmem:[#allocation83_spill] sm:$0xff] }
 0x2d4   : > { %v7149_v1 = vld [vmem:[#allocation79_spill] sm:$0xff] }
 0x2d5   : > { %v1847_v60 = vadd.f32 %v5863_v63, %v1588_v3  ;;  %v2252_v59 = vpop.f32.mrf.mxu0  ;;  %v3521_v3 = vsel %vm3514_vm7, %v3518_v9, %v3520_v23  ;;  %v3048_v32 = vrot.slane %v7149_v1, 2 }
 0x2d7   : > { %v5920_v22 = vadd.f32 %v2250_v47, %v1847_v60  ;;  %4445 = vmatmul.msk.bf16.gmra.mxu3 %vm635_vm2, %v3047_v62 }
 0x2d9   : > { %7144 = vst [vmem:[#allocation29_spill] sm:$0xff] %v5920_v22  ;;  %v5936_v53 = vpop.f32.mrf.mxu3 }
 0x2da   : > { %v1503_v28 = vpop.f32.mrf.mxu2  ;;  %v1126_v48 = vpop.f32.mrf.mxu1 }
 0x2db   : > { %v1589_v44 = vadd.f32 %v1503_v28, %v1124_v6  ;;  %v1127_v36 = vadd.f32 %v1126_v48, %v7148_v25  ;;  %v7150_v6 = vld [vmem:[#allocation77_spill] sm:$0xff]  ;;  %v7153_v48 = vld [vmem:[#allocation86_spill] sm:$0xff] }
 0x2dc   : > { %v3049_v28 = vrot.slane %v7150_v6, 3 }
 0x2dd   : > { %v1848_v63 = vadd.f32 %v5875_v37, %v1589_v44  ;;  %v2255_v47 = vpop.f32.mrf.mxu0  ;;  %4375 = vmatmul.msk.bf16.gmra.mxu1 %vm635_vm2, %v2360_v58 }
 0x2de   : > { %v3050_v62 = vor.u32 %v3049_v28, %v3048_v32 }
 0x2df   : > { %4409 = vmatmul.msk.bf16.gmra.mxu2 %vm635_vm2, %v2362_v14  ;;  %v5934_v20 = vadd.f32 %v2252_v59, %v1848_v63  ;;  %v7152_v59 = vld [vmem:[#allocation49_spill] sm:$0xff] }
 0x2e0   : > { %4477 = vmatmul.msk.bf16.gmra.mxu0 %vm635_vm2, %v3521_v3  ;;  %v2363_v63 = vrot.slane %v7152_v59, 2 }
 0x2e1   : > { %7147 = vst [vmem:[#allocation105_spill] sm:$0xff] %v5934_v20  ;;  %v5946_v20 = vpop.f32.mrf.mxu3 }
 0x2e2   : > { %v1506_v30 = vpop.f32.mrf.mxu2  ;;  %v1128_v37 = vpop.f32.mrf.mxu1  ;;  %v2364_v6 = vsel %vm2353_vm6, %v2361_v19, %v2363_v63 }
 0x2e3   : > { %v1590_v60 = vadd.f32 %v1506_v30, %v1127_v36  ;;  %v1129_v25 = vadd.f32 %v1128_v37, %v7153_v48  ;;  %v3522_v36 = vrot.slane %v7152_v59, 3  ;;  %v3051_v30 = vsel %vm3024_vm5, %v3046_v46, %v3050_v62  ;;  %v7155_v46 = vld [vmem:[#allocation89_spill] sm:$0xff]  ;;  %v7156_v59 = vld [vmem:[#allocation4_spill] sm:$0xff] }
 0x2e4   : > { %v3052_v48 = vrot.slane %v7156_v59, 2 }
 0x2e5   : > { %v1849_v58 = vadd.f32 %v5890_v29, %v1590_v60  ;;  %v2257_v9 = vpop.f32.mrf.mxu0  ;;  %v3523_v60 = vsel %vm3514_vm7, %v3520_v23, %v3522_v36 }
 0x2e7   : > { %v5943_v44 = vadd.f32 %v2255_v47, %v1849_v58  ;;  %4446 = vmatmul.msk.bf16.gmra.mxu3 %vm635_vm2, %v3051_v30 }
 0x2e9   : > { %7151 = vst [vmem:[#allocation108_spill] sm:$0xff] %v5943_v44  ;;  %v5959_v32 = vpop.f32.mrf.mxu3 }
 0x2ea   : > { %v1508_v3 = vpop.f32.mrf.mxu2  ;;  %v1131_v22 = vpop.f32.mrf.mxu1 }
 0x2eb   : > { %v1591_v1 = vadd.f32 %v1508_v3, %v1129_v25  ;;  %v1132_v28 = vadd.f32 %v1131_v22, %v7155_v46  ;;  %v7157_v25 = vld [vmem:[#allocation3_spill] sm:$0xff]  ;;  %v7160_v22 = vld [vmem:[#allocation92_spill] sm:$0xff] }
 0x2ec   : > { %v3053_v3 = vrot.slane %v7157_v25, 3 }
 0x2ed   : > { %v1850_v29 = vadd.f32 %v5900_v7, %v1591_v1  ;;  %v2260_v47 = vpop.f32.mrf.mxu0  ;;  %4376 = vmatmul.msk.bf16.gmra.mxu1 %vm635_vm2, %v2362_v14 }
 0x2ee   : > { %v3054_v30 = vor.u32 %v3053_v3, %v3052_v48 }
 0x2ef   : > { %4410 = vmatmul.msk.bf16.gmra.mxu2 %vm635_vm2, %v2364_v6  ;;  %v5957_v37 = vadd.f32 %v2257_v9, %v1850_v29  ;;  %v7159_v9 = vld [vmem:[#allocation60_spill] sm:$0xff] }
 0x2f0   : > { %4478 = vmatmul.msk.bf16.gmra.mxu0 %vm635_vm2, %v3523_v60  ;;  %v2365_v29 = vrot.slane %v7159_v9, 2 }
 0x2f1   : > { %7154 = vst [vmem:[#allocation46_spill] sm:$0xff] %v5957_v37  ;;  %v5969_v37 = vpop.f32.mrf.mxu3 }
 0x2f2   : > { %v1511_v19 = vpop.f32.mrf.mxu2  ;;  %v1133_v7 = vpop.f32.mrf.mxu1  ;;  %v2366_v25 = vsel %vm2353_vm6, %v2363_v63, %v2365_v29 }
 0x2f3   : > { %v1592_v58 = vadd.f32 %v1511_v19, %v1132_v28  ;;  %v1134_v46 = vadd.f32 %v1133_v7, %v7160_v22  ;;  %v3524_v28 = vrot.slane %v7159_v9, 3  ;;  %v3055_v19 = vsel %vm3024_vm5, %v3050_v62, %v3054_v30  ;;  %v7162_v62 = vld [vmem:[#allocation95_spill] sm:$0xff]  ;;  %v7163_v9 = vld [vmem:[#allocation12_spill] sm:$0xff] }
 0x2f4   : > { %v3056_v22 = vrot.slane %v7163_v9, 2 }
 0x2f5   : > { %v1851_v14 = vadd.f32 %v5913_v18, %v1592_v58  ;;  %v2262_v23 = vpop.f32.mrf.mxu0  ;;  %v3525_v58 = vsel %vm3514_vm7, %v3522_v36, %v3524_v28 }
 0x2f7   : > { %v5966_v1 = vadd.f32 %v2260_v47, %v1851_v14  ;;  %4447 = vmatmul.msk.bf16.gmra.mxu3 %vm635_vm2, %v3055_v19 }
 0x2f9   : > { %7158 = vst [vmem:[#allocation38_spill] sm:$0xff] %v5966_v1  ;;  %v5982_v48 = vpop.f32.mrf.mxu3 }
 0x2fa   : > { %v1513_v60 = vpop.f32.mrf.mxu2  ;;  %v1136_v44 = vpop.f32.mrf.mxu1 }
 0x2fb   : > { %v1593_v59 = vadd.f32 %v1513_v60, %v1134_v46  ;;  %v1137_v3 = vadd.f32 %v1136_v44, %v7162_v62  ;;  %v7164_v46 = vld [vmem:[#allocation6_spill] sm:$0xff] }
 0x2fc   : > { %v3057_v60 = vrot.slane %v7164_v46, 3  ;;  %v7166_v44 = vld [vmem:[#allocation98_spill] sm:$0xff] }
 0x2fd   : > { %v1852_v18 = vadd.f32 %v5923_v8, %v1593_v59  ;;  %v2265_v47 = vpop.f32.mrf.mxu0  ;;  %4377 = vmatmul.msk.bf16.gmra.mxu1 %vm635_vm2, %v2364_v6 }
 0x2fe   : > { %v3058_v19 = vor.u32 %v3057_v60, %v3056_v22 }
 0x2ff   : > { %4411 = vmatmul.msk.bf16.gmra.mxu2 %vm635_vm2, %v2366_v25  ;;  %v5980_v7 = vadd.f32 %v2262_v23, %v1852_v18  ;;  %v7165_v23 = vld [vmem:[#allocation71_spill] sm:$0xff] }
 0x300   : > { %4479 = vmatmul.msk.bf16.gmra.mxu0 %vm635_vm2, %v3525_v58  ;;  %v2367_v18 = vrot.slane %v7165_v23, 2 }
 0x301   : > { %7161 = vst [vmem:[#allocation61_spill] sm:$0xff] %v5980_v7  ;;  %v5992_v7 = vpop.f32.mrf.mxu3 }
 0x302   : > { %v1516_v63 = vpop.f32.mrf.mxu2  ;;  %v1138_v8 = vpop.f32.mrf.mxu1  ;;  %v2368_v46 = vsel %vm2353_vm6, %v2365_v29, %v2367_v18 }
 0x303   : > { %v1594_v14 = vadd.f32 %v1516_v63, %v1137_v3  ;;  %v1139_v62 = vadd.f32 %v1138_v8, %v7166_v44  ;;  %v3526_v3 = vrot.slane %v7165_v23, 3  ;;  %v3059_v63 = vsel %vm3024_vm5, %v3054_v30, %v3058_v19  ;;  %v7167_v30 = vld [vmem:[#allocation101_spill] sm:$0xff] }
 0x304   : > { %v3060_v23 = vrot.slane %v4745_v51, 2  ;;  %v3061_v44 = vrot.slane %v4676_v61, 3 }
 0x305   : > { %v1853_v6 = vadd.f32 %v5936_v53, %v1594_v14  ;;  %v2267_v36 = vpop.f32.mrf.mxu0  ;;  %v3527_v14 = vsel %vm3514_vm7, %v3524_v28, %v3526_v3 }
 0x307   : > { %v5989_v59 = vadd.f32 %v2265_v47, %v1853_v6  ;;  %4448 = vmatmul.msk.bf16.gmra.mxu3 %vm635_vm2, %v3059_v63 }
 0x309   : > { %v6005_v22 = vpop.f32.mrf.mxu3 }
 0x30a   : > { %v1518_v58 = vpop.f32.mrf.mxu2  ;;  %v1141_v1 = vpop.f32.mrf.mxu1 }
 0x30b   : > { %v1595_v9 = vadd.f32 %v1518_v58, %v1139_v62  ;;  %v1142_v60 = vadd.f32 %v1141_v1, %v7167_v30  ;;  %v3062_v62 = vor.u32 %v3061_v44, %v3060_v23  ;;  %v7168_v1 = vld [vmem:[#allocation104_spill] sm:$0xff]  ;;  %v3064_v44 = vrot.slane %v4801_v24, 2 }
 0x30d   : > { %v1854_v53 = vadd.f32 %v5946_v20, %v1595_v9  ;;  %v2270_v47 = vpop.f32.mrf.mxu0  ;;  %4378 = vmatmul.msk.bf16.gmra.mxu1 %vm635_vm2, %v2366_v25  ;;  %v3063_v30 = vsel %vm3024_vm5, %v3058_v19, %v3062_v62  ;;  %v7169_v19 = vld [vmem:[#allocation107_spill] sm:$0xff] }
 0x30f   : > { %4412 = vmatmul.msk.bf16.gmra.mxu2 %vm635_vm2, %v2368_v46  ;;  %v6003_v8 = vadd.f32 %v2267_v36, %v1854_v53  ;;  %v2369_v36 = vrot.slane %v4597_v12, 2 }
 0x310   : > { %4480 = vmatmul.msk.bf16.gmra.mxu0 %vm635_vm2, %v3527_v14  ;;  %v3528_v14 = vrot.slane %v4597_v12, 3 }
 0x311   : > { %v6015_v63 = vpop.f32.mrf.mxu3  ;;  %v2370_v61 = vsel %vm2353_vm6, %v2367_v18, %v2369_v36 }
 0x312   : > { %v1521_v29 = vpop.f32.mrf.mxu2  ;;  %v1143_v20 = vpop.f32.mrf.mxu1 }
 0x313   : > { %v1596_v6 = vadd.f32 %v1521_v29, %v1142_v60  ;;  %v1144_v9 = vadd.f32 %v1143_v20, %v7168_v1  ;;  %v3529_v29 = vsel %vm3514_vm7, %v3526_v3, %v3528_v14 }
 0x315   : > { %v1855_v25 = vadd.f32 %v5959_v32, %v1596_v6  ;;  %v2272_v28 = vpop.f32.mrf.mxu0 }
 0x317   : > { %v6012_v58 = vadd.f32 %v2270_v47, %v1855_v25  ;;  %4449 = vmatmul.msk.bf16.gmra.mxu3 %vm635_vm2, %v3063_v30  ;;  %v3065_v25 = vrot.slane %v4748_v52, 3  ;;  %v7170_v30 = vld [vmem:[#allocation110_spill] sm:$0xff] }
 0x319   : > { %v3066_v1 = vor.u32 %v3065_v25, %v3064_v44  ;;  %v3068_v44 = vrot.slane %v4857_v39, 2  ;;  %v3069_v25 = vrot.slane %v4804_v33, 3 }
 0x31a   : > { %v1523_v53 = vpop.f32.mrf.mxu2  ;;  %v1146_v60 = vpop.f32.mrf.mxu1 }
 0x31b   : > { %v1597_v51 = vadd.f32 %v1523_v53, %v1144_v9  ;;  %v6028_v12 = vpop.f32.mrf.mxu3  ;;  %v1147_v20 = vadd.f32 %v1146_v60, %v7169_v19 }
 0x31d   : > { %v1856_v32 = vadd.f32 %v5969_v37, %v1597_v51  ;;  %v2275_v47 = vpop.f32.mrf.mxu0  ;;  %4379 = vmatmul.msk.bf16.gmra.mxu1 %vm635_vm2, %v2368_v46 }
 0x31f   : > { %4413 = vmatmul.msk.bf16.gmra.mxu2 %vm635_vm2, %v2370_v61  ;;  %v6026_v6 = vadd.f32 %v2272_v28, %v1856_v32  ;;  %v2371_v28 = vrot.slane %v4601_v15, 2  ;;  %v3530_v32 = vrot.slane %v4601_v15, 3 }
 0x320   : > { %4481 = vmatmul.msk.bf16.gmra.mxu0 %vm635_vm2, %v3529_v29  ;;  %v3067_v29 = vsel %vm3024_vm5, %v3062_v62, %v3066_v1  ;;  %v7171_v62 = vld [vmem:[#allocation113_spill] sm:$0xff] }
 0x321   : > { %v2372_v52 = vsel %vm2353_vm6, %v2369_v36, %v2371_v28 }
 0x322   : > { %v1526_v18 = vpop.f32.mrf.mxu2  ;;  %v1148_v37 = vpop.f32.mrf.mxu1 }
 0x323   : > { %v1598_v23 = vadd.f32 %v1526_v18, %v1147_v20  ;;  %v6038_v53 = vpop.f32.mrf.mxu3  ;;  %v1149_v51 = vadd.f32 %v1148_v37, %v7170_v30  ;;  %v3531_v20 = vsel %vm3514_vm7, %v3528_v14, %v3530_v32 }
 0x325   : > { %v1857_v46 = vadd.f32 %v5982_v48, %v1598_v23  ;;  %v2277_v3 = vpop.f32.mrf.mxu0 }
 0x327   : > { %v6035_v9 = vadd.f32 %v2275_v47, %v1857_v46  ;;  %4450 = vmatmul.msk.bf16.gmra.mxu3 %vm635_vm2, %v3067_v29  ;;  %v3070_v46 = vor.u32 %v3069_v25, %v3068_v44 }
 0x329   : > { %v3071_v39 = vsel %vm3024_vm5, %v3066_v1, %v3070_v46 }
 0x32a   : > { %v1528_v60 = vpop.f32.mrf.mxu2  ;;  %v1151_v19 = vpop.f32.mrf.mxu1 }
 0x32b   : > { %v1599_v24 = vadd.f32 %v1528_v60, %v1149_v51  ;;  %v6051_v15 = vpop.f32.mrf.mxu3  ;;  %v1152_v23 = vadd.f32 %v1151_v19, %v7171_v62  ;;  %v7172_v60 = vld [vmem:[#allocation116_spill] sm:$0xff]  ;;  %v3532_v19 = vrot.slane %v4658_v50, 3 }
 0x32d   : > { %v1858_v48 = vadd.f32 %v5992_v7, %v1599_v24  ;;  %v2280_v47 = vpop.f32.mrf.mxu0  ;;  %4380 = vmatmul.msk.bf16.gmra.mxu1 %vm635_vm2, %v2370_v61  ;;  %v3533_v62 = vsel %vm3514_vm7, %v3530_v32, %v3532_v19 }
 0x32f   : > { %4414 = vmatmul.msk.bf16.gmra.mxu2 %vm635_vm2, %v2372_v52  ;;  %v6049_v18 = vadd.f32 %v2277_v3, %v1858_v48  ;;  %v2373_v3 = vrot.slane %v4658_v50, 2 }
 0x330   : > { %4482 = vmatmul.msk.bf16.gmra.mxu0 %vm635_vm2, %v3531_v20 }
 0x332   : > { %v1531_v36 = vpop.f32.mrf.mxu2  ;;  %v1153_v7 = vpop.f32.mrf.mxu1 }
 0x333   : > { %v1600_v37 = vadd.f32 %v1531_v36, %v1152_v23  ;;  %v6061_v51 = vpop.f32.mrf.mxu3  ;;  %v1154_v29 = vadd.f32 %v1153_v7, %v7172_v60  ;;  %v6086_v7 = vld [vmem:[%s6707_s3] ss:$0 sm:$0xff] }
 0x335   : > { %v1859_v61 = vadd.f32 %v6005_v22, %v1600_v37  ;;  %v2282_v14 = vpop.f32.mrf.mxu0  ;;  %v2374_v22 = vsel %vm2353_vm6, %v2371_v28, %v2373_v3  ;;  %v3072_v37 = vrot.slane %v4918_v5, 2 }
 0x337   : > { %v6058_v30 = vadd.f32 %v2280_v47, %v1859_v61  ;;  %4451 = vmatmul.msk.bf16.gmra.mxu3 %vm635_vm2, %v3071_v39  ;;  %v2375_v61 = vrot.slane %v4724_v38, 2 }
 0x33a   : > { %v1533_v24 = vpop.f32.mrf.mxu2  ;;  %v2532_v48 = vpop.f32.mrf.mxu1 }
 0x33b   : > { %v1601_v33 = vadd.f32 %v1533_v24, %v1154_v29  ;;  %v6075_v1 = vpop.f32.mrf.mxu3  ;;  %v2697_v23 = vadd.f32 %v2532_v48, %v5353_v57  ;;  %v2376_v48 = vsel %vm2353_vm6, %v2373_v3, %v2375_v61 }
 0x33d   : > { %v1860_v47 = vadd.f32 %v6015_v63, %v1601_v33  ;;  %v3693_v20 = vpop.f32.mrf.mxu0  ;;  %4381 = vmatmul.msk.bf16.gmra.mxu1 %vm635_vm2, %v2372_v52  ;;  %v3073_v52 = vrot.slane %v4860_v34, 3 }
 0x33f   : > { %4415 = vmatmul.msk.bf16.gmra.mxu2 %vm635_vm2, %v2374_v22  ;;  %v6073_v50 = vadd.f32 %v2282_v14, %v1860_v47  ;;  %v3074_v25 = vor.u32 %v3073_v52, %v3072_v37 }
 0x340   : > { %4483 = vmatmul.msk.bf16.gmra.mxu0 %vm635_vm2, %v3533_v62 }
 0x341   : > { %v3075_v29 = vsel %vm3024_vm5, %v3070_v46, %v3074_v25 }
 0x342   : > { %v2791_v28 = vpop.f32.mrf.mxu2  ;;  %v2534_v36 = vpop.f32.mrf.mxu1 }
 0x343   : > { %v2956_v63 = vadd.f32 %v2791_v28, %v2697_v23  ;;  %v6089_v14 = vpop.f32.mrf.mxu3  ;;  %v2698_v5 = vadd.f32 %v2534_v36, %v5366_v42  ;;  %v3076_v36 = vrot.slane %v7001_v10, 2  ;;  %v3536_v10 = vrot.slane %v4784_v40, 3 }
 0x345   : > { %v3446_v32 = vadd.f32 %v6028_v12, %v2956_v63  ;;  %v3695_v44 = vpop.f32.mrf.mxu0  ;;  %v3534_v12 = vrot.slane %v4724_v38, 3 }
 0x347   : > { %v3858_v57 = vadd.f32 %v3693_v20, %v3446_v32  ;;  %4452 = vmatmul.msk.bf16.gmra.mxu3 %vm635_vm2, %v3075_v29  ;;  %v3535_v20 = vsel %vm3514_vm7, %v3532_v19, %v3534_v12 }
 0x349   : > { %v3928_v60 = vadd.f32 %v6086_v7, %v3858_v57 }
 0x34a   : > { %v2793_v34 = vpop.f32.mrf.mxu2  ;;  %v2537_v33 = vpop.f32.mrf.mxu1 }
 0x34b   : > { %v3994_v24 = vmax.f32 %v3928_v60, 0.0  ;;  %v2957_v39 = vadd.f32 %v2793_v34, %v2698_v5  ;;  %v6107_v38 = vpop.f32.mrf.mxu3  ;;  %v2699_v3 = vadd.f32 %v2537_v33, %v5373_v49  ;;  %v7173_v60 = vld [vmem:[#allocation126_spill] sm:$0xff] }
 0x34d   : > { %4060 = vst [vmem:[%s6096_s28] sm:$0xff] %v3994_v24  ;;  %v3447_v47 = vadd.f32 %v6038_v53, %v2957_v39  ;;  %v3698_v42 = vpop.f32.mrf.mxu0  ;;  %4382 = vmatmul.msk.bf16.gmra.mxu1 %vm635_vm2, %v2374_v22  ;;  %v3077_v22 = vrot.slane %v7002_v13, 3 }
 0x34f   : > { %v3859_v62 = vadd.f32 %v3695_v44, %v3447_v47  ;;  %4416 = vmatmul.msk.bf16.gmra.mxu2 %vm635_vm2, %v2376_v48  ;;  %v3078_v52 = vor.u32 %v3077_v22, %v3076_v36  ;;  %v2377_v44 = vrot.slane %v4784_v40, 2  ;;  %v2379_v22 = vrot.slane %v4840_v56, 2 }
 0x350   : > { %4484 = vmatmul.msk.bf16.gmra.mxu0 %vm635_vm2, %v3535_v20 }
 0x351   : > { %v3929_v46 = vadd.f32 %v6086_v7, %v3859_v62  ;;  %v3079_v13 = vsel %vm3024_vm5, %v3074_v25, %v3078_v52  ;;  %v7174_v62 = vld [vmem:[#allocation127_spill] sm:$0xff] }
 0x352   : > { %v2796_v53 = vpop.f32.mrf.mxu2  ;;  %v2539_v63 = vpop.f32.mrf.mxu1 }
 0x353   : > { %v3995_v23 = vmax.f32 %v3929_v46, 0.0  ;;  %v2958_v28 = vadd.f32 %v2796_v53, %v2699_v3  ;;  %v6117_v49 = vpop.f32.mrf.mxu3  ;;  %v2700_v5 = vadd.f32 %v2539_v63, %v7173_v60 }
 0x355   : > { %4061 = vst [vmem:[%s6096_s28 + $0x8] sm:$0xff] %v3995_v23  ;;  %v3448_v19 = vadd.f32 %v6051_v15, %v2958_v28  ;;  %v3700_v37 = vpop.f32.mrf.mxu0  ;;  %v2378_v15 = vsel %vm2353_vm6, %v2375_v61, %v2377_v44  ;;  %v3080_v23 = vrot.slane %v7006_v11, 2  ;;  %v3538_v11 = vrot.slane %v4840_v56, 3 }
 0x357   : > { %v3860_v32 = vadd.f32 %v3698_v42, %v3448_v19  ;;  %4453 = vmatmul.msk.bf16.gmra.mxu3 %vm635_vm2, %v3079_v13  ;;  %v3537_v42 = vsel %vm3514_vm7, %v3534_v12, %v3536_v10 }
 0x359   : > { %v3930_v57 = vadd.f32 %v6086_v7, %v3860_v32  ;;  %v7175_v32 = vld [vmem:[#allocation128_spill] sm:$0xff] }
 0x35a   : > { %v2798_v34 = vpop.f32.mrf.mxu2  ;;  %v2542_v39 = vpop.f32.mrf.mxu1 }
 0x35b   : > { %v3996_v29 = vmax.f32 %v3930_v57, 0.0  ;;  %v2959_v24 = vadd.f32 %v2798_v34, %v2700_v5  ;;  %v6130_v40 = vpop.f32.mrf.mxu3  ;;  %v2701_v61 = vadd.f32 %v2542_v39, %v7174_v62  ;;  %v3539_v39 = vsel %vm3514_vm7, %v3536_v10, %v3538_v11 }
 0x35c   : > { %v3084_v62 = vrot.slane %v5072_v35, 2  ;;  %v3540_v35 = vrot.slane %v4900_v17, 3 }
 0x35d   : > { %4062 = vst [vmem:[%s6096_s28 + $0x10] sm:$0xff] %v3996_v29  ;;  %v3449_v33 = vadd.f32 %v6061_v51, %v2959_v24  ;;  %v3703_v47 = vpop.f32.mrf.mxu0  ;;  %4383 = vmatmul.msk.bf16.gmra.mxu1 %vm635_vm2, %v2376_v48  ;;  %v3081_v48 = vrot.slane %v7007_v16, 3 }
 0x35f   : > { %v3861_v20 = vadd.f32 %v3700_v37, %v3449_v33  ;;  %4417 = vmatmul.msk.bf16.gmra.mxu2 %vm635_vm2, %v2378_v15  ;;  %v3082_v63 = vor.u32 %v3081_v48, %v3080_v23  ;;  %v7177_v48 = vld [vmem:[#allocation130_spill] sm:$0xff] }
 0x360   : > { %4485 = vmatmul.msk.bf16.gmra.mxu0 %vm635_vm2, %v3537_v42 }
 0x361   : > { %v3931_v25 = vadd.f32 %v6086_v7, %v3861_v20  ;;  %v3083_v16 = vsel %vm3024_vm5, %v3078_v52, %v3082_v63 }
 0x362   : > { %v2801_v51 = vpop.f32.mrf.mxu2  ;;  %v2544_v53 = vpop.f32.mrf.mxu1 }
 0x363   : > { %v3997_v46 = vmax.f32 %v3931_v25, 0.0  ;;  %v2960_v3 = vadd.f32 %v2801_v51, %v2701_v61  ;;  %v6140_v19 = vpop.f32.mrf.mxu3  ;;  %v2702_v57 = vadd.f32 %v2544_v53, %v7175_v32 }
 0x365   : > { %4063 = vst [vmem:[%s6096_s28 + $0x18] sm:$0xff] %v3997_v46  ;;  %v3450_v12 = vadd.f32 %v6075_v1, %v2960_v3  ;;  %v3705_v28 = vpop.f32.mrf.mxu0  ;;  %v2380_v1 = vsel %vm2353_vm6, %v2377_v44, %v2379_v22  ;;  %v2381_v3 = vrot.slane %v4900_v17, 2 }
 0x367   : > { %v3862_v36 = vadd.f32 %v3703_v47, %v3450_v12  ;;  %4454 = vmatmul.msk.bf16.gmra.mxu3 %vm635_vm2, %v3083_v16  ;;  %v7176_v47 = vld [vmem:[#allocation129_spill] sm:$0xff]  ;;  %v3541_v16 = vsel %vm3514_vm7, %v3538_v11, %v3540_v35 }
 0x369   : > { %v3932_v37 = vadd.f32 %v6086_v7, %v3862_v36 }
 0x36a   : > { %v2803_v60 = vpop.f32.mrf.mxu2  ;;  %v2547_v13 = vpop.f32.mrf.mxu1 }
 0x36b   : > { %v3998_v5 = vmax.f32 %v3932_v37, 0.0  ;;  %v2961_v34 = vadd.f32 %v2803_v60, %v2702_v57  ;;  %v6153_v56 = vpop.f32.mrf.mxu3  ;;  %v2703_v44 = vadd.f32 %v2547_v13, %v7176_v47 }
 0x36d   : > { %4064 = vst [vmem:[%s6096_s28 + $0x20] sm:$0xff] %v3998_v5  ;;  %v3451_v29 = vadd.f32 %v6089_v14, %v2961_v34  ;;  %v3708_v24 = vpop.f32.mrf.mxu0  ;;  %4384 = vmatmul.msk.bf16.gmra.mxu1 %vm635_vm2, %v2378_v15  ;;  %v3085_v15 = vrot.slane %v7011_v31, 3  ;;  %v7178_v34 = vld [vmem:[#allocation63_spill] sm:$0xff] }
 0x36f   : > { %v3863_v33 = vadd.f32 %v3705_v28, %v3451_v29  ;;  %4418 = vmatmul.msk.bf16.gmra.mxu2 %vm635_vm2, %v2380_v1  ;;  %v3086_v51 = vor.u32 %v3085_v15, %v3084_v62 }
 0x370   : > { %4486 = vmatmul.msk.bf16.gmra.mxu0 %vm635_vm2, %v3539_v39  ;;  %v3088_v39 = vrot.slane %v7015_v26, 2 }
 0x371   : > { %v3933_v52 = vadd.f32 %v6086_v7, %v3863_v33  ;;  %v3087_v31 = vsel %vm3024_vm5, %v3082_v63, %v3086_v51 }
 0x372   : > { %v2806_v14 = vpop.f32.mrf.mxu2  ;;  %v2549_v25 = vpop.f32.mrf.mxu1 }
 0x373   : > { %v3999_v42 = vmax.f32 %v3933_v52, 0.0  ;;  %v2962_v20 = vadd.f32 %v2806_v14, %v2703_v44  ;;  %v6163_v53 = vpop.f32.mrf.mxu3  ;;  %v2704_v12 = vadd.f32 %v2549_v25, %v7177_v48  ;;  %v7179_v44 = vld [vmem:[#allocation58_spill] sm:$0xff]  ;;  %v7180_v25 = vld [vmem:[#allocation52_spill] sm:$0xff] }
 0x374   : > { %v2383_v14 = vrot.slane %v7179_v44, 2  ;;  %v3542_v26 = vrot.slane %v7179_v44, 3 }
 0x375   : > { %4065 = vst [vmem:[%s6096_s28 + $0x28] sm:$0xff] %v3999_v42  ;;  %v3452_v10 = vadd.f32 %v6107_v38, %v2962_v20  ;;  %v3710_v61 = vpop.f32.mrf.mxu0  ;;  %v2382_v38 = vsel %vm2353_vm6, %v2379_v22, %v2381_v3 }
 0x377   : > { %v3864_v46 = vadd.f32 %v3708_v24, %v3452_v10  ;;  %4455 = vmatmul.msk.bf16.gmra.mxu3 %vm635_vm2, %v3087_v31 }
 0x379   : > { %v3934_v23 = vadd.f32 %v6086_v7, %v3864_v46 }
 0x37a   : > { %v2808_v28 = vpop.f32.mrf.mxu2  ;;  %v2552_v32 = vpop.f32.mrf.mxu1 }
 0x37b   : > { %v4000_v36 = vmax.f32 %v3934_v23, 0.0  ;;  %v2963_v37 = vadd.f32 %v2808_v28, %v2704_v12  ;;  %v6176_v17 = vpop.f32.mrf.mxu3  ;;  %v2705_v22 = vadd.f32 %v2552_v32, %v7178_v34  ;;  %v3543_v12 = vsel %vm3514_vm7, %v3540_v35, %v3542_v26  ;;  %v7182_v34 = vld [vmem:[#allocation69_spill] sm:$0xff] }
 0x37d   : > { %4066 = vst [vmem:[%s6096_s28 + $0x30] sm:$0xff] %v4000_v36  ;;  %v3453_v57 = vadd.f32 %v6117_v49, %v2963_v37  ;;  %v3713_v60 = vpop.f32.mrf.mxu0  ;;  %4385 = vmatmul.msk.bf16.gmra.mxu1 %vm635_vm2, %v2380_v1  ;;  %v3089_v1 = vrot.slane %v4623_v27, 3  ;;  %v7181_v36 = vld [vmem:[#allocation72_spill] sm:$0xff] }
 0x37f   : > { %v3865_v5 = vadd.f32 %v3710_v61, %v3453_v57  ;;  %4419 = vmatmul.msk.bf16.gmra.mxu2 %vm635_vm2, %v2382_v38  ;;  %v3090_v52 = vor.u32 %v3089_v1, %v3088_v39 }
 0x380   : > { %4487 = vmatmul.msk.bf16.gmra.mxu0 %vm635_vm2, %v3541_v16 }
 0x381   : > { %v3935_v63 = vadd.f32 %v6086_v7, %v3865_v5  ;;  %v3091_v27 = vsel %vm3024_vm5, %v3086_v51, %v3090_v52 }
 0x382   : > { %v2811_v49 = vpop.f32.mrf.mxu2  ;;  %v2554_v24 = vpop.f32.mrf.mxu1 }
 0x383   : > { %v4001_v13 = vmax.f32 %v3935_v63, 0.0  ;;  %v2964_v29 = vadd.f32 %v2811_v49, %v2705_v22  ;;  %v6186_v42 = vpop.f32.mrf.mxu3  ;;  %v2706_v62 = vadd.f32 %v2554_v24, %v7180_v25  ;;  %v2385_v22 = vrot.slane %v7182_v34, 2 }
 0x385   : > { %4067 = vst [vmem:[%s6096_s28 + $0x38] sm:$0xff] %v4001_v13  ;;  %v3454_v11 = vadd.f32 %v6130_v40, %v2964_v29  ;;  %v3715_v33 = vpop.f32.mrf.mxu0  ;;  %v2384_v40 = vsel %vm2353_vm6, %v2381_v3, %v2383_v14  ;;  %v7183_v29 = vld [vmem:[#allocation64_spill] sm:$0xff] }
 0x387   : > { %v3866_v47 = vadd.f32 %v3713_v60, %v3454_v11  ;;  %4456 = vmatmul.msk.bf16.gmra.mxu3 %vm635_vm2, %v3091_v27  ;;  %v3092_v60 = vrot.slane %v7019_v45, 2  ;;  %v3544_v45 = vrot.slane %v7182_v34, 3 }
 0x389   : > { %v3936_v20 = vadd.f32 %v6086_v7, %v3866_v47 }
 0x38a   : > { %v2813_v15 = vpop.f32.mrf.mxu2  ;;  %v2557_v46 = vpop.f32.mrf.mxu1 }
 0x38b   : > { %v4002_v10 = vmax.f32 %v3936_v20, 0.0  ;;  %v2965_v61 = vadd.f32 %v2813_v15, %v2706_v62  ;;  %v6199_v51 = vpop.f32.mrf.mxu3  ;;  %v2707_v3 = vadd.f32 %v2557_v46, %v7181_v36  ;;  %v3545_v20 = vsel %vm3514_vm7, %v3542_v26, %v3544_v45  ;;  %v7184_v15 = vld [vmem:[#allocation73_spill] sm:$0xff] }
 0x38c   : > { %v3096_v46 = vrot.slane %v7024_v4, 2 }
 0x38d   : > { %4068 = vst [vmem:[%s6096_s28 + $0x40] sm:$0xff] %v4002_v10  ;;  %v3455_v23 = vadd.f32 %v6140_v19, %v2965_v61  ;;  %v3718_v48 = vpop.f32.mrf.mxu0  ;;  %4386 = vmatmul.msk.bf16.gmra.mxu1 %vm635_vm2, %v2382_v38  ;;  %v3093_v38 = vrot.slane %v7020_v54, 3 }
 0x38f   : > { %v3867_v28 = vadd.f32 %v3715_v33, %v3455_v23  ;;  %4420 = vmatmul.msk.bf16.gmra.mxu2 %vm635_vm2, %v2384_v40  ;;  %v3094_v5 = vor.u32 %v3093_v38, %v3092_v60 }
 0x390   : > { %4488 = vmatmul.msk.bf16.gmra.mxu0 %vm635_vm2, %v3543_v12 }
 0x391   : > { %v3937_v31 = vadd.f32 %v6086_v7, %v3867_v28  ;;  %v3095_v54 = vsel %vm3024_vm5, %v3090_v52, %v3094_v5 }
 0x392   : > { %v2816_v19 = vpop.f32.mrf.mxu2  ;;  %v2559_v57 = vpop.f32.mrf.mxu1 }
 0x393   : > { %v4003_v37 = vmax.f32 %v3937_v31, 0.0  ;;  %v2966_v32 = vadd.f32 %v2816_v19, %v2707_v3  ;;  %v6209_v49 = vpop.f32.mrf.mxu3  ;;  %v2708_v24 = vadd.f32 %v2559_v57, %v7183_v29  ;;  %v7186_v31 = vld [vmem:[#allocation2_spill] sm:$0xff] }
 0x394   : > { %v2387_v36 = vrot.slane %v7186_v31, 2  ;;  %v3546_v4 = vrot.slane %v7186_v31, 3 }
 0x395   : > { %4069 = vst [vmem:[%s6096_s28 + $0x48] sm:$0xff] %v4003_v37  ;;  %v3456_v35 = vadd.f32 %v6153_v56, %v2966_v32  ;;  %v3720_v16 = vpop.f32.mrf.mxu0  ;;  %v2386_v56 = vsel %vm2353_vm6, %v2383_v14, %v2385_v22  ;;  %v7187_v37 = vld [vmem:[#allocation131_spill] sm:$0xff] }
 0x397   : > { %v3868_v63 = vadd.f32 %v3718_v48, %v3456_v35  ;;  %4457 = vmatmul.msk.bf16.gmra.mxu3 %vm635_vm2, %v3095_v54 }
 0x399   : > { %v3938_v13 = vadd.f32 %v6086_v7, %v3868_v63 }
 0x39a   : > { %v2818_v39 = vpop.f32.mrf.mxu2  ;;  %v2562_v33 = vpop.f32.mrf.mxu1 }
 0x39b   : > { %v4004_v1 = vmax.f32 %v3938_v13, 0.0  ;;  %v2967_v11 = vadd.f32 %v2818_v39, %v2708_v24  ;;  %v6222_v52 = vpop.f32.mrf.mxu3  ;;  %v2709_v14 = vadd.f32 %v2562_v33, %v7184_v15  ;;  %v3547_v13 = vsel %vm3514_vm7, %v3544_v45, %v3546_v4  ;;  %v7188_v39 = vld [vmem:[#allocation7_spill] sm:$0xff]  ;;  %v7189_v33 = vld [vmem:[#allocation34_spill] sm:$0xff]  ;;  %v7191_v15 = vld [vmem:[#allocation5_spill] sm:$0xff] }
 0x39d   : > { %4070 = vst [vmem:[%s6096_s28 + $0x50] sm:$0xff] %v4004_v1  ;;  %v3457_v47 = vadd.f32 %v6163_v53, %v2967_v11  ;;  %v3723_v44 = vpop.f32.mrf.mxu0  ;;  %4387 = vmatmul.msk.bf16.gmra.mxu1 %vm635_vm2, %v2384_v40  ;;  %v7185_v40 = vld [vmem:[#allocation14_spill] sm:$0xff] }
 0x39e   : > { %v3097_v23 = vrot.slane %v7185_v40, 3  ;;  %v3548_v40 = vrot.slane %v7191_v15, 3 }
 0x39f   : > { %v3869_v25 = vadd.f32 %v3720_v16, %v3457_v47  ;;  %4421 = vmatmul.msk.bf16.gmra.mxu2 %vm635_vm2, %v2386_v56  ;;  %v3100_v47 = vrot.slane %v7189_v33, 2 }
 0x3a0   : > { %4489 = vmatmul.msk.bf16.gmra.mxu0 %vm635_vm2, %v3545_v20  ;;  %v3098_v12 = vor.u32 %v3097_v23, %v3096_v46 }
 0x3a1   : > { %v3939_v62 = vadd.f32 %v6086_v7, %v3869_v25 }
 0x3a2   : > { %v2821_v53 = vpop.f32.mrf.mxu2  ;;  %v2564_v61 = vpop.f32.mrf.mxu1  ;;  %v3099_v60 = vsel %vm3024_vm5, %v3094_v5, %v3098_v12 }
 0x3a3   : > { %v4005_v27 = vmax.f32 %v3939_v62, 0.0  ;;  %v2968_v10 = vadd.f32 %v2821_v53, %v2709_v14  ;;  %v6232_v3 = vpop.f32.mrf.mxu3  ;;  %v2710_v32 = vadd.f32 %v2564_v61, %v7187_v37  ;;  %v2389_v14 = vrot.slane %v7191_v15, 2 }
 0x3a4   : > { %v3549_v37 = vsel %vm3514_vm7, %v3546_v4, %v3548_v40 }
 0x3a5   : > { %4071 = vst [vmem:[%s6096_s28 + $0x58] sm:$0xff] %v4005_v27  ;;  %v3458_v26 = vadd.f32 %v6176_v17, %v2968_v10  ;;  %v3725_v48 = vpop.f32.mrf.mxu0  ;;  %v2388_v17 = vsel %vm2353_vm6, %v2385_v22, %v2387_v36  ;;  %v7192_v10 = vld [vmem:[#allocation132_spill] sm:$0xff] }
 0x3a7   : > { %v3870_v28 = vadd.f32 %v3723_v44, %v3458_v26  ;;  %4458 = vmatmul.msk.bf16.gmra.mxu3 %vm635_vm2, %v3099_v60  ;;  %v7193_v60 = vld [vmem:[#allocation13_spill] sm:$0xff] }
 0x3a9   : > { %v3940_v19 = vadd.f32 %v6086_v7, %v3870_v28 }
 0x3aa   : > { %v2823_v57 = vpop.f32.mrf.mxu2  ;;  %v2567_v16 = vpop.f32.mrf.mxu1 }
 0x3ab   : > { %v4006_v38 = vmax.f32 %v3940_v19, 0.0  ;;  %v2969_v35 = vadd.f32 %v2823_v57, %v2710_v32  ;;  %v6245_v5 = vpop.f32.mrf.mxu3  ;;  %v2711_v22 = vadd.f32 %v2567_v16, %v7188_v39 }
 0x3ad   : > { %4072 = vst [vmem:[%s6096_s28 + $0x60] sm:$0xff] %v4006_v38  ;;  %v3459_v63 = vadd.f32 %v6186_v42, %v2969_v35  ;;  %v3728_v34 = vpop.f32.mrf.mxu0  ;;  %4388 = vmatmul.msk.bf16.gmra.mxu1 %vm635_vm2, %v2386_v56  ;;  %v7190_v56 = vld [vmem:[#allocation26_spill] sm:$0xff] }
 0x3ae   : > { %v3101_v44 = vrot.slane %v7190_v56, 3 }
 0x3af   : > { %v3871_v29 = vadd.f32 %v3725_v48, %v3459_v63  ;;  %4422 = vmatmul.msk.bf16.gmra.mxu2 %vm635_vm2, %v2388_v17  ;;  %v7194_v63 = vld [vmem:[#allocation43_spill] sm:$0xff] }
 0x3b0   : > { %4490 = vmatmul.msk.bf16.gmra.mxu0 %vm635_vm2, %v3547_v13  ;;  %v3102_v25 = vor.u32 %v3101_v44, %v3100_v47 }
 0x3b1   : > { %v3941_v24 = vadd.f32 %v6086_v7, %v3871_v29 }
 0x3b2   : > { %v2826_v42 = vpop.f32.mrf.mxu2  ;;  %v2569_v11 = vpop.f32.mrf.mxu1  ;;  %v3103_v23 = vsel %vm3024_vm5, %v3098_v12, %v3102_v25 }
 0x3b3   : > { %v4007_v54 = vmax.f32 %v3941_v24, 0.0  ;;  %v2970_v1 = vadd.f32 %v2826_v42, %v2711_v22  ;;  %v6255_v53 = vpop.f32.mrf.mxu3  ;;  %v2712_v61 = vadd.f32 %v2569_v11, %v7192_v10  ;;  %v7196_v22 = vld [vmem:[#allocation10_spill] sm:$0xff]  ;;  %v7197_v11 = vld [vmem:[#allocation8_spill] sm:$0xff] }
 0x3b4   : > { %v2391_v42 = vrot.slane %v7196_v22, 2  ;;  %v3550_v56 = vrot.slane %v7196_v22, 3 }
 0x3b5   : > { %4073 = vst [vmem:[%s6096_s28 + $0x68] sm:$0xff] %v4007_v54  ;;  %v3460_v45 = vadd.f32 %v6199_v51, %v2970_v1  ;;  %v3730_v20 = vpop.f32.mrf.mxu0  ;;  %v2390_v51 = vsel %vm2353_vm6, %v2387_v36, %v2389_v14 }
 0x3b6   : > { %v3551_v10 = vsel %vm3514_vm7, %v3548_v40, %v3550_v56 }
 0x3b7   : > { %v3872_v62 = vadd.f32 %v3728_v34, %v3460_v45  ;;  %4459 = vmatmul.msk.bf16.gmra.mxu3 %vm635_vm2, %v3103_v23  ;;  %v3104_v34 = vrot.slane %v7194_v63, 2  ;;  %v7198_v23 = vld [vmem:[#allocation25_spill] sm:$0xff] }
 0x3b9   : > { %v3942_v27 = vadd.f32 %v6086_v7, %v3872_v62 }
 0x3ba   : > { %v2828_v46 = vpop.f32.mrf.mxu2  ;;  %v2572_v28 = vpop.f32.mrf.mxu1 }
 0x3bb   : > { %v4008_v26 = vmax.f32 %v3942_v27, 0.0  ;;  %v2971_v48 = vadd.f32 %v2828_v46, %v2712_v61  ;;  %v6268_v12 = vpop.f32.mrf.mxu3  ;;  %v2713_v36 = vadd.f32 %v2572_v28, %v7193_v60 }
 0x3bd   : > { %4074 = vst [vmem:[%s6096_s28 + $0x70] sm:$0xff] %v4008_v26  ;;  %v3461_v31 = vadd.f32 %v6209_v49, %v2971_v48  ;;  %v3733_v19 = vpop.f32.mrf.mxu0  ;;  %4389 = vmatmul.msk.bf16.gmra.mxu1 %vm635_vm2, %v2388_v17  ;;  %v7195_v17 = vld [vmem:[#allocation35_spill] sm:$0xff] }
 0x3be   : > { %v3105_v13 = vrot.slane %v7195_v17, 3 }
 0x3bf   : > { %v3873_v32 = vadd.f32 %v3730_v20, %v3461_v31  ;;  %4423 = vmatmul.msk.bf16.gmra.mxu2 %vm635_vm2, %v2390_v51  ;;  %v7199_v31 = vld [vmem:[#allocation53_spill] sm:$0xff] }
 0x3c0   : > { %4491 = vmatmul.msk.bf16.gmra.mxu0 %vm635_vm2, %v3549_v37  ;;  %v3106_v24 = vor.u32 %v3105_v13, %v3104_v34 }
 0x3c1   : > { %v3943_v57 = vadd.f32 %v6086_v7, %v3873_v32 }
 0x3c2   : > { %v2831_v49 = vpop.f32.mrf.mxu2  ;;  %v2574_v16 = vpop.f32.mrf.mxu1  ;;  %v3107_v44 = vsel %vm3024_vm5, %v3102_v25, %v3106_v24 }
 0x3c3   : > { %v4009_v38 = vmax.f32 %v3943_v57, 0.0  ;;  %v2972_v35 = vadd.f32 %v2831_v49, %v2713_v36  ;;  %v6278_v54 = vpop.f32.mrf.mxu3  ;;  %v2714_v33 = vadd.f32 %v2574_v16, %v7197_v11  ;;  %v7201_v36 = vld [vmem:[#allocation21_spill] sm:$0xff] }
 0x3c4   : > { %v2393_v49 = vrot.slane %v7201_v36, 2  ;;  %v7202_v16 = vld [vmem:[#allocation81_spill] sm:$0xff]  ;;  %v3552_v17 = vrot.slane %v7201_v36, 3 }
 0x3c5   : > { %4075 = vst [vmem:[%s6096_s28 + $0x78] sm:$0xff] %v4009_v38  ;;  %v3462_v4 = vadd.f32 %v6222_v52, %v2972_v35  ;;  %v3735_v29 = vpop.f32.mrf.mxu0  ;;  %v2392_v52 = vsel %vm2353_vm6, %v2389_v14, %v2391_v42 }
 0x3c6   : > { %v3553_v11 = vsel %vm3514_vm7, %v3550_v56, %v3552_v17 }
 0x3c7   : > { %v3874_v39 = vadd.f32 %v3733_v19, %v3462_v4  ;;  %4460 = vmatmul.msk.bf16.gmra.mxu3 %vm635_vm2, %v3107_v44  ;;  %v3108_v19 = vrot.slane %v7199_v31, 2  ;;  %v7203_v44 = vld [vmem:[#allocation133_spill] sm:$0xff] }
 0x3c9   : > { %v3944_v1 = vadd.f32 %v6086_v7, %v3874_v39 }
 0x3ca   : > { %v2833_v47 = vpop.f32.mrf.mxu2  ;;  %v2577_v62 = vpop.f32.mrf.mxu1 }
 0x3cb   : > { %v4010_v45 = vmax.f32 %v3944_v1, 0.0  ;;  %v2973_v20 = vadd.f32 %v2833_v47, %v2714_v33  ;;  %v6291_v25 = vpop.f32.mrf.mxu3  ;;  %v2715_v14 = vadd.f32 %v2577_v62, %v7198_v23 }
 0x3cd   : > { %4076 = vst [vmem:[%s6096_s28 + $0x80] sm:$0xff] %v4010_v45  ;;  %v3463_v15 = vadd.f32 %v6232_v3, %v2973_v20  ;;  %v3738_v27 = vpop.f32.mrf.mxu0  ;;  %4390 = vmatmul.msk.bf16.gmra.mxu1 %vm635_vm2, %v2390_v51  ;;  %v7200_v51 = vld [vmem:[#allocation44_spill] sm:$0xff] }
 0x3ce   : > { %v3109_v37 = vrot.slane %v7200_v51, 3 }
 0x3cf   : > { %v3875_v61 = vadd.f32 %v3735_v29, %v3463_v15  ;;  %4424 = vmatmul.msk.bf16.gmra.mxu2 %vm635_vm2, %v2392_v52  ;;  %v7204_v15 = vld [vmem:[#allocation65_spill] sm:$0xff] }
 0x3d0   : > { %4492 = vmatmul.msk.bf16.gmra.mxu0 %vm635_vm2, %v3551_v10  ;;  %v3110_v57 = vor.u32 %v3109_v37, %v3108_v19 }
 0x3d1   : > { %v3945_v46 = vadd.f32 %v6086_v7, %v3875_v61 }
 0x3d2   : > { %v2836_v3 = vpop.f32.mrf.mxu2  ;;  %v2579_v28 = vpop.f32.mrf.mxu1  ;;  %v3111_v13 = vsel %vm3024_vm5, %v3106_v24, %v3110_v57 }
 0x3d3   : > { %v4011_v26 = vmax.f32 %v3945_v46, 0.0  ;;  %v2974_v48 = vadd.f32 %v2836_v3, %v2715_v14  ;;  %v6301_v38 = vpop.f32.mrf.mxu3  ;;  %v2716_v63 = vadd.f32 %v2579_v28, %v7202_v16  ;;  %v7206_v14 = vld [vmem:[#allocation30_spill] sm:$0xff]  ;;  %v7207_v28 = vld [vmem:[#allocation85_spill] sm:$0xff] }
 0x3d4   : > { %v2395_v3 = vrot.slane %v7206_v14, 2  ;;  %v3554_v51 = vrot.slane %v7206_v14, 3 }
 0x3d5   : > { %4077 = vst [vmem:[%s6096_s28 + $0x88] sm:$0xff] %v4011_v26  ;;  %v3464_v40 = vadd.f32 %v6245_v5, %v2974_v48  ;;  %v3740_v32 = vpop.f32.mrf.mxu0  ;;  %v2394_v5 = vsel %vm2353_vm6, %v2391_v42, %v2393_v49 }
 0x3d6   : > { %v3555_v16 = vsel %vm3514_vm7, %v3552_v17, %v3554_v51 }
 0x3d7   : > { %v3876_v60 = vadd.f32 %v3738_v27, %v3464_v40  ;;  %4461 = vmatmul.msk.bf16.gmra.mxu3 %vm635_vm2, %v3111_v13  ;;  %v3112_v27 = vrot.slane %v7204_v15, 2  ;;  %v7208_v13 = vld [vmem:[#allocation88_spill] sm:$0xff] }
 0x3d9   : > { %v3946_v35 = vadd.f32 %v6086_v7, %v3876_v60 }
 0x3da   : > { %v2838_v34 = vpop.f32.mrf.mxu2  ;;  %v2582_v39 = vpop.f32.mrf.mxu1 }
 0x3db   : > { %v4012_v4 = vmax.f32 %v3946_v35, 0.0  ;;  %v2975_v29 = vadd.f32 %v2838_v34, %v2716_v63  ;;  %v6314_v24 = vpop.f32.mrf.mxu3  ;;  %v2717_v42 = vadd.f32 %v2582_v39, %v7203_v44 }
 0x3dd   : > { %4078 = vst [vmem:[%s6096_s28 + $0x90] sm:$0xff] %v4012_v4  ;;  %v3465_v22 = vadd.f32 %v6255_v53, %v2975_v29  ;;  %v3743_v1 = vpop.f32.mrf.mxu0  ;;  %4391 = vmatmul.msk.bf16.gmra.mxu1 %vm635_vm2, %v2392_v52  ;;  %v7205_v52 = vld [vmem:[#allocation54_spill] sm:$0xff] }
 0x3de   : > { %v3113_v10 = vrot.slane %v7205_v52, 3 }
 0x3df   : > { %v3877_v33 = vadd.f32 %v3740_v32, %v3465_v22  ;;  %4425 = vmatmul.msk.bf16.gmra.mxu2 %vm635_vm2, %v2394_v5  ;;  %v7209_v22 = vld [vmem:[#allocation74_spill] sm:$0xff] }
 0x3e0   : > { %4493 = vmatmul.msk.bf16.gmra.mxu0 %vm635_vm2, %v3553_v11  ;;  %v3114_v46 = vor.u32 %v3113_v10, %v3112_v27 }
 0x3e1   : > { %v3947_v47 = vadd.f32 %v6086_v7, %v3877_v33 }
 0x3e2   : > { %v2841_v53 = vpop.f32.mrf.mxu2  ;;  %v2584_v62 = vpop.f32.mrf.mxu1  ;;  %v3115_v37 = vsel %vm3024_vm5, %v3110_v57, %v3114_v46 }
 0x3e3   : > { %v4013_v45 = vmax.f32 %v3947_v47, 0.0  ;;  %v2976_v20 = vadd.f32 %v2841_v53, %v2717_v42  ;;  %v6324_v26 = vpop.f32.mrf.mxu3  ;;  %v2718_v31 = vadd.f32 %v2584_v62, %v7207_v28  ;;  %v7211_v42 = vld [vmem:[#allocation39_spill] sm:$0xff] }
 0x3e4   : > { %v2397_v53 = vrot.slane %v7211_v42, 2  ;;  %v7212_v62 = vld [vmem:[#allocation91_spill] sm:$0xff]  ;;  %v3556_v52 = vrot.slane %v7211_v42, 3 }
 0x3e5   : > { %4079 = vst [vmem:[%s6096_s28 + $0x98] sm:$0xff] %v4013_v45  ;;  %v3466_v56 = vadd.f32 %v6268_v12, %v2976_v20  ;;  %v3745_v61 = vpop.f32.mrf.mxu0  ;;  %v2396_v12 = vsel %vm2353_vm6, %v2393_v49, %v2395_v3 }
 0x3e6   : > { %v3557_v28 = vsel %vm3514_vm7, %v3554_v51, %v3556_v52 }
 0x3e7   : > { %v3878_v23 = vadd.f32 %v3743_v1, %v3466_v56  ;;  %4462 = vmatmul.msk.bf16.gmra.mxu3 %vm635_vm2, %v3115_v37  ;;  %v3116_v1 = vrot.slane %v7209_v22, 2  ;;  %v7213_v37 = vld [vmem:[#allocation94_spill] sm:$0xff] }
 0x3e9   : > { %v3948_v48 = vadd.f32 %v6086_v7, %v3878_v23 }
 0x3ea   : > { %v2843_v19 = vpop.f32.mrf.mxu2  ;;  %v2587_v60 = vpop.f32.mrf.mxu1 }
 0x3eb   : > { %v4014_v40 = vmax.f32 %v3948_v48, 0.0  ;;  %v2977_v32 = vadd.f32 %v2843_v19, %v2718_v31  ;;  %v6337_v57 = vpop.f32.mrf.mxu3  ;;  %v2719_v49 = vadd.f32 %v2587_v60, %v7208_v13 }
 0x3ed   : > { %4080 = vst [vmem:[%s6096_s28 + $0xa0] sm:$0xff] %v4014_v40  ;;  %v3467_v36 = vadd.f32 %v6278_v54, %v2977_v32  ;;  %v3748_v35 = vpop.f32.mrf.mxu0  ;;  %4392 = vmatmul.msk.bf16.gmra.mxu1 %vm635_vm2, %v2394_v5  ;;  %v7210_v5 = vld [vmem:[#allocation66_spill] sm:$0xff] }
 0x3ee   : > { %v3117_v11 = vrot.slane %v7210_v5, 3 }
 0x3ef   : > { %v3879_v63 = vadd.f32 %v3745_v61, %v3467_v36  ;;  %4426 = vmatmul.msk.bf16.gmra.mxu2 %vm635_vm2, %v2396_v12  ;;  %v7214_v36 = vld [vmem:[#allocation78_spill] sm:$0xff] }
 0x3f0   : > { %4494 = vmatmul.msk.bf16.gmra.mxu0 %vm635_vm2, %v3555_v16  ;;  %v3118_v47 = vor.u32 %v3117_v11, %v3116_v1 }
 0x3f1   : > { %v3949_v34 = vadd.f32 %v6086_v7, %v3879_v63 }
 0x3f2   : > { %v2846_v54 = vpop.f32.mrf.mxu2  ;;  %v2589_v39 = vpop.f32.mrf.mxu1  ;;  %v3119_v10 = vsel %vm3024_vm5, %v3114_v46, %v3118_v47 }
 0x3f3   : > { %v4015_v4 = vmax.f32 %v3949_v34, 0.0  ;;  %v2978_v29 = vadd.f32 %v2846_v54, %v2719_v49  ;;  %v6347_v45 = vpop.f32.mrf.mxu3  ;;  %v2720_v15 = vadd.f32 %v2589_v39, %v7212_v62  ;;  %v7216_v49 = vld [vmem:[#allocation48_spill] sm:$0xff]  ;;  %v7217_v39 = vld [vmem:[#allocation97_spill] sm:$0xff] }
 0x3f4   : > { %v2399_v54 = vrot.slane %v7216_v49, 2  ;;  %v3558_v5 = vrot.slane %v7216_v49, 3 }
 0x3f5   : > { %4081 = vst [vmem:[%s6096_s28 + $0xa8] sm:$0xff] %v4015_v4  ;;  %v3468_v17 = vadd.f32 %v6291_v25, %v2978_v29  ;;  %v3750_v33 = vpop.f32.mrf.mxu0  ;;  %v2398_v25 = vsel %vm2353_vm6, %v2395_v3, %v2397_v53 }
 0x3f6   : > { %v3559_v62 = vsel %vm3514_vm7, %v3556_v52, %v3558_v5 }
 0x3f7   : > { %v3880_v44 = vadd.f32 %v3748_v35, %v3468_v17  ;;  %4463 = vmatmul.msk.bf16.gmra.mxu3 %vm635_vm2, %v3119_v10  ;;  %v3120_v35 = vrot.slane %v7214_v36, 2  ;;  %v7218_v10 = vld [vmem:[#allocation100_spill] sm:$0xff] }
 0x3f9   : > { %v3950_v20 = vadd.f32 %v6086_v7, %v3880_v44 }
 0x3fa   : > { %v2848_v27 = vpop.f32.mrf.mxu2  ;;  %v2592_v23 = vpop.f32.mrf.mxu1 }
 0x3fb   : > { %v4016_v56 = vmax.f32 %v3950_v20, 0.0  ;;  %v2979_v61 = vadd.f32 %v2848_v27, %v2720_v15  ;;  %v6360_v46 = vpop.f32.mrf.mxu3  ;;  %v2721_v3 = vadd.f32 %v2592_v23, %v7213_v37 }
 0x3fd   : > { %4082 = vst [vmem:[%s6096_s28 + $0xb0] sm:$0xff] %v4016_v56  ;;  %v3469_v14 = vadd.f32 %v6301_v38, %v2979_v61  ;;  %v3753_v48 = vpop.f32.mrf.mxu0  ;;  %4393 = vmatmul.msk.bf16.gmra.mxu1 %vm635_vm2, %v2396_v12  ;;  %v7215_v12 = vld [vmem:[#allocation75_spill] sm:$0xff] }
 0x3fe   : > { %v3121_v16 = vrot.slane %v7215_v12, 3 }
 0x3ff   : > { %v3881_v31 = vadd.f32 %v3750_v33, %v3469_v14  ;;  %4427 = vmatmul.msk.bf16.gmra.mxu2 %vm635_vm2, %v2398_v25  ;;  %v7219_v14 = vld [vmem:[#allocation19_spill] sm:$0xff] }
 0x400   : > { %4495 = vmatmul.msk.bf16.gmra.mxu0 %vm635_vm2, %v3557_v28  ;;  %v3122_v34 = vor.u32 %v3121_v16, %v3120_v35 }
 0x401   : > { %v3951_v19 = vadd.f32 %v6086_v7, %v3881_v31 }
 0x402   : > { %v2851_v38 = vpop.f32.mrf.mxu2  ;;  %v2594_v60 = vpop.f32.mrf.mxu1  ;;  %v3123_v11 = vsel %vm3024_vm5, %v3118_v47, %v3122_v34 }
 0x403   : > { %v4017_v40 = vmax.f32 %v3951_v19, 0.0  ;;  %v2980_v32 = vadd.f32 %v2851_v38, %v2721_v3  ;;  %v6370_v4 = vpop.f32.mrf.mxu3  ;;  %v2722_v22 = vadd.f32 %v2594_v60, %v7217_v39  ;;  %v7221_v3 = vld [vmem:[#allocation59_spill] sm:$0xff] }
 0x404   : > { %v2401_v38 = vrot.slane %v7221_v3, 2  ;;  %v7222_v60 = vld [vmem:[#allocation103_spill] sm:$0xff]  ;;  %v3560_v12 = vrot.slane %v7221_v3, 3 }
 0x405   : > { %4083 = vst [vmem:[%s6096_s28 + $0xb8] sm:$0xff] %v4017_v40  ;;  %v3470_v51 = vadd.f32 %v6314_v24, %v2980_v32  ;;  %v3755_v63 = vpop.f32.mrf.mxu0  ;;  %v2400_v24 = vsel %vm2353_vm6, %v2397_v53, %v2399_v54 }
 0x406   : > { %v3561_v39 = vsel %vm3514_vm7, %v3558_v5, %v3560_v12 }
 0x407   : > { %v3882_v13 = vadd.f32 %v3753_v48, %v3470_v51  ;;  %4464 = vmatmul.msk.bf16.gmra.mxu3 %vm635_vm2, %v3123_v11  ;;  %v3124_v48 = vrot.slane %v7219_v14, 2  ;;  %v7223_v11 = vld [vmem:[#allocation106_spill] sm:$0xff] }
 0x409   : > { %v3952_v29 = vadd.f32 %v6086_v7, %v3882_v13 }
 0x40a   : > { %v2853_v1 = vpop.f32.mrf.mxu2  ;;  %v2597_v44 = vpop.f32.mrf.mxu1 }
 0x40b   : > { %v4018_v17 = vmax.f32 %v3952_v29, 0.0  ;;  %v2981_v33 = vadd.f32 %v2853_v1, %v2722_v22  ;;  %v6383_v47 = vpop.f32.mrf.mxu3  ;;  %v2723_v53 = vadd.f32 %v2597_v44, %v7218_v10 }
 0x40d   : > { %4084 = vst [vmem:[%s6096_s28 + $0xc0] sm:$0xff] %v4018_v17  ;;  %v3471_v42 = vadd.f32 %v6324_v26, %v2981_v33  ;;  %v3758_v20 = vpop.f32.mrf.mxu0  ;;  %4394 = vmatmul.msk.bf16.gmra.mxu1 %vm635_vm2, %v2398_v25  ;;  %v7220_v25 = vld [vmem:[#allocation18_spill] sm:$0xff] }
 0x40e   : > { %v3125_v28 = vrot.slane %v7220_v25, 3 }
 0x40f   : > { %v3883_v15 = vadd.f32 %v3755_v63, %v3471_v42  ;;  %4428 = vmatmul.msk.bf16.gmra.mxu2 %vm635_vm2, %v2400_v24  ;;  %v7224_v42 = vld [vmem:[#allocation24_spill] sm:$0xff] }
 0x410   : > { %4496 = vmatmul.msk.bf16.gmra.mxu0 %vm635_vm2, %v3559_v62  ;;  %v3126_v19 = vor.u32 %v3125_v28, %v3124_v48 }
 0x411   : > { %v3953_v27 = vadd.f32 %v6086_v7, %v3883_v15 }
 0x412   : > { %v2856_v26 = vpop.f32.mrf.mxu2  ;;  %v2599_v23 = vpop.f32.mrf.mxu1  ;;  %v3127_v16 = vsel %vm3024_vm5, %v3122_v34, %v3126_v19 }
 0x413   : > { %v4019_v56 = vmax.f32 %v3953_v27, 0.0  ;;  %v2982_v61 = vadd.f32 %v2856_v26, %v2723_v53  ;;  %v6393_v40 = vpop.f32.mrf.mxu3  ;;  %v2724_v36 = vadd.f32 %v2599_v23, %v7222_v60  ;;  %v7226_v53 = vld [vmem:[#allocation70_spill] sm:$0xff]  ;;  %v7227_v23 = vld [vmem:[#allocation109_spill] sm:$0xff] }
 0x414   : > { %v2403_v26 = vrot.slane %v7226_v53, 2  ;;  %v3562_v25 = vrot.slane %v7226_v53, 3 }
 0x415   : > { %4085 = vst [vmem:[%s6096_s28 + $0xc8] sm:$0xff] %v4019_v56  ;;  %v3472_v52 = vadd.f32 %v6337_v57, %v2982_v61  ;;  %v3760_v31 = vpop.f32.mrf.mxu0  ;;  %v2402_v57 = vsel %vm2353_vm6, %v2399_v54, %v2401_v38 }
 0x416   : > { %v3563_v60 = vsel %vm3514_vm7, %v3560_v12, %v3562_v25 }
 0x417   : > { %v3884_v37 = vadd.f32 %v3758_v20, %v3472_v52  ;;  %4465 = vmatmul.msk.bf16.gmra.mxu3 %vm635_vm2, %v3127_v16  ;;  %v3128_v20 = vrot.slane %v7224_v42, 2  ;;  %v7228_v16 = vld [vmem:[#allocation112_spill] sm:$0xff] }
 0x419   : > { %v3954_v32 = vadd.f32 %v6086_v7, %v3884_v37 }
 0x41a   : > { %v2858_v35 = vpop.f32.mrf.mxu2  ;;  %v2602_v13 = vpop.f32.mrf.mxu1 }
 0x41b   : > { %v4020_v51 = vmax.f32 %v3954_v32, 0.0  ;;  %v2983_v63 = vadd.f32 %v2858_v35, %v2724_v36  ;;  %v6406_v34 = vpop.f32.mrf.mxu3  ;;  %v2725_v54 = vadd.f32 %v2602_v13, %v7223_v11 }
 0x41d   : > { %4086 = vst [vmem:[%s6096_s28 + $0xd0] sm:$0xff] %v4020_v51  ;;  %v3473_v49 = vadd.f32 %v6347_v45, %v2983_v63  ;;  %v3763_v29 = vpop.f32.mrf.mxu0  ;;  %4395 = vmatmul.msk.bf16.gmra.mxu1 %vm635_vm2, %v2400_v24  ;;  %v7225_v24 = vld [vmem:[#allocation20_spill] sm:$0xff] }
 0x41e   : > { %v3129_v62 = vrot.slane %v7225_v24, 3 }
 0x41f   : > { %v3885_v22 = vadd.f32 %v3760_v31, %v3473_v49  ;;  %4429 = vmatmul.msk.bf16.gmra.mxu2 %vm635_vm2, %v2402_v57  ;;  %v3132_v49 = vrot.slane %v7086_v55, 2 }
 0x420   : > { %4497 = vmatmul.msk.bf16.gmra.mxu0 %vm635_vm2, %v3561_v39  ;;  %v3130_v27 = vor.u32 %v3129_v62, %v3128_v20 }
 0x421   : > { %v3955_v1 = vadd.f32 %v6086_v7, %v3885_v22 }
 0x422   : > { %v2861_v45 = vpop.f32.mrf.mxu2  ;;  %v2604_v44 = vpop.f32.mrf.mxu1  ;;  %v3131_v28 = vsel %vm3024_vm5, %v3126_v19, %v3130_v27 }
 0x423   : > { %v4021_v17 = vmax.f32 %v3955_v1, 0.0  ;;  %v2984_v33 = vadd.f32 %v2861_v45, %v2725_v54  ;;  %v6416_v56 = vpop.f32.mrf.mxu3  ;;  %v2726_v14 = vadd.f32 %v2604_v44, %v7227_v23  ;;  %v6444_v45 = vld [vmem:[%s6707_s3] ss:$0 sm:$0xff] }
 0x425   : > { %4087 = vst [vmem:[%s6096_s28 + $0xd8] sm:$0xff] %v4021_v17  ;;  %v3474_v5 = vadd.f32 %v6360_v46, %v2984_v33  ;;  %v3765_v15 = vpop.f32.mrf.mxu0  ;;  %v2404_v46 = vsel %vm2353_vm6, %v2401_v38, %v2403_v26  ;;  %v7231_v17 = vld [vmem:[#allocation115_spill] sm:$0xff] }
 0x427   : > { %v3886_v10 = vadd.f32 %v3763_v29, %v3474_v5  ;;  %4466 = vmatmul.msk.bf16.gmra.mxu3 %vm635_vm2, %v3131_v28 }
 0x429   : > { %v3956_v61 = vadd.f32 %v6086_v7, %v3886_v10 }
 0x42a   : > { %v2863_v48 = vpop.f32.mrf.mxu2  ;;  %v2607_v37 = vpop.f32.mrf.mxu1 }
 0x42b   : > { %v4022_v52 = vmax.f32 %v3956_v61, 0.0  ;;  %v2985_v31 = vadd.f32 %v2863_v48, %v2726_v14  ;;  %v6429_v19 = vpop.f32.mrf.mxu3  ;;  %v2727_v38 = vadd.f32 %v2607_v37, %v7228_v16  ;;  %v7232_v14 = vld [vmem:[#allocation118_spill] sm:$0xff] }
 0x42d   : > { %4088 = vst [vmem:[%s6096_s28 + $0xe0] sm:$0xff] %v4022_v52  ;;  %v3475_v3 = vadd.f32 %v6370_v4, %v2985_v31  ;;  %v3768_v32 = vpop.f32.mrf.mxu0  ;;  %4396 = vmatmul.msk.bf16.gmra.mxu1 %vm635_vm2, %v2402_v57  ;;  %v7229_v57 = vld [vmem:[#allocation27_spill] sm:$0xff]  ;;  %v7233_v31 = vld [vmem:[#allocation42_spill] sm:$0xff] }
 0x42e   : > { %v3133_v29 = vrot.slane %v7229_v57, 3  ;;  %v3136_v37 = vrot.slane %v7233_v31, 2 }
 0x42f   : > { %v3887_v36 = vadd.f32 %v3765_v15, %v3475_v3  ;;  %4430 = vmatmul.msk.bf16.gmra.mxu2 %vm635_vm2, %v2404_v46 }
 0x430   : > { %4498 = vmatmul.msk.bf16.gmra.mxu0 %vm635_vm2, %v3563_v60  ;;  %v3134_v22 = vor.u32 %v3133_v29, %v3132_v49 }
 0x431   : > { %v3957_v35 = vadd.f32 %v6086_v7, %v3887_v36  ;;  %v7230_v7 = vld [vmem:[#allocation15_spill] sm:$0xff] }
 0x432   : > { %v2866_v4 = vpop.f32.mrf.mxu2  ;;  %v2609_v13 = vpop.f32.mrf.mxu1  ;;  %v2405_v11 = vrot.slane %v7230_v7, 2  ;;  %v3135_v42 = vsel %vm3024_vm5, %v3130_v27, %v3134_v22 }
 0x433   : > { %v4023_v51 = vmax.f32 %v3957_v35, 0.0  ;;  %v2986_v63 = vadd.f32 %v2866_v4, %v2727_v38  ;;  %v6439_v54 = vpop.f32.mrf.mxu3  ;;  %v2728_v33 = vadd.f32 %v2609_v13, %v7231_v17  ;;  %v7235_v35 = vld [vmem:[#allocation16_spill] sm:$0xff] }
 0x434   : > { %v2406_v5 = vsel %vm2353_vm6, %v2403_v26, %v2405_v11  ;;  %v2407_v16 = vrot.slane %v7235_v35, 2  ;;  %v3566_v49 = vrot.slane %v7235_v35, 3 }
 0x435   : > { %4089 = vst [vmem:[%s6096_s28 + $0xe8] sm:$0xff] %v4023_v51  ;;  %v3476_v12 = vadd.f32 %v6383_v47, %v2986_v63  ;;  %v3770_v39 = vpop.f32.mrf.mxu0  ;;  %v3564_v47 = vrot.slane %v7230_v7, 3  ;;  %v7236_v51 = vld [vmem:[#allocation120_spill] sm:$0xff] }
 0x437   : > { %v3888_v1 = vadd.f32 %v3768_v32, %v3476_v12  ;;  %4467 = vmatmul.msk.bf16.gmra.mxu3 %vm635_vm2, %v3135_v42  ;;  %v3565_v53 = vsel %vm3514_vm7, %v3562_v25, %v3564_v47 }
 0x439   : > { %v3958_v55 = vadd.f32 %v6444_v45, %v3888_v1 }
 0x43a   : > { %v2868_v44 = vpop.f32.mrf.mxu2  ;;  %v2612_v62 = vpop.f32.mrf.mxu1 }
 0x43b   : > { %v4024_v20 = vmax.f32 %v3958_v55, 0.0  ;;  %v2987_v24 = vadd.f32 %v2868_v44, %v2728_v33  ;;  %v6457_v27 = vpop.f32.mrf.mxu3  ;;  %v2729_v26 = vadd.f32 %v2612_v62, %v7232_v14  ;;  %v3567_v55 = vsel %vm3514_vm7, %v3564_v47, %v3566_v49  ;;  %v7237_v44 = vld [vmem:[#allocation122_spill] sm:$0xff]  ;;  %v7238_v62 = vld [vmem:[#allocation51_spill] sm:$0xff] }
 0x43c   : > { %v7240_v14 = vld [vmem:[#allocation23_spill] sm:$0xff] }
 0x43d   : > { %4090 = vst [vmem:[%s6096_s28 + $0xf0] sm:$0xff] %v4024_v20  ;;  %v3477_v15 = vadd.f32 %v6393_v40, %v2987_v24  ;;  %v3773_v10 = vpop.f32.mrf.mxu0  ;;  %4397 = vmatmul.msk.bf16.gmra.mxu1 %vm635_vm2, %v2404_v46  ;;  %v7234_v46 = vld [vmem:[#allocation36_spill] sm:$0xff] }
 0x43e   : > { %v3137_v3 = vrot.slane %v7234_v46, 3 }
 0x43f   : > { %v3889_v61 = vadd.f32 %v3770_v39, %v3477_v15  ;;  %4431 = vmatmul.msk.bf16.gmra.mxu2 %vm635_vm2, %v2406_v5  ;;  %v3140_v15 = vrot.slane %v7238_v62, 2 }
 0x440   : > { %4499 = vmatmul.msk.bf16.gmra.mxu0 %vm635_vm2, %v3565_v53  ;;  %v3138_v60 = vor.u32 %v3137_v3, %v3136_v37  ;;  %v3568_v37 = vrot.slane %v7240_v14, 3 }
 0x441   : > { %v3959_v23 = vadd.f32 %v6444_v45, %v3889_v61 }
 0x442   : > { %v2871_v40 = vpop.f32.mrf.mxu2  ;;  %v2614_v52 = vpop.f32.mrf.mxu1  ;;  %v3139_v57 = vsel %vm3024_vm5, %v3134_v22, %v3138_v60 }
 0x443   : > { %v4025_v48 = vmax.f32 %v3959_v23, 0.0  ;;  %v2988_v28 = vadd.f32 %v2871_v40, %v2729_v26  ;;  %v6467_v38 = vpop.f32.mrf.mxu3  ;;  %v2730_v63 = vadd.f32 %v2614_v52, %v7236_v51  ;;  %v2409_v26 = vrot.slane %v7240_v14, 2 }
 0x445   : > { %4091 = vst [vmem:[%s6096_s28 + $0xf8] sm:$0xff] %v4025_v48  ;;  %v3478_v25 = vadd.f32 %v6406_v34, %v2988_v28  ;;  %v3775_v32 = vpop.f32.mrf.mxu0  ;;  %v2408_v34 = vsel %vm2353_vm6, %v2405_v11, %v2407_v16  ;;  %v7241_v28 = vld [vmem:[#allocation124_spill] sm:$0xff] }
 0x447   : > { %v3890_v36 = vadd.f32 %v3773_v10, %v3478_v25  ;;  %4468 = vmatmul.msk.bf16.gmra.mxu3 %vm635_vm2, %v3139_v57 }
 0x449   : > { %v3960_v4 = vadd.f32 %v6444_v45, %v3890_v36 }
 0x44a   : > { %v2873_v13 = vpop.f32.mrf.mxu2  ;;  %v2617_v39 = vpop.f32.mrf.mxu1 }
 0x44b   : > { %v4026_v29 = vmax.f32 %v3960_v4, 0.0  ;;  %v2989_v12 = vadd.f32 %v2873_v13, %v2730_v63  ;;  %v6480_v22 = vpop.f32.mrf.mxu3  ;;  %v2731_v11 = vadd.f32 %v2617_v39, %v7237_v44  ;;  %v3569_v4 = vsel %vm3514_vm7, %v3566_v49, %v3568_v37  ;;  %v7242_v13 = vld [vmem:[#allocation80_spill] sm:$0xff]  ;;  %v7243_v39 = vld [vmem:[#allocation62_spill] sm:$0xff] }
 0x44c   : > { %v7245_v44 = vld [vmem:[#allocation32_spill] sm:$0xff] }
 0x44d   : > { %4092 = vst [vmem:[%s6096_s28 + $0x100] sm:$0xff] %v4026_v29  ;;  %v3479_v1 = vadd.f32 %v6416_v56, %v2989_v12  ;;  %v3778_v7 = vpop.f32.mrf.mxu0  ;;  %4398 = vmatmul.msk.bf16.gmra.mxu1 %vm635_vm2, %v2406_v5  ;;  %v7239_v5 = vld [vmem:[#allocation45_spill] sm:$0xff] }
 0x44e   : > { %v3141_v10 = vrot.slane %v7239_v5, 3 }
 0x44f   : > { %v3891_v17 = vadd.f32 %v3775_v32, %v3479_v1  ;;  %4432 = vmatmul.msk.bf16.gmra.mxu2 %vm635_vm2, %v2408_v34  ;;  %v3144_v1 = vrot.slane %v7243_v39, 2  ;;  %v3572_v39 = vrot.slane %v7088_v43, 3 }
 0x450   : > { %4500 = vmatmul.msk.bf16.gmra.mxu0 %vm635_vm2, %v3567_v55  ;;  %v3142_v61 = vor.u32 %v3141_v10, %v3140_v15  ;;  %v3570_v15 = vrot.slane %v7245_v44, 3 }
 0x451   : > { %v3961_v33 = vadd.f32 %v6444_v45, %v3891_v17 }
 0x452   : > { %v2876_v56 = vpop.f32.mrf.mxu2  ;;  %v2619_v24 = vpop.f32.mrf.mxu1  ;;  %v3143_v46 = vsel %vm3024_vm5, %v3138_v60, %v3142_v61 }
 0x453   : > { %v4027_v42 = vmax.f32 %v3961_v33, 0.0  ;;  %v2990_v20 = vadd.f32 %v2876_v56, %v2731_v11  ;;  %v6490_v40 = vpop.f32.mrf.mxu3  ;;  %v2732_v52 = vadd.f32 %v2619_v24, %v7241_v28  ;;  %v2411_v11 = vrot.slane %v7245_v44, 2  ;;  %v4524_v44 = vld [vmem:[%s4959_s12 + $0x10] sm:$0xff] }
 0x455   : > { %4093 = vst [vmem:[%s6096_s28 + $0x108] sm:$0xff] %v4027_v42  ;;  %v3480_v47 = vadd.f32 %v6429_v19, %v2990_v20  ;;  %v3780_v53 = vpop.f32.mrf.mxu0  ;;  %v2410_v19 = vsel %vm2353_vm6, %v2407_v16, %v2409_v26  ;;  %v7246_v20 = vld [vmem:[#allocation33_spill] sm:$0xff] }
 0x457   : > { %v3892_v23 = vadd.f32 %v3778_v7, %v3480_v47  ;;  %4469 = vmatmul.msk.bf16.gmra.mxu3 %vm635_vm2, %v3143_v46 }
 0x459   : > { %v3962_v48 = vadd.f32 %v6444_v45, %v3892_v23 }
 0x45a   : > { %v2878_v31 = vpop.f32.mrf.mxu2  ;;  %v2622_v32 = vpop.f32.mrf.mxu1 }
 0x45b   : > { %v4028_v3 = vmax.f32 %v3962_v48, 0.0  ;;  %v2991_v25 = vadd.f32 %v2878_v31, %v2732_v52  ;;  %v6503_v60 = vpop.f32.mrf.mxu3  ;;  %v2733_v16 = vadd.f32 %v2622_v32, %v7242_v13  ;;  %v3571_v48 = vsel %vm3514_vm7, %v3568_v37, %v3570_v15  ;;  %v7247_v31 = vld [vmem:[#allocation41_spill] sm:$0xff] }
 0x45c   : > { %v7248_v32 = vshrl.u32 %v5761_v41, 16  ;;  %v7249_v37 = vshll.u32 %v5761_v41, 16  ;;  %v2413_v13 = vrot.slane %v7088_v43, 2  ;;  %v3573_v43 = vsel %vm3514_vm7, %v3570_v15, %v3572_v39 }
 0x45d   : > { %4094 = vst [vmem:[%s6096_s28 + $0x110] sm:$0xff] %v4028_v3  ;;  %v3481_v36 = vadd.f32 %v6439_v54, %v2991_v25  ;;  %v3783_v35 = vpop.f32.mrf.mxu0  ;;  %4399 = vmatmul.msk.bf16.gmra.mxu1 %vm635_vm2, %v2408_v34  ;;  %v7244_v34 = vld [vmem:[#allocation55_spill] sm:$0xff] }
 0x45e   : > { %v3145_v7 = vrot.slane %v7244_v34, 3  ;;  %v327_v34 = vld [vmem:[%s4959_s12 + $0x18] sm:$0xff] }
 0x45f   : > { %v3893_v51 = vadd.f32 %v3780_v53, %v3481_v36  ;;  %4433 = vmatmul.msk.bf16.gmra.mxu2 %vm635_vm2, %v2410_v19  ;;  %v3149_v36 = vrot.slane %v7249_v37, 3 }
 0x460   : > { %4501 = vmatmul.msk.bf16.gmra.mxu0 %vm635_vm2, %v3569_v4  ;;  %v3146_v17 = vor.u32 %v3145_v7, %v3144_v1 }
 0x461   : > { %v3963_v63 = vadd.f32 %v6444_v45, %v3893_v51 }
 0x462   : > { %v2881_v54 = vpop.f32.mrf.mxu2  ;;  %v2624_v12 = vpop.f32.mrf.mxu1  ;;  %v3147_v5 = vsel %vm3024_vm5, %v3142_v61, %v3146_v17 }
 0x463   : > { %v4029_v57 = vmax.f32 %v3963_v63, 0.0  ;;  %v2992_v29 = vadd.f32 %v2881_v54, %v2733_v16  ;;  %v6513_v56 = vpop.f32.mrf.mxu3  ;;  %v2734_v24 = vadd.f32 %v2624_v12, %v7246_v20 }
 0x465   : > { %4095 = vst [vmem:[%s6096_s28 + $0x118] sm:$0xff] %v4029_v57  ;;  %v3482_v49 = vadd.f32 %v6457_v27, %v2992_v29  ;;  %v3785_v55 = vpop.f32.mrf.mxu0  ;;  %v2412_v27 = vsel %vm2353_vm6, %v2409_v26, %v2411_v11  ;;  %v7250_v57 = vld [vmem:[#allocation82_spill] sm:$0xff] }
 0x467   : > { %v3894_v33 = vadd.f32 %v3783_v35, %v3482_v49  ;;  %4470 = vmatmul.msk.bf16.gmra.mxu3 %vm635_vm2, %v3147_v5 }
 0x469   : > { %v3964_v42 = vadd.f32 %v6444_v45, %v3894_v33 }
 0x46a   : > { %v2883_v62 = vpop.f32.mrf.mxu2  ;;  %v2627_v53 = vpop.f32.mrf.mxu1 }
 0x46b   : > { %v4030_v10 = vmax.f32 %v3964_v42, 0.0  ;;  %v2993_v47 = vadd.f32 %v2883_v62, %v2734_v24  ;;  %v6526_v61 = vpop.f32.mrf.mxu3  ;;  %v2735_v26 = vadd.f32 %v2627_v53, %v7247_v31  ;;  %v6550_v42 = vpack.c.bf16 %v327_v34, %v4524_v44  ;;  %v7251_v62 = vld [vmem:[#allocation84_spill] sm:$0xff] }
 0x46d   : > { %4096 = vst [vmem:[%s6096_s28 + $0x120] sm:$0xff] %v4030_v10  ;;  %v3483_v23 = vadd.f32 %v6467_v38, %v2993_v47  ;;  %v3788_v14 = vpop.f32.mrf.mxu0  ;;  %4400 = vmatmul.msk.bf16.gmra.mxu1 %vm635_vm2, %v2410_v19  ;;  %v3148_v19 = vrot.slane %v7248_v32, 2  ;;  %v3153_v10 = vshrl.u32 %v6550_v42, 16  ;;  %v3156_v47 = vshll.u32 %v6550_v42, 16 }
 0x46f   : > { %v3895_v28 = vadd.f32 %v3785_v55, %v3483_v23  ;;  %4434 = vmatmul.msk.bf16.gmra.mxu2 %vm635_vm2, %v2412_v27  ;;  %v3150_v51 = vor.u32 %v3149_v36, %v3148_v19  ;;  %v2414_v55 = vsel %vm2353_vm6, %v2411_v11, %v2413_v13  ;;  %v3155_v15 = vrot.slane %v3153_v10, 2  ;;  %v7254_v10 = vld [vmem:[#allocation93_spill] sm:$0xff] }
 0x470   : > { %4502 = vmatmul.msk.bf16.gmra.mxu0 %vm635_vm2, %v3571_v48  ;;  %v3574_v19 = vrot.slane %v7095_v21, 3 }
 0x471   : > { %v3965_v52 = vadd.f32 %v6444_v45, %v3895_v28  ;;  %v3151_v1 = vsel %vm3024_vm5, %v3146_v17, %v3150_v51 }
 0x472   : > { %v2886_v38 = vpop.f32.mrf.mxu2  ;;  %v2629_v25 = vpop.f32.mrf.mxu1 }
 0x473   : > { %v4031_v46 = vmax.f32 %v3965_v52, 0.0  ;;  %v2994_v3 = vadd.f32 %v2886_v38, %v2735_v26  ;;  %v6538_v16 = vpop.f32.mrf.mxu3  ;;  %v2736_v29 = vadd.f32 %v2629_v25, %v7250_v57  ;;  %v2415_v26 = vrot.slane %v7095_v21, 2  ;;  %v328_v21 = vld [vmem:[%s4959_s12 + $0x20] sm:$0xff] }
 0x474   : > { %v3575_v57 = vsel %vm3514_vm7, %v3572_v39, %v3574_v19 }
 0x475   : > { %4097 = vst [vmem:[%s6096_s28 + $0x128] sm:$0xff] %v4031_v46  ;;  %v3484_v35 = vadd.f32 %v6480_v22, %v2994_v3  ;;  %v3790_v4 = vpop.f32.mrf.mxu0  ;;  %v7252_v3 = vld [vmem:[#allocation50_spill] sm:$0xff] }
 0x477   : > { %v3896_v63 = vadd.f32 %v3788_v14, %v3484_v35  ;;  %4471 = vmatmul.msk.bf16.gmra.mxu3 %vm635_vm2, %v3151_v1  ;;  %v3158_v14 = vrot.slane %v3156_v47, 3  ;;  %v7253_v1 = vld [vmem:[#allocation90_spill] sm:$0xff] }
 0x479   : > { %v3966_v54 = vadd.f32 %v6444_v45, %v3896_v63  ;;  %v3159_v52 = vor.u32 %v3158_v14, %v3155_v15 }
 0x47a   : > { %v2888_v12 = vpop.f32.mrf.mxu2  ;;  %v2632_v49 = vpop.f32.mrf.mxu1 }
 0x47b   : > { %v4032_v22 = vmax.f32 %v3966_v54, 0.0  ;;  %v2995_v7 = vadd.f32 %v2888_v12, %v2736_v29  ;;  %v6555_v24 = vpop.f32.mrf.mxu3  ;;  %v3160_v37 = vsel %vm3024_vm5, %v3150_v51, %v3159_v52  ;;  %v6581_v12 = vpack.c.bf16 %v328_v21, %v328_v21 }
 0x47c   : > { %v3578_v21 = vrot.slane %v6550_v42, 3 }
 0x47d   : > { %4098 = vst [vmem:[%s6096_s28 + $0x130] sm:$0xff] %v4032_v22  ;;  %v3485_v33 = vadd.f32 %v6490_v40, %v2995_v7  ;;  %v3793_v20 = vpop.f32.mrf.mxu0  ;;  %4401 = vmatmul.msk.bf16.gmra.mxu1 %vm635_vm2, %v2412_v27  ;;  %v2737_v40 = vadd.f32 %v2632_v49, %v7251_v62  ;;  %v3162_v22 = vshrl.u32 %v6581_v12, 16  ;;  %v3165_v39 = vshll.u32 %v6581_v12, 16 }
 0x47e   : > { %v6591_v62 = vrot.slane %v5761_v41, 2 }
 0x47f   : > { %v3897_v17 = vadd.f32 %v3790_v4, %v3485_v33  ;;  %4435 = vmatmul.msk.bf16.gmra.mxu2 %vm635_vm2, %v2414_v55  ;;  %v2416_v4 = vsel %vm2353_vm6, %v2413_v13, %v2415_v26  ;;  %v3164_v33 = vrot.slane %v3162_v22, 2  ;;  %v3167_v44 = vrot.slane %v3165_v39, 3 }
 0x480   : > { %4503 = vmatmul.msk.bf16.gmra.mxu0 %vm635_vm2, %v3573_v43 }
 0x481   : > { %v3967_v11 = vadd.f32 %v6444_v45, %v3897_v17  ;;  %v3168_v17 = vor.u32 %v3167_v44, %v3164_v33 }
 0x482   : > { %v2891_v5 = vpop.f32.mrf.mxu2  ;;  %v2634_v23 = vpop.f32.mrf.mxu1 }
 0x483   : > { %v4033_v53 = vmax.f32 %v3967_v11, 0.0  ;;  %v2996_v27 = vadd.f32 %v2891_v5, %v2737_v40  ;;  %v6565_v38 = vpop.f32.mrf.mxu3  ;;  %v2738_v25 = vadd.f32 %v2634_v23, %v7252_v3  ;;  %v3169_v23 = vsel %vm3024_vm5, %v3159_v52, %v3168_v17  ;;  %v7255_v3 = vld [vmem:[#allocation96_spill] sm:$0xff] }
 0x485   : > { %4099 = vst [vmem:[%s6096_s28 + $0x138] sm:$0xff] %v4033_v53  ;;  %v3486_v48 = vadd.f32 %v6503_v60, %v2996_v27  ;;  %v3795_v28 = vpop.f32.mrf.mxu0  ;;  %v3576_v27 = vrot.slane %v5761_v41, 3 }
 0x487   : > { %v3898_v31 = vadd.f32 %v3793_v20, %v3486_v48  ;;  %4472 = vmatmul.msk.bf16.gmra.mxu3 %vm635_vm2, %v3160_v37  ;;  %v2418_v48 = vsel %vm2353_vm6, %v2415_v26, %v6591_v62 }
 0x489   : > { %v3968_v46 = vadd.f32 %v6444_v45, %v3898_v31 }
 0x48a   : > { %v2893_v32 = vpop.f32.mrf.mxu2  ;;  %v2637_v60 = vpop.f32.mrf.mxu1 }
 0x48b   : > { %v4034_v36 = vmax.f32 %v3968_v46, 0.0  ;;  %v2997_v35 = vadd.f32 %v2893_v32, %v2738_v25  ;;  %v6579_v51 = vpop.f32.mrf.mxu3  ;;  %v3577_v46 = vsel %vm3514_vm7, %v3574_v19, %v3576_v27 }
 0x48d   : > { %4100 = vst [vmem:[%s6096_s28 + $0x140] sm:$0xff] %v4034_v36  ;;  %v3487_v63 = vadd.f32 %v6513_v56, %v2997_v35  ;;  %v3798_v54 = vpop.f32.mrf.mxu0  ;;  %4402 = vmatmul.msk.bf16.gmra.mxu1 %vm635_vm2, %v2414_v55  ;;  %v2739_v56 = vadd.f32 %v2637_v60, %v7253_v1 }
 0x48f   : > { %v3899_v29 = vadd.f32 %v3795_v28, %v3487_v63  ;;  %4436 = vmatmul.msk.bf16.gmra.mxu2 %vm635_vm2, %v2416_v4 }
 0x490   : > { %4504 = vmatmul.msk.bf16.gmra.mxu0 %vm635_vm2, %v3575_v57 }
 0x491   : > { %v3969_v13 = vadd.f32 %v6444_v45, %v3899_v29 }
 0x492   : > { %v2896_v34 = vpop.f32.mrf.mxu2  ;;  %v2639_v55 = vpop.f32.mrf.mxu1 }
 0x493   : > { %v4035_v7 = vmax.f32 %v3969_v13, 0.0  ;;  %v2998_v49 = vadd.f32 %v2896_v34, %v2739_v56  ;;  %v6593_v40 = vpop.f32.mrf.mxu3  ;;  %v2740_v47 = vadd.f32 %v2639_v55, %v7254_v10  ;;  %v7257_v10 = vld [vmem:[#allocation87_spill] sm:$0xff] }
 0x495   : > { %4101 = vst [vmem:[%s6096_s28 + $0x148] sm:$0xff] %v4035_v7  ;;  %v3488_v20 = vadd.f32 %v6526_v61, %v2998_v49  ;;  %v3800_v43 = vpop.f32.mrf.mxu0  ;;  %v3579_v7 = vsel %vm3514_vm7, %v3576_v27, %v3578_v21 }
 0x497   : > { %v3900_v11 = vadd.f32 %v3798_v54, %v3488_v20  ;;  %4473 = vmatmul.msk.bf16.gmra.mxu3 %vm635_vm2, %v3169_v23  ;;  %v7256_v54 = vld [vmem:[#allocation99_spill] sm:$0xff] }
 0x499   : > { %v3970_v5 = vadd.f32 %v6444_v45, %v3900_v11 }
 0x49a   : > { %v2898_v53 = vpop.f32.mrf.mxu2  ;;  %v2642_v61 = vpop.f32.mrf.mxu1 }
 0x49b   : > { %v4036_v15 = vmax.f32 %v3970_v5, 0.0  ;;  %v2999_v14 = vadd.f32 %v2898_v53, %v2740_v47  ;;  %v2741_v25 = vadd.f32 %v2642_v61, %v7255_v3  ;;  %v6610_v32 = vpop.f32.mrf.mxu3  ;;  %v2419_v47 = vrot.slane %v7257_v10, 2  ;;  %v7258_v3 = vld [vmem:[#allocation102_spill] sm:$0xff] }
 0x49c   : > { %v2771_v53 = vrot.slane %v6581_v12, 2 }
 0x49d   : > { %4102 = vst [vmem:[%s6096_s28 + $0x150] sm:$0xff] %v4036_v15  ;;  %v3489_v28 = vadd.f32 %v6538_v16, %v2999_v14  ;;  %v3803_v31 = vpop.f32.mrf.mxu0  ;;  %4403 = vmatmul.msk.bf16.gmra.mxu1 %vm635_vm2, %v2416_v4  ;;  %v2769_v4 = vrot.slane %v6550_v42, 2  ;;  %v3580_v15 = vrot.slane %v6581_v12, 3 }
 0x49f   : > { %v3901_v41 = vadd.f32 %v3800_v43, %v3489_v28  ;;  %4437 = vmatmul.msk.bf16.gmra.mxu2 %vm635_vm2, %v2418_v48  ;;  %v2770_v34 = vsel %vm2353_vm6, %v6591_v62, %v2769_v4  ;;  %v2772_v28 = vsel %vm2353_vm6, %v2769_v4, %v2771_v53 }
 0x4a0   : > { %4505 = vmatmul.msk.bf16.gmra.mxu0 %vm635_vm2, %v3577_v46 }
 0x4a1   : > { %v3971_v52 = vadd.f32 %v6444_v45, %v3901_v41 }
 0x4a2   : > { %v2901_v26 = vpop.f32.mrf.mxu2  ;;  %v2644_v36 = vpop.f32.mrf.mxu1 }
 0x4a3   : > { %v4037_v16 = vmax.f32 %v3971_v52, 0.0  ;;  %v3000_v37 = vadd.f32 %v2901_v26, %v2741_v25  ;;  %v2742_v57 = vadd.f32 %v2644_v36, %v7256_v54  ;;  %v3403_v22 = vpop.f32.mrf.mxu3 }
 0x4a5   : > { %4103 = vst [vmem:[%s6096_s28 + $0x158] sm:$0xff] %v4037_v16  ;;  %v3490_v35 = vadd.f32 %v6555_v24, %v3000_v37  ;;  %v3805_v19 = vpop.f32.mrf.mxu0 }
 0x4a7   : > { %v3902_v60 = vadd.f32 %v3803_v31, %v3490_v35 }
 0x4a9   : > { %v3972_v63 = vadd.f32 %v6444_v45, %v3902_v60  ;;  %v7259_v60 = vld [vmem:[#allocation28_spill] sm:$0xff] }
 0x4aa   : > { %v2903_v29 = vpop.f32.mrf.mxu2  ;;  %v2647_v56 = vpop.f32.mrf.mxu1 }
 0x4ab   : > { %v4038_v13 = vmax.f32 %v3972_v63, 0.0  ;;  %v3001_v1 = vadd.f32 %v2903_v29, %v2742_v57  ;;  %v2743_v55 = vadd.f32 %v2647_v56, %v5846_v0  ;;  %v3406_v11 = vpop.f32.mrf.mxu3 }
 0x4ad   : > { %4104 = vst [vmem:[%s6096_s28 + $0x160] sm:$0xff] %v4038_v13  ;;  %v3491_v24 = vadd.f32 %v6565_v38, %v3001_v1  ;;  %v3808_v39 = vpop.f32.mrf.mxu0  ;;  %4404 = vmatmul.msk.bf16.gmra.mxu1 %vm635_vm2, %v2418_v48 }
 0x4af   : > { %v3903_v49 = vadd.f32 %v3805_v19, %v3491_v24  ;;  %4438 = vmatmul.msk.bf16.gmra.mxu2 %vm635_vm2, %v2770_v34  ;;  %v7260_v24 = vld [vmem:[#allocation17_spill] sm:$0xff] }
 0x4b0   : > { %4506 = vmatmul.msk.bf16.gmra.mxu0 %vm635_vm2, %v3579_v7 }
 0x4b1   : > { %v3973_v42 = vadd.f32 %v6444_v45, %v3903_v49 }
 0x4b2   : > { %v2906_v33 = vpop.f32.mrf.mxu2  ;;  %v2649_v43 = vpop.f32.mrf.mxu1 }
 0x4b3   : > { %v4039_v44 = vmax.f32 %v3973_v42, 0.0  ;;  %v3002_v20 = vadd.f32 %v2906_v33, %v2743_v55  ;;  %v2744_v0 = vadd.f32 %v2649_v43, %v5861_v2  ;;  %v3581_v2 = vsel %vm3514_vm7, %v3578_v21, %v3580_v15  ;;  %v3408_v12 = vpop.f32.mrf.mxu3 }
 0x4b5   : > { %4105 = vst [vmem:[%s6096_s28 + $0x168] sm:$0xff] %v4039_v44  ;;  %v3492_v38 = vadd.f32 %v6579_v51, %v3002_v20  ;;  %v3810_v17 = vpop.f32.mrf.mxu0  ;;  %v2420_v51 = vsel %vm2353_vm6, %v6591_v62, %v2419_v47 }
 0x4b7   : > { %v3904_v5 = vadd.f32 %v3808_v39, %v3492_v38  ;;  %v7261_v38 = vld [vmem:[#allocation37_spill] sm:$0xff] }
 0x4b9   : > { %v3974_v27 = vadd.f32 %v6444_v45, %v3904_v5 }
 0x4ba   : > { %v2908_v23 = vpop.f32.mrf.mxu2  ;;  %v2652_v48 = vpop.f32.mrf.mxu1 }
 0x4bb   : > { %v4040_v14 = vmax.f32 %v3974_v27, 0.0  ;;  %v3003_v61 = vadd.f32 %v2908_v23, %v2744_v0  ;;  %v2745_v25 = vadd.f32 %v2652_v48, %v7258_v3  ;;  %v3411_v54 = vpop.f32.mrf.mxu3 }
 0x4bd   : > { %4106 = vst [vmem:[%s6096_s28 + $0x170] sm:$0xff] %v4040_v14  ;;  %v3493_v31 = vadd.f32 %v6593_v40, %v3003_v61  ;;  %v3813_v46 = vpop.f32.mrf.mxu0  ;;  %4405 = vmatmul.msk.bf16.gmra.mxu1 %vm635_vm2, %v2420_v51  ;;  %v7262_v14 = vld [vmem:[#allocation29_spill] sm:$0xff] }
 0x4bf   : > { %v3905_v41 = vadd.f32 %v3810_v17, %v3493_v31  ;;  %4439 = vmatmul.msk.bf16.gmra.mxu2 %vm635_vm2, %v2772_v28 }
 0x4c0   : > { %4507 = vmatmul.msk.bf16.gmra.mxu0 %vm635_vm2, %v3581_v2 }
 0x4c1   : > { %v3975_v52 = vadd.f32 %v6444_v45, %v3905_v41 }
 0x4c2   : > { %v2911_v62 = vpop.f32.mrf.mxu2  ;;  %v2654_v40 = vpop.f32.mrf.mxu1 }
 0x4c3   : > { %v4041_v26 = vmax.f32 %v3975_v52, 0.0  ;;  %v3004_v16 = vadd.f32 %v2911_v62, %v2745_v25  ;;  %v2746_v4 = vadd.f32 %v2654_v40, %v7259_v60  ;;  %v3413_v55 = vpop.f32.mrf.mxu3 }
 0x4c5   : > { %4107 = vst [vmem:[%s6096_s28 + $0x178] sm:$0xff] %v4041_v26  ;;  %v3494_v37 = vadd.f32 %v6610_v32, %v3004_v16  ;;  %v3815_v36 = vpop.f32.mrf.mxu0 }
 0x4c7   : > { %v3906_v35 = vadd.f32 %v3813_v46, %v3494_v37 }
 0x4c9   : > { %v3976_v19 = vadd.f32 %v6444_v45, %v3906_v35 }
 0x4ca   : > { %v2913_v63 = vpop.f32.mrf.mxu2  ;;  %v2657_v21 = vpop.f32.mrf.mxu1 }
 0x4cb   : > { %v4042_v57 = vmax.f32 %v3976_v19, 0.0  ;;  %v3005_v29 = vadd.f32 %v2913_v63, %v2746_v4  ;;  %v2747_v32 = vadd.f32 %v2657_v21, %v7260_v24  ;;  %v3416_v0 = vpop.f32.mrf.mxu3  ;;  %v7264_v19 = vld [vmem:[#allocation108_spill] sm:$0xff] }
 0x4cd   : > { %4108 = vst [vmem:[%s6096_s28 + $0x180] sm:$0xff] %v4042_v57  ;;  %v3495_v13 = vadd.f32 %v3403_v22, %v3005_v29  ;;  %v3818_v1 = vpop.f32.mrf.mxu0 }
 0x4cf   : > { %v3907_v56 = vadd.f32 %v3815_v36, %v3495_v13 }
 0x4d1   : > { %v3977_v34 = vadd.f32 %v6444_v45, %v3907_v56 }
 0x4d2   : > { %v2916_v39 = vpop.f32.mrf.mxu2  ;;  %v2659_v42 = vpop.f32.mrf.mxu1 }
 0x4d3   : > { %v4043_v7 = vmax.f32 %v3977_v34, 0.0  ;;  %v3006_v49 = vadd.f32 %v2916_v39, %v2747_v32  ;;  %v2748_v22 = vadd.f32 %v2659_v42, %v7261_v38  ;;  %v3418_v41 = vpop.f32.mrf.mxu3  ;;  %v7265_v34 = vld [vmem:[#allocation46_spill] sm:$0xff] }
 0x4d5   : > { %4109 = vst [vmem:[%s6096_s28 + $0x188] sm:$0xff] %v4043_v7  ;;  %v3496_v33 = vadd.f32 %v3406_v11, %v3006_v49  ;;  %v3820_v44 = vpop.f32.mrf.mxu0 }
 0x4d7   : > { %v3908_v20 = vadd.f32 %v3818_v1, %v3496_v33 }
 0x4d9   : > { %v3978_v43 = vadd.f32 %v6444_v45, %v3908_v20 }
 0x4da   : > { %v2918_v17 = vpop.f32.mrf.mxu2  ;;  %v2662_v47 = vpop.f32.mrf.mxu1 }
 0x4db   : > { %v4044_v5 = vmax.f32 %v3978_v43, 0.0  ;;  %v3007_v10 = vadd.f32 %v2918_v17, %v2748_v22  ;;  %v2749_v11 = vadd.f32 %v2662_v47, %v7262_v14  ;;  %v3421_v63 = vpop.f32.mrf.mxu3  ;;  %v7266_v43 = vld [vmem:[#allocation38_spill] sm:$0xff] }
 0x4dd   : > { %4110 = vst [vmem:[%s6096_s28 + $0x190] sm:$0xff] %v4044_v5  ;;  %v3497_v53 = vadd.f32 %v3408_v12, %v3007_v10  ;;  %v3823_v27 = vpop.f32.mrf.mxu0  ;;  %v7263_v12 = vld [vmem:[#allocation105_spill] sm:$0xff] }
 0x4df   : > { %v3909_v23 = vadd.f32 %v3820_v44, %v3497_v53 }
 0x4e1   : > { %v3979_v15 = vadd.f32 %v6444_v45, %v3909_v23 }
 0x4e2   : > { %v2921_v61 = vpop.f32.mrf.mxu2  ;;  %v2664_v28 = vpop.f32.mrf.mxu1 }
 0x4e3   : > { %v4045_v48 = vmax.f32 %v3979_v15, 0.0  ;;  %v3008_v51 = vadd.f32 %v2921_v61, %v2749_v11  ;;  %v2750_v3 = vadd.f32 %v2664_v28, %v7263_v12  ;;  %v3423_v42 = vpop.f32.mrf.mxu3  ;;  %v7267_v15 = vld [vmem:[#allocation61_spill] sm:$0xff] }
 0x4e5   : > { %4111 = vst [vmem:[%s6096_s28 + $0x198] sm:$0xff] %v4045_v48  ;;  %v3498_v31 = vadd.f32 %v3411_v54, %v3008_v51  ;;  %v3825_v46 = vpop.f32.mrf.mxu0 }
 0x4e7   : > { %v3910_v2 = vadd.f32 %v3823_v27, %v3498_v31 }
 0x4e9   : > { %v3980_v52 = vadd.f32 %v6444_v45, %v3910_v2 }
 0x4ea   : > { %v2923_v25 = vpop.f32.mrf.mxu2  ;;  %v2667_v16 = vpop.f32.mrf.mxu1 }
 0x4eb   : > { %v4046_v62 = vmax.f32 %v3980_v52, 0.0  ;;  %v3009_v26 = vadd.f32 %v2923_v25, %v2750_v3  ;;  %v2751_v60 = vadd.f32 %v2667_v16, %v7264_v19  ;;  %v3426_v27 = vpop.f32.mrf.mxu3 }
 0x4ed   : > { %4112 = vst [vmem:[%s6096_s28 + $0x1a0] sm:$0xff] %v4046_v62  ;;  %v3499_v40 = vadd.f32 %v3413_v55, %v3009_v26  ;;  %v3828_v37 = vpop.f32.mrf.mxu0 }
 0x4ef   : > { %v3911_v36 = vadd.f32 %v3825_v46, %v3499_v40 }
 0x4f1   : > { %v3981_v35 = vadd.f32 %v6444_v45, %v3911_v36 }
 0x4f2   : > { %v2926_v4 = vpop.f32.mrf.mxu2  ;;  %v2669_v29 = vpop.f32.mrf.mxu1 }
 0x4f3   : > { %v4047_v54 = vmax.f32 %v3981_v35, 0.0  ;;  %v3010_v57 = vadd.f32 %v2926_v4, %v2751_v60  ;;  %v2752_v24 = vadd.f32 %v2669_v29, %v7265_v34  ;;  %v3428_v2 = vpop.f32.mrf.mxu3 }
 0x4f5   : > { %4113 = vst [vmem:[%s6096_s28 + $0x1a8] sm:$0xff] %v4047_v54  ;;  %v3500_v21 = vadd.f32 %v3416_v0, %v3010_v57  ;;  %v3830_v13 = vpop.f32.mrf.mxu0 }
 0x4f7   : > { %v3912_v1 = vadd.f32 %v3828_v37, %v3500_v21 }
 0x4f9   : > { %v3982_v56 = vadd.f32 %v6444_v45, %v3912_v1 }
 0x4fa   : > { %v2928_v32 = vpop.f32.mrf.mxu2  ;;  %v2672_v49 = vpop.f32.mrf.mxu1 }
 0x4fb   : > { %v4048_v39 = vmax.f32 %v3982_v56, 0.0  ;;  %v3011_v7 = vadd.f32 %v2928_v32, %v2752_v24  ;;  %v2753_v38 = vadd.f32 %v2672_v49, %v7266_v43  ;;  %v3431_v19 = vpop.f32.mrf.mxu3 }
 0x4fd   : > { %4114 = vst [vmem:[%s6096_s28 + $0x1b0] sm:$0xff] %v4048_v39  ;;  %v3501_v55 = vadd.f32 %v3418_v41, %v3011_v7  ;;  %v3833_v33 = vpop.f32.mrf.mxu0 }
 0x4ff   : > { %v3913_v44 = vadd.f32 %v3830_v13, %v3501_v55 }
 0x501   : > { %v3983_v20 = vadd.f32 %v6444_v45, %v3913_v44 }
 0x502   : > { %v2931_v22 = vpop.f32.mrf.mxu2  ;;  %v2674_v10 = vpop.f32.mrf.mxu1 }
 0x503   : > { %v4049_v17 = vmax.f32 %v3983_v20, 0.0  ;;  %v3012_v5 = vadd.f32 %v2931_v22, %v2753_v38  ;;  %v2754_v14 = vadd.f32 %v2674_v10, %v7267_v15 }
 0x505   : > { %4115 = vst [vmem:[%s6096_s28 + $0x1b8] sm:$0xff] %v4049_v17  ;;  %v3502_v47 = vadd.f32 %v3421_v63, %v3012_v5  ;;  %v3835_v53 = vpop.f32.mrf.mxu0 }
 0x507   : > { %v3914_v0 = vadd.f32 %v3833_v33, %v3502_v47 }
 0x509   : > { %v3984_v23 = vadd.f32 %v6444_v45, %v3914_v0 }
 0x50a   : > { %v2933_v11 = vpop.f32.mrf.mxu2  ;;  %v2677_v51 = vpop.f32.mrf.mxu1 }
 0x50b   : > { %v4050_v61 = vmax.f32 %v3984_v23, 0.0  ;;  %v3013_v48 = vadd.f32 %v2933_v11, %v2754_v14  ;;  %v2755_v52 = vadd.f32 %v2677_v51, %v5989_v59 }
 0x50d   : > { %4116 = vst [vmem:[%s6096_s28 + $0x1c0] sm:$0xff] %v4050_v61  ;;  %v3503_v28 = vadd.f32 %v3423_v42, %v3013_v48  ;;  %v3838_v31 = vpop.f32.mrf.mxu0 }
 0x50f   : > { %v3915_v46 = vadd.f32 %v3835_v53, %v3503_v28 }
 0x511   : > { %v3985_v41 = vadd.f32 %v6444_v45, %v3915_v46 }
 0x512   : > { %v2936_v12 = vpop.f32.mrf.mxu2  ;;  %v2679_v62 = vpop.f32.mrf.mxu1 }
 0x513   : > { %v4051_v3 = vmax.f32 %v3985_v41, 0.0  ;;  %v3014_v25 = vadd.f32 %v2936_v12, %v2755_v52  ;;  %v2756_v36 = vadd.f32 %v2679_v62, %v6003_v8  ;;  %v3433_v8 = vpop.f32.mrf.mxu3 }
 0x515   : > { %4117 = vst [vmem:[%s6096_s28 + $0x1c8] sm:$0xff] %v4051_v3  ;;  %v3504_v26 = vadd.f32 %v3426_v27, %v3014_v25  ;;  %v3840_v16 = vpop.f32.mrf.mxu0 }
 0x517   : > { %v3916_v40 = vadd.f32 %v3838_v31, %v3504_v26 }
 0x519   : > { %v3986_v37 = vadd.f32 %v6444_v45, %v3916_v40 }
 0x51a   : > { %v2938_v35 = vpop.f32.mrf.mxu2  ;;  %v2682_v63 = vpop.f32.mrf.mxu1 }
 0x51b   : > { %v4052_v60 = vmax.f32 %v3986_v37, 0.0  ;;  %v3015_v4 = vadd.f32 %v2938_v35, %v2756_v36  ;;  %v2757_v21 = vadd.f32 %v2682_v63, %v6012_v58  ;;  %v3436_v20 = vpop.f32.mrf.mxu3 }
 0x51d   : > { %4118 = vst [vmem:[%s6096_s28 + $0x1d0] sm:$0xff] %v4052_v60  ;;  %v3505_v59 = vadd.f32 %v3428_v2, %v3015_v4  ;;  %v3843_v54 = vpop.f32.mrf.mxu0 }
 0x51f   : > { %v3917_v57 = vadd.f32 %v3840_v16, %v3505_v59 }
 0x521   : > { %v3987_v29 = vadd.f32 %v6444_v45, %v3917_v57 }
 0x522   : > { %v2941_v13 = vpop.f32.mrf.mxu2  ;;  %v2684_v34 = vpop.f32.mrf.mxu1 }
 0x523   : > { %v4053_v1 = vmax.f32 %v3987_v29, 0.0  ;;  %v3016_v56 = vadd.f32 %v2941_v13, %v2757_v21  ;;  %v2758_v49 = vadd.f32 %v2684_v34, %v6026_v6  ;;  %v3438_v0 = vpop.f32.mrf.mxu3 }
 0x525   : > { %4119 = vst [vmem:[%s6096_s28 + $0x1d8] sm:$0xff] %v4053_v1  ;;  %v3506_v24 = vadd.f32 %v3431_v19, %v3016_v56  ;;  %v3845_v32 = vpop.f32.mrf.mxu0 }
 0x527   : > { %v3918_v39 = vadd.f32 %v3843_v54, %v3506_v24 }
 0x529   : > { %v3988_v7 = vadd.f32 %v6444_v45, %v3918_v39 }
 0x52a   : > { %v2943_v42 = vpop.f32.mrf.mxu2  ;;  %v2687_v44 = vpop.f32.mrf.mxu1 }
 0x52b   : > { %v4054_v55 = vmax.f32 %v3988_v7, 0.0  ;;  %v3017_v33 = vadd.f32 %v2943_v42, %v2758_v49  ;;  %v2759_v17 = vadd.f32 %v2687_v44, %v6035_v9  ;;  %v3441_v2 = vpop.f32.mrf.mxu3 }
 0x52d   : > { %4120 = vst [vmem:[%s6096_s28 + $0x1e0] sm:$0xff] %v4054_v55  ;;  %v3507_v58 = vadd.f32 %v3433_v8, %v3017_v33  ;;  %v3848_v38 = vpop.f32.mrf.mxu0 }
 0x52f   : > { %v3919_v43 = vadd.f32 %v3845_v32, %v3507_v58 }
 0x531   : > { %v3989_v22 = vadd.f32 %v6444_v45, %v3919_v43 }
 0x532   : > { %v2946_v5 = vpop.f32.mrf.mxu2  ;;  %v2689_v53 = vpop.f32.mrf.mxu1 }
 0x533   : > { %v4055_v10 = vmax.f32 %v3989_v22, 0.0  ;;  %v3018_v47 = vadd.f32 %v2946_v5, %v2759_v17  ;;  %v2760_v15 = vadd.f32 %v2689_v53, %v6049_v18  ;;  %v3443_v35 = vpop.f32.mrf.mxu3 }
 0x535   : > { %4121 = vst [vmem:[%s6096_s28 + $0x1e8] sm:$0xff] %v4055_v10  ;;  %v3508_v6 = vadd.f32 %v3436_v20, %v3018_v47  ;;  %v3850_v14 = vpop.f32.mrf.mxu0 }
 0x537   : > { %v3920_v27 = vadd.f32 %v3848_v38, %v3508_v6 }
 0x539   : > { %v3990_v23 = vadd.f32 %v6444_v45, %v3920_v27 }
 0x53a   : > { %v2948_v11 = vpop.f32.mrf.mxu2  ;;  %v2692_v51 = vpop.f32.mrf.mxu1 }
 0x53b   : > { %v4056_v61 = vmax.f32 %v3990_v23, 0.0  ;;  %v3019_v48 = vadd.f32 %v2948_v11, %v2760_v15  ;;  %v2761_v46 = vadd.f32 %v2692_v51, %v6058_v30 }
 0x53d   : > { %4122 = vst [vmem:[%s6096_s28 + $0x1f0] sm:$0xff] %v4056_v61  ;;  %v3509_v9 = vadd.f32 %v3438_v0, %v3019_v48  ;;  %v3853_v3 = vpop.f32.mrf.mxu0 }
 0x53f   : > { %v3921_v28 = vadd.f32 %v3850_v14, %v3509_v9 }
 0x541   : > { %v3991_v31 = vadd.f32 %v6444_v45, %v3921_v28 }
 0x542   : > { %v2951_v41 = vpop.f32.mrf.mxu2  ;;  %v2694_v25 = vpop.f32.mrf.mxu1 }
 0x543   : > { %v4057_v52 = vmax.f32 %v3991_v31, 0.0  ;;  %v3020_v12 = vadd.f32 %v2951_v41, %v2761_v46  ;;  %v2762_v16 = vadd.f32 %v2694_v25, %v6073_v50 }
 0x545   : > { %4123 = vst [vmem:[%s6096_s28 + $0x1f8] sm:$0xff] %v4057_v52  ;;  %v3510_v18 = vadd.f32 %v3441_v2, %v3020_v12  ;;  %v3855_v19 = vpop.f32.mrf.mxu0 }
 0x547   : > { %v3922_v62 = vadd.f32 %v3853_v3, %v3510_v18 }
 0x549   : > { %v3992_v26 = vadd.f32 %v6444_v45, %v3922_v62 }
 0x54a   : > { %v2953_v40 = vpop.f32.mrf.mxu2 }
 0x54b   : > { %v4058_v37 = vmax.f32 %v3992_v26, 0.0  ;;  %v3021_v36 = vadd.f32 %v2953_v40, %v2762_v16 }
 0x54d   : > { %4124 = vst [vmem:[%s6096_s28 + $0x200] sm:$0xff] %v4058_v37  ;;  %v3511_v30 = vadd.f32 %v3443_v35, %v3021_v36 }
 0x54f   : > { %v3923_v60 = vadd.f32 %v3855_v19, %v3511_v30 }
 0x551   : > { %v3993_v4 = vadd.f32 %v6444_v45, %v3923_v60 }
 0x553   : > { %v4059_v63 = vmax.f32 %v3993_v4, 0.0 }
 0x555   : > { %4125 = vst [vmem:[%s6096_s28 + $0x208] sm:$0xff] %v4059_v63 }
 0x556 PF: > { %s14_s15 = sadd.s32 1, %s4531_s15  }
 0x557   : > { %p11_p6 = scmp.ge.s32.totalorder %s14_s15, 4  }
 0x559   :  { %13 = sbr.rel (!%p11_p6) target bundleno = 1 (0x1), region = 77 }

</bundles_post_ra>
